<compile_context>
chip_gen: v6e
topology: v6e:2x2x1
jax: 0.10.0
libtpu: 0.0.40
codegen_flags: <defaults>
</compile_context>

<pallas_src>
from functools import partial

import jax
import jax.numpy as jnp
from jax.experimental import pallas as pl
from jax.experimental.pallas import tpu as pltpu


def _double_conv_kernel(x_ref, w1_ref, s1_ref, w2_ref, s2_ref, o_ref,
                        xpad_ref, col1_ref, midpad_ref, col2_ref,
                        *, H, W, Cin, Cmid, Cout):
    """Fused (conv3x3 + BN + ReLU) x 2 for one batch element.

    x_ref     : (1, H, W, Cin)      input tile (un-padded)
    w1_ref    : (9*Cin, Cmid)       conv1 weights, BN1 scale pre-folded
    s1_ref    : (1, Cmid)           BN1 shift (beta - mean*scale)
    w2_ref    : (9*Cmid, Cout)      conv2 weights, BN2 scale pre-folded
    s2_ref    : (1, Cout)           BN2 shift
    o_ref     : (1, H, W, Cout)
    xpad_ref  : (H+2, W+2, Cin)     VMEM zero-halo buffer for the input
    col1_ref  : (H, W, 9*Cin)       VMEM im2col slab for conv1
    midpad_ref: (H+2, W+2, Cmid)    VMEM zero-halo buffer for the intermediate
    col2_ref  : (H, W, 9*Cmid)      VMEM im2col slab for conv2
    """
    f32 = jnp.float32

    # ---------------- stage 1: conv1 + bn1 + relu (+ dropout = id) ----------
    # Zero-pad into VMEM (replaces the old HBM jnp.pad). Re-zeroed every grid
    # step so it is safe under megacore grid sharding.
    xpad_ref[...] = jnp.zeros_like(xpad_ref)
    xpad_ref[pl.ds(1, H), pl.ds(1, W), :] = x_ref[0].astype(f32)

    # im2col: place the 9 shifted (H, W, Cin) windows side by side on the lane
    # axis -> one (H, W, 9*Cin) slab, contracted by a single MXU matmul.
    for kh in range(3):
        for kw in range(3):
            t = kh * 3 + kw
            col1_ref[:, :, pl.ds(t * Cin, Cin)] = (
                xpad_ref[pl.ds(kh, H), pl.ds(kw, W), :])

    acc1 = jax.lax.dot_general(
        col1_ref[...].astype(w1_ref.dtype), w1_ref[...],
        dimension_numbers=(((2,), (0,)), ((), ())),
        preferred_element_type=f32)                       # (H, W, Cmid), f32 acc
    # BN scale already folded into w1; epilogue = shift + ReLU, in f32.
    y1 = jnp.maximum(acc1 + s1_ref[...], 0.0)

    # ---------------- stage 2: conv2 + bn2 + relu (+ dropout = id) ----------
    # Intermediate stays in VMEM (no HBM writeback / re-read between stages).
    midpad_ref[...] = jnp.zeros_like(midpad_ref)
    midpad_ref[pl.ds(1, H), pl.ds(1, W), :] = y1

    for kh in range(3):
        for kw in range(3):
            t = kh * 3 + kw
            col2_ref[:, :, pl.ds(t * Cmid, Cmid)] = (
                midpad_ref[pl.ds(kh, H), pl.ds(kw, W), :])

    acc2 = jax.lax.dot_general(
        col2_ref[...].astype(w2_ref.dtype), w2_ref[...],
        dimension_numbers=(((2,), (0,)), ((), ())),
        preferred_element_type=f32)                       # (H, W, Cout), f32 acc
    y2 = jnp.maximum(acc2 + s2_ref[...], 0.0)

    o_ref[0] = y2.astype(o_ref.dtype)


def double_conv_fused(x_nhwc, w1_2d, shift1, w2_2d, shift2):
    """x_nhwc: (N,H,W,Cin); w1_2d: (9*Cin,Cmid); w2_2d: (9*Cmid,Cout); shifts: (1,C)."""
    N, H, W, Cin = x_nhwc.shape
    K1, Cmid = w1_2d.shape
    K2, Cout = w2_2d.shape
    assert K1 == 9 * Cin and K2 == 9 * Cmid

    kernel = partial(_double_conv_kernel, H=H, W=W, Cin=Cin, Cmid=Cmid, Cout=Cout)
    return pl.pallas_call(
        kernel,
        out_shape=jax.ShapeDtypeStruct((N, H, W, Cout), x_nhwc.dtype),
        grid_spec=pltpu.PrefetchScalarGridSpec(
            num_scalar_prefetch=0,
            grid=(N,),                                   # one batch element / step
            in_specs=[
                pl.BlockSpec((1, H, W, Cin), lambda n: (n, 0, 0, 0)),
                pl.BlockSpec((9 * Cin, Cmid), lambda n: (0, 0)),
                pl.BlockSpec((1, Cmid), lambda n: (0, 0)),
                pl.BlockSpec((9 * Cmid, Cout), lambda n: (0, 0)),
                pl.BlockSpec((1, Cout), lambda n: (0, 0)),
            ],
            out_specs=pl.BlockSpec((1, H, W, Cout), lambda n: (n, 0, 0, 0)),
            scratch_shapes=[
                pltpu.VMEM((H + 2, W + 2, Cin), jnp.float32),
                pltpu.VMEM((H, W, 9 * Cin), jnp.float32),
                pltpu.VMEM((H + 2, W + 2, Cmid), jnp.float32),
                pltpu.VMEM((H, W, 9 * Cmid), jnp.float32),
            ],
        ),
        # Batch axis is parallel -> megacore / v7x 2-TC sharding.
        # VMEM footprint here is ~130 KiB, well under the scoped default on all
        # generations, so no explicit vmem_limit_bytes is needed.
        compiler_params=pltpu.CompilerParams(dimension_semantics=("parallel",)),
    )(x_nhwc, w1_2d, shift1, w2_2d, shift2)


def _fold_bn_into_weights(w_hwio, gamma, beta, mean, var, eps=1e-5):
    """Fold BN scale into conv weights; return (9*Cin, Cout) weights + (1,Cout) shift."""
    scale = gamma / jnp.sqrt(var + eps)                   # (Cout,)
    shift = beta - mean * scale                           # (Cout,)
    w_folded = w_hwio * scale[None, None, None, :]        # scale over Cout
    kh, kw, cin, cout = w_hwio.shape
    return w_folded.reshape(kh * kw * cin, cout), shift[None, :]


def double_conv_forward(x_nchw, params, *, compute_dtype=jnp.float32):
    """DoubleConv.forward (eval mode). x_nchw: (N,Cin,H,W) -> (N,Cout,H,W).

    compute_dtype=jnp.bfloat16 feeds the MXU with bf16 operands (f32
    accumulation + f32 epilogue) — the preferred setting on v6e/v7x.
    """
    # Layout conversion once at the module boundary only (a full network
    # should stay NHWC throughout and skip these transposes entirely).
    x = jnp.transpose(x_nchw, (0, 2, 3, 1))               # NCHW -> NHWC
    w1, s1 = _fold_bn_into_weights(params["w1"], params["g1"], params["be1"],
                                   params["rm1"], params["rv1"])
    w2, s2 = _fold_bn_into_weights(params["w2"], params["g2"], params["be2"],
                                   params["rm2"], params["rv2"])
    y = double_conv_fused(x, w1.astype(compute_dtype), s1,
                          w2.astype(compute_dtype), s2)
    return jnp.transpose(y, (0, 3, 1, 2))                 # NHWC -> NCHW


def _reference_forward(x_nchw, params, eps=1e-5):
    """Pure-JAX reference (lax conv, unfolded BN) for verification."""
    def conv(x, w_hwio):
        return jax.lax.conv_general_dilated(
            x, w_hwio, window_strides=(1, 1), padding="SAME",
            dimension_numbers=("NCHW", "HWIO", "NCHW"))
    def bn_relu(y, g, b, rm, rv):
        s = g / jnp.sqrt(rv + eps)
        sh = b - rm * s
        return jnp.maximum(y * s[None, :, None, None] + sh[None, :, None, None], 0.0)
    y = bn_relu(conv(x_nchw, params["w1"]),
                params["g1"], params["be1"], params["rm1"], params["rv1"])
    y = bn_relu(conv(y, params["w2"]),
                params["g2"], params["be2"], params["rm2"], params["rv2"])
    return y


def make_params(key, in_channels, out_channels):
    ks = jax.random.split(key, 10)
    f32 = jnp.float32
    return dict(
        # conv weights in HWIO = (3, 3, Cin, Cout), no bias (matches nn.Conv2d(bias=False))
        w1=0.1 * jax.random.normal(ks[0], (3, 3, in_channels, out_channels), f32),
        w2=0.1 * jax.random.normal(ks[1], (3, 3, out_channels, out_channels), f32),
        g1=jax.random.uniform(ks[2], (out_channels,), f32, 0.5, 1.5),
        be1=0.1 * jax.random.normal(ks[3], (out_channels,), f32),
        rm1=0.1 * jax.random.normal(ks[4], (out_channels,), f32),
        rv1=jax.random.uniform(ks[5], (out_channels,), f32, 0.5, 1.5),
        g2=jax.random.uniform(ks[6], (out_channels,), f32, 0.5, 1.5),
        be2=0.1 * jax.random.normal(ks[7], (out_channels,), f32),
        rm2=0.1 * jax.random.normal(ks[8], (out_channels,), f32),
        rv2=jax.random.uniform(ks[9], (out_channels,), f32, 0.5, 1.5),
    )


if __name__ == "__main__":
    key = jax.random.PRNGKey(0)
    k_x, k_p = jax.random.split(key)

    N, Cin, Cout, H, W = 2, 4, 8, 16, 16
    dropout = 0.1  # inactive in eval mode
    x = jax.random.normal(k_x, (N, Cin, H, W), jnp.float32)   # NCHW like PyTorch
    params = make_params(k_p, Cin, Cout)

    ref = jax.block_until_ready(_reference_forward(x, params))

    # f32 path (exact eval-mode semantics of the PyTorch module)
    out = jax.block_until_ready(double_conv_forward(x, params))
    assert out.shape == (N, Cout, H, W), out.shape
    assert jnp.allclose(out, ref, atol=5e-4, rtol=5e-4), \
        float(jnp.max(jnp.abs(out - ref)))

    # bf16 MXU operands, f32 accumulation + epilogue (v6e/v7x fast path)
    out_bf16 = jax.block_until_ready(
        double_conv_forward(x, params, compute_dtype=jnp.bfloat16))
    assert out_bf16.shape == (N, Cout, H, W), out_bf16.shape
    assert jnp.allclose(out_bf16, ref, atol=1e-1, rtol=1e-1), \
        float(jnp.max(jnp.abs(out_bf16 - ref)))

    print("KERNEL_OK")
</pallas_src>

<mosaic_0001>
module attributes {stable_mosaic.version = 11 : i64} {
  func.func @_double_conv_kernel(%arg0: i32, %arg1: memref<1x16x16x4xf32, #tpu.memory_space<vmem>>, %arg2: memref<36x8xf32, #tpu.memory_space<vmem>>, %arg3: memref<1x8xf32, #tpu.memory_space<vmem>>, %arg4: memref<72x8xf32, #tpu.memory_space<vmem>>, %arg5: memref<1x8xf32, #tpu.memory_space<vmem>>, %arg6: memref<1x16x16x8xf32, #tpu.memory_space<vmem>>, %arg7: memref<18x18x4xf32, #tpu.memory_space<vmem>>, %arg8: memref<16x16x36xf32, #tpu.memory_space<vmem>>, %arg9: memref<18x18x8xf32, #tpu.memory_space<vmem>>, %arg10: memref<16x16x72xf32, #tpu.memory_space<vmem>>) attributes {dimension_semantics = [#tpu.dimension_semantics<parallel>], iteration_bounds = array<i64: 2>, scalar_prefetch = 0 : i64, scratch_operands = 4 : i64, tpu.core_type = #tpu.core_type<tc>, window_params = [{transform_indices = @transform_0, window_bounds = array<i64: 1, 16, 16, 4>}, {pipeline_mode = #tpu.pipeline_mode<synchronous>, transform_indices = @transform_1, window_bounds = array<i64: 36, 8>}, {pipeline_mode = #tpu.pipeline_mode<synchronous>, transform_indices = @transform_2, window_bounds = array<i64: 1, 8>}, {pipeline_mode = #tpu.pipeline_mode<synchronous>, transform_indices = @transform_3, window_bounds = array<i64: 72, 8>}, {pipeline_mode = #tpu.pipeline_mode<synchronous>, transform_indices = @transform_4, window_bounds = array<i64: 1, 8>}, {transform_indices = @transform_5, window_bounds = array<i64: 1, 16, 16, 8>}]} {
    %cst = arith.constant 0.000000e+00 : f32
    %0 = vector.broadcast %cst : f32 to vector<18x18x4xf32>
    %c0 = arith.constant 0 : index
    %c0_0 = arith.constant 0 : index
    %c0_1 = arith.constant 0 : index
    %1 = vector.load %arg7[%c0, %c0_0, %c0_1] : memref<18x18x4xf32, #tpu.memory_space<vmem>>, vector<18x18x4xf32>
    tpu.vector_store %arg7[%c0, %c0_0, %c0_1], %0 {strides = array<i32>} : memref<18x18x4xf32, #tpu.memory_space<vmem>>, vector<18x18x4xf32>,
    %c0_2 = arith.constant 0 : index
    %c0_3 = arith.constant 0 : index
    %c0_4 = arith.constant 0 : index
    %c0_5 = arith.constant 0 : index
    %2 = vector.load %arg1[%c0_2, %c0_3, %c0_4, %c0_5] : memref<1x16x16x4xf32, #tpu.memory_space<vmem>>, vector<1x16x16x4xf32>
    %3 = vector.shape_cast %2 : vector<1x16x16x4xf32> to vector<16x16x4xf32>
    %c1 = arith.constant 1 : index
    %c1_6 = arith.constant 1 : index
    %c0_7 = arith.constant 0 : index
    %4 = vector.load %arg7[%c1, %c1_6, %c0_7] : memref<18x18x4xf32, #tpu.memory_space<vmem>>, vector<16x16x4xf32>
    tpu.vector_store %arg7[%c1, %c1_6, %c0_7], %3 {strides = array<i32>} : memref<18x18x4xf32, #tpu.memory_space<vmem>>, vector<16x16x4xf32>,
    %c0_8 = arith.constant 0 : index
    %c0_9 = arith.constant 0 : index
    %c0_10 = arith.constant 0 : index
    %5 = vector.load %arg7[%c0_8, %c0_9, %c0_10] : memref<18x18x4xf32, #tpu.memory_space<vmem>>, vector<16x16x4xf32>
    %c0_11 = arith.constant 0 : index
    %c0_12 = arith.constant 0 : index
    %c0_13 = arith.constant 0 : index
    %6 = vector.load %arg8[%c0_11, %c0_12, %c0_13] : memref<16x16x36xf32, #tpu.memory_space<vmem>>, vector<16x16x4xf32>
    tpu.vector_store %arg8[%c0_11, %c0_12, %c0_13], %5 {strides = array<i32>} : memref<16x16x36xf32, #tpu.memory_space<vmem>>, vector<16x16x4xf32>,
    %c0_14 = arith.constant 0 : index
    %c1_15 = arith.constant 1 : index
    %c0_16 = arith.constant 0 : index
    %7 = vector.load %arg7[%c0_14, %c1_15, %c0_16] : memref<18x18x4xf32, #tpu.memory_space<vmem>>, vector<16x16x4xf32>
    %c0_17 = arith.constant 0 : index
    %c0_18 = arith.constant 0 : index
    %c4 = arith.constant 4 : index
    %8 = vector.load %arg8[%c0_17, %c0_18, %c4] : memref<16x16x36xf32, #tpu.memory_space<vmem>>, vector<16x16x4xf32>
    tpu.vector_store %arg8[%c0_17, %c0_18, %c4], %7 {strides = array<i32>} : memref<16x16x36xf32, #tpu.memory_space<vmem>>, vector<16x16x4xf32>,
    %c0_19 = arith.constant 0 : index
    %c2 = arith.constant 2 : index
    %c0_20 = arith.constant 0 : index
    %9 = vector.load %arg7[%c0_19, %c2, %c0_20] : memref<18x18x4xf32, #tpu.memory_space<vmem>>, vector<16x16x4xf32>
    %c0_21 = arith.constant 0 : index
    %c0_22 = arith.constant 0 : index
    %c8 = arith.constant 8 : index
    %10 = vector.load %arg8[%c0_21, %c0_22, %c8] : memref<16x16x36xf32, #tpu.memory_space<vmem>>, vector<16x16x4xf32>
    tpu.vector_store %arg8[%c0_21, %c0_22, %c8], %9 {strides = array<i32>} : memref<16x16x36xf32, #tpu.memory_space<vmem>>, vector<16x16x4xf32>,
    %c1_23 = arith.constant 1 : index
    %c0_24 = arith.constant 0 : index
    %c0_25 = arith.constant 0 : index
    %11 = vector.load %arg7[%c1_23, %c0_24, %c0_25] : memref<18x18x4xf32, #tpu.memory_space<vmem>>, vector<16x16x4xf32>
    %c0_26 = arith.constant 0 : index
    %c0_27 = arith.constant 0 : index
    %c12 = arith.constant 12 : index
    %12 = vector.load %arg8[%c0_26, %c0_27, %c12] : memref<16x16x36xf32, #tpu.memory_space<vmem>>, vector<16x16x4xf32>
    tpu.vector_store %arg8[%c0_26, %c0_27, %c12], %11 {strides = array<i32>} : memref<16x16x36xf32, #tpu.memory_space<vmem>>, vector<16x16x4xf32>,
    %c1_28 = arith.constant 1 : index
    %c1_29 = arith.constant 1 : index
    %c0_30 = arith.constant 0 : index
    %13 = vector.load %arg7[%c1_28, %c1_29, %c0_30] : memref<18x18x4xf32, #tpu.memory_space<vmem>>, vector<16x16x4xf32>
    %c0_31 = arith.constant 0 : index
    %c0_32 = arith.constant 0 : index
    %c16 = arith.constant 16 : index
    %14 = vector.load %arg8[%c0_31, %c0_32, %c16] : memref<16x16x36xf32, #tpu.memory_space<vmem>>, vector<16x16x4xf32>
    tpu.vector_store %arg8[%c0_31, %c0_32, %c16], %13 {strides = array<i32>} : memref<16x16x36xf32, #tpu.memory_space<vmem>>, vector<16x16x4xf32>,
    %c1_33 = arith.constant 1 : index
    %c2_34 = arith.constant 2 : index
    %c0_35 = arith.constant 0 : index
    %15 = vector.load %arg7[%c1_33, %c2_34, %c0_35] : memref<18x18x4xf32, #tpu.memory_space<vmem>>, vector<16x16x4xf32>
    %c0_36 = arith.constant 0 : index
    %c0_37 = arith.constant 0 : index
    %c20 = arith.constant 20 : index
    %16 = vector.load %arg8[%c0_36, %c0_37, %c20] : memref<16x16x36xf32, #tpu.memory_space<vmem>>, vector<16x16x4xf32>
    tpu.vector_store %arg8[%c0_36, %c0_37, %c20], %15 {strides = array<i32>} : memref<16x16x36xf32, #tpu.memory_space<vmem>>, vector<16x16x4xf32>,
    %c2_38 = arith.constant 2 : index
    %c0_39 = arith.constant 0 : index
    %c0_40 = arith.constant 0 : index
    %17 = vector.load %arg7[%c2_38, %c0_39, %c0_40] : memref<18x18x4xf32, #tpu.memory_space<vmem>>, vector<16x16x4xf32>
    %c0_41 = arith.constant 0 : index
    %c0_42 = arith.constant 0 : index
    %c24 = arith.constant 24 : index
    %18 = vector.load %arg8[%c0_41, %c0_42, %c24] : memref<16x16x36xf32, #tpu.memory_space<vmem>>, vector<16x16x4xf32>
    tpu.vector_store %arg8[%c0_41, %c0_42, %c24], %17 {strides = array<i32>} : memref<16x16x36xf32, #tpu.memory_space<vmem>>, vector<16x16x4xf32>,
    %c2_43 = arith.constant 2 : index
    %c1_44 = arith.constant 1 : index
    %c0_45 = arith.constant 0 : index
    %19 = vector.load %arg7[%c2_43, %c1_44, %c0_45] : memref<18x18x4xf32, #tpu.memory_space<vmem>>, vector<16x16x4xf32>
    %c0_46 = arith.constant 0 : index
    %c0_47 = arith.constant 0 : index
    %c28 = arith.constant 28 : index
    %20 = vector.load %arg8[%c0_46, %c0_47, %c28] : memref<16x16x36xf32, #tpu.memory_space<vmem>>, vector<16x16x4xf32>
    tpu.vector_store %arg8[%c0_46, %c0_47, %c28], %19 {strides = array<i32>} : memref<16x16x36xf32, #tpu.memory_space<vmem>>, vector<16x16x4xf32>,
    %c2_48 = arith.constant 2 : index
    %c2_49 = arith.constant 2 : index
    %c0_50 = arith.constant 0 : index
    %21 = vector.load %arg7[%c2_48, %c2_49, %c0_50] : memref<18x18x4xf32, #tpu.memory_space<vmem>>, vector<16x16x4xf32>
    %c0_51 = arith.constant 0 : index
    %c0_52 = arith.constant 0 : index
    %c32 = arith.constant 32 : index
    %22 = vector.load %arg8[%c0_51, %c0_52, %c32] : memref<16x16x36xf32, #tpu.memory_space<vmem>>, vector<16x16x4xf32>
    tpu.vector_store %arg8[%c0_51, %c0_52, %c32], %21 {strides = array<i32>} : memref<16x16x36xf32, #tpu.memory_space<vmem>>, vector<16x16x4xf32>,
    %c0_53 = arith.constant 0 : index
    %c0_54 = arith.constant 0 : index
    %c0_55 = arith.constant 0 : index
    %23 = vector.load %arg8[%c0_53, %c0_54, %c0_55] : memref<16x16x36xf32, #tpu.memory_space<vmem>>, vector<16x16x36xf32>
    %c0_56 = arith.constant 0 : index
    %c0_57 = arith.constant 0 : index
    %24 = vector.load %arg2[%c0_56, %c0_57] : memref<36x8xf32, #tpu.memory_space<vmem>>, vector<36x8xf32>
    %cst_58 = arith.constant dense<0.000000e+00> : vector<16x16x8xf32>
    %25 = tpu.matmul %23, %24, %cst_58 {dimension_numbers = #tpu.dot_dimension_numbers<[2], [0], [0, 1], [1], [0, 0, 0, 1, 1, 1], [], []>} : vector<16x16x36xf32>, vector<36x8xf32>, vector<16x16x8xf32> -> vector<16x16x8xf32>
    %c0_59 = arith.constant 0 : index
    %c0_60 = arith.constant 0 : index
    %26 = vector.load %arg3[%c0_59, %c0_60] : memref<1x8xf32, #tpu.memory_space<vmem>>, vector<1x8xf32>
    %27 = vector.shape_cast %26 : vector<1x8xf32> to vector<1x1x8xf32>
    %28 = vector.broadcast %27 : vector<1x1x8xf32> to vector<16x16x8xf32>
    %29 = arith.addf %25, %28 : vector<16x16x8xf32>
    %cst_61 = arith.constant 0.000000e+00 : f32
    %30 = vector.broadcast %cst_61 : f32 to vector<16x16x8xf32>
    %31 = arith.maximumf %29, %30 : vector<16x16x8xf32>
    %cst_62 = arith.constant 0.000000e+00 : f32
    %32 = vector.broadcast %cst_62 : f32 to vector<18x18x8xf32>
    %c0_63 = arith.constant 0 : index
    %c0_64 = arith.constant 0 : index
    %c0_65 = arith.constant 0 : index
    %33 = vector.load %arg9[%c0_63, %c0_64, %c0_65] : memref<18x18x8xf32, #tpu.memory_space<vmem>>, vector<18x18x8xf32>
    tpu.vector_store %arg9[%c0_63, %c0_64, %c0_65], %32 {strides = array<i32>} : memref<18x18x8xf32, #tpu.memory_space<vmem>>, vector<18x18x8xf32>,
    %c1_66 = arith.constant 1 : index
    %c1_67 = arith.constant 1 : index
    %c0_68 = arith.constant 0 : index
    %34 = vector.load %arg9[%c1_66, %c1_67, %c0_68] : memref<18x18x8xf32, #tpu.memory_space<vmem>>, vector<16x16x8xf32>
    tpu.vector_store %arg9[%c1_66, %c1_67, %c0_68], %31 {strides = array<i32>} : memref<18x18x8xf32, #tpu.memory_space<vmem>>, vector<16x16x8xf32>,
    %c0_69 = arith.constant 0 : index
    %c0_70 = arith.constant 0 : index
    %c0_71 = arith.constant 0 : index
    %35 = vector.load %arg9[%c0_69, %c0_70, %c0_71] : memref<18x18x8xf32, #tpu.memory_space<vmem>>, vector<16x16x8xf32>
    %c0_72 = arith.constant 0 : index
    %c0_73 = arith.constant 0 : index
    %c0_74 = arith.constant 0 : index
    %36 = vector.load %arg10[%c0_72, %c0_73, %c0_74] : memref<16x16x72xf32, #tpu.memory_space<vmem>>, vector<16x16x8xf32>
    tpu.vector_store %arg10[%c0_72, %c0_73, %c0_74], %35 {strides = array<i32>} : memref<16x16x72xf32, #tpu.memory_space<vmem>>, vector<16x16x8xf32>,
    %c0_75 = arith.constant 0 : index
    %c1_76 = arith.constant 1 : index
    %c0_77 = arith.constant 0 : index
    %37 = vector.load %arg9[%c0_75, %c1_76, %c0_77] : memref<18x18x8xf32, #tpu.memory_space<vmem>>, vector<16x16x8xf32>
    %c0_78 = arith.constant 0 : index
    %c0_79 = arith.constant 0 : index
    %c8_80 = arith.constant 8 : index
    %38 = vector.load %arg10[%c0_78, %c0_79, %c8_80] : memref<16x16x72xf32, #tpu.memory_space<vmem>>, vector<16x16x8xf32>
    tpu.vector_store %arg10[%c0_78, %c0_79, %c8_80], %37 {strides = array<i32>} : memref<16x16x72xf32, #tpu.memory_space<vmem>>, vector<16x16x8xf32>,
    %c0_81 = arith.constant 0 : index
    %c2_82 = arith.constant 2 : index
    %c0_83 = arith.constant 0 : index
    %39 = vector.load %arg9[%c0_81, %c2_82, %c0_83] : memref<18x18x8xf32, #tpu.memory_space<vmem>>, vector<16x16x8xf32>
    %c0_84 = arith.constant 0 : index
    %c0_85 = arith.constant 0 : index
    %c16_86 = arith.constant 16 : index
    %40 = vector.load %arg10[%c0_84, %c0_85, %c16_86] : memref<16x16x72xf32, #tpu.memory_space<vmem>>, vector<16x16x8xf32>
    tpu.vector_store %arg10[%c0_84, %c0_85, %c16_86], %39 {strides = array<i32>} : memref<16x16x72xf32, #tpu.memory_space<vmem>>, vector<16x16x8xf32>,
    %c1_87 = arith.constant 1 : index
    %c0_88 = arith.constant 0 : index
    %c0_89 = arith.constant 0 : index
    %41 = vector.load %arg9[%c1_87, %c0_88, %c0_89] : memref<18x18x8xf32, #tpu.memory_space<vmem>>, vector<16x16x8xf32>
    %c0_90 = arith.constant 0 : index
    %c0_91 = arith.constant 0 : index
    %c24_92 = arith.constant 24 : index
    %42 = vector.load %arg10[%c0_90, %c0_91, %c24_92] : memref<16x16x72xf32, #tpu.memory_space<vmem>>, vector<16x16x8xf32>
    tpu.vector_store %arg10[%c0_90, %c0_91, %c24_92], %41 {strides = array<i32>} : memref<16x16x72xf32, #tpu.memory_space<vmem>>, vector<16x16x8xf32>,
    %c1_93 = arith.constant 1 : index
    %c1_94 = arith.constant 1 : index
    %c0_95 = arith.constant 0 : index
    %43 = vector.load %arg9[%c1_93, %c1_94, %c0_95] : memref<18x18x8xf32, #tpu.memory_space<vmem>>, vector<16x16x8xf32>
    %c0_96 = arith.constant 0 : index
    %c0_97 = arith.constant 0 : index
    %c32_98 = arith.constant 32 : index
    %44 = vector.load %arg10[%c0_96, %c0_97, %c32_98] : memref<16x16x72xf32, #tpu.memory_space<vmem>>, vector<16x16x8xf32>
    tpu.vector_store %arg10[%c0_96, %c0_97, %c32_98], %43 {strides = array<i32>} : memref<16x16x72xf32, #tpu.memory_space<vmem>>, vector<16x16x8xf32>,
    %c1_99 = arith.constant 1 : index
    %c2_100 = arith.constant 2 : index
    %c0_101 = arith.constant 0 : index
    %45 = vector.load %arg9[%c1_99, %c2_100, %c0_101] : memref<18x18x8xf32, #tpu.memory_space<vmem>>, vector<16x16x8xf32>
    %c0_102 = arith.constant 0 : index
    %c0_103 = arith.constant 0 : index
    %c40 = arith.constant 40 : index
    %46 = vector.load %arg10[%c0_102, %c0_103, %c40] : memref<16x16x72xf32, #tpu.memory_space<vmem>>, vector<16x16x8xf32>
    tpu.vector_store %arg10[%c0_102, %c0_103, %c40], %45 {strides = array<i32>} : memref<16x16x72xf32, #tpu.memory_space<vmem>>, vector<16x16x8xf32>,
    %c2_104 = arith.constant 2 : index
    %c0_105 = arith.constant 0 : index
    %c0_106 = arith.constant 0 : index
    %47 = vector.load %arg9[%c2_104, %c0_105, %c0_106] : memref<18x18x8xf32, #tpu.memory_space<vmem>>, vector<16x16x8xf32>
    %c0_107 = arith.constant 0 : index
    %c0_108 = arith.constant 0 : index
    %c48 = arith.constant 48 : index
    %48 = vector.load %arg10[%c0_107, %c0_108, %c48] : memref<16x16x72xf32, #tpu.memory_space<vmem>>, vector<16x16x8xf32>
    tpu.vector_store %arg10[%c0_107, %c0_108, %c48], %47 {strides = array<i32>} : memref<16x16x72xf32, #tpu.memory_space<vmem>>, vector<16x16x8xf32>,
    %c2_109 = arith.constant 2 : index
    %c1_110 = arith.constant 1 : index
    %c0_111 = arith.constant 0 : index
    %49 = vector.load %arg9[%c2_109, %c1_110, %c0_111] : memref<18x18x8xf32, #tpu.memory_space<vmem>>, vector<16x16x8xf32>
    %c0_112 = arith.constant 0 : index
    %c0_113 = arith.constant 0 : index
    %c56 = arith.constant 56 : index
    %50 = vector.load %arg10[%c0_112, %c0_113, %c56] : memref<16x16x72xf32, #tpu.memory_space<vmem>>, vector<16x16x8xf32>
    tpu.vector_store %arg10[%c0_112, %c0_113, %c56], %49 {strides = array<i32>} : memref<16x16x72xf32, #tpu.memory_space<vmem>>, vector<16x16x8xf32>,
    %c2_114 = arith.constant 2 : index
    %c2_115 = arith.constant 2 : index
    %c0_116 = arith.constant 0 : index
    %51 = vector.load %arg9[%c2_114, %c2_115, %c0_116] : memref<18x18x8xf32, #tpu.memory_space<vmem>>, vector<16x16x8xf32>
    %c0_117 = arith.constant 0 : index
    %c0_118 = arith.constant 0 : index
    %c64 = arith.constant 64 : index
    %52 = vector.load %arg10[%c0_117, %c0_118, %c64] : memref<16x16x72xf32, #tpu.memory_space<vmem>>, vector<16x16x8xf32>
    tpu.vector_store %arg10[%c0_117, %c0_118, %c64], %51 {strides = array<i32>} : memref<16x16x72xf32, #tpu.memory_space<vmem>>, vector<16x16x8xf32>,
    %c0_119 = arith.constant 0 : index
    %c0_120 = arith.constant 0 : index
    %c0_121 = arith.constant 0 : index
    %53 = vector.load %arg10[%c0_119, %c0_120, %c0_121] : memref<16x16x72xf32, #tpu.memory_space<vmem>>, vector<16x16x72xf32>
    %c0_122 = arith.constant 0 : index
    %c0_123 = arith.constant 0 : index
    %54 = vector.load %arg4[%c0_122, %c0_123] : memref<72x8xf32, #tpu.memory_space<vmem>>, vector<72x8xf32>
    %cst_124 = arith.constant dense<0.000000e+00> : vector<16x16x8xf32>
    %55 = tpu.matmul %53, %54, %cst_124 {dimension_numbers = #tpu.dot_dimension_numbers<[2], [0], [0, 1], [1], [0, 0, 0, 1, 1, 1], [], []>} : vector<16x16x72xf32>, vector<72x8xf32>, vector<16x16x8xf32> -> vector<16x16x8xf32>
    %c0_125 = arith.constant 0 : index
    %c0_126 = arith.constant 0 : index
    %56 = vector.load %arg5[%c0_125, %c0_126] : memref<1x8xf32, #tpu.memory_space<vmem>>, vector<1x8xf32>
    %57 = vector.shape_cast %56 : vector<1x8xf32> to vector<1x1x8xf32>
    %58 = vector.broadcast %57 : vector<1x1x8xf32> to vector<16x16x8xf32>
    %59 = arith.addf %55, %58 : vector<16x16x8xf32>
    %cst_127 = arith.constant 0.000000e+00 : f32
    %60 = vector.broadcast %cst_127 : f32 to vector<16x16x8xf32>
    %61 = arith.maximumf %59, %60 : vector<16x16x8xf32>
    %c0_128 = arith.constant 0 : index
    %c0_129 = arith.constant 0 : index
    %c0_130 = arith.constant 0 : index
    %c0_131 = arith.constant 0 : index
    %62 = vector.load %arg6[%c0_128, %c0_129, %c0_130, %c0_131] : memref<1x16x16x8xf32, #tpu.memory_space<vmem>>, vector<1x16x16x8xf32>
    %63 = vector.shape_cast %62 : vector<1x16x16x8xf32> to vector<16x16x8xf32>
    %64 = vector.shape_cast %61 : vector<16x16x8xf32> to vector<1x16x16x8xf32>
    tpu.vector_store %arg6[%c0_128, %c0_129, %c0_130, %c0_131], %64 {strides = array<i32>} : memref<1x16x16x8xf32, #tpu.memory_space<vmem>>, vector<1x16x16x8xf32>,
    return
  }
  func.func @transform_0(%arg0: i32) -> (i32, i32, i32, i32) {
    %c0_i32 = arith.constant 0 : i32
    %c0_i32_0 = arith.constant 0 : i32
    %c0_i32_1 = arith.constant 0 : i32
    %c0_i32_2 = arith.constant 0 : i32
    return %arg0, %c0_i32, %c0_i32_0, %c0_i32_1 : i32, i32, i32, i32
  }
  func.func @transform_1(%arg0: i32) -> (i32, i32) {
    %c0_i32 = arith.constant 0 : i32
    %c0_i32_0 = arith.constant 0 : i32
    %c0_i32_1 = arith.constant 0 : i32
    return %c0_i32, %c0_i32_0 : i32, i32
  }
  func.func @transform_2(%arg0: i32) -> (i32, i32) {
    %c0_i32 = arith.constant 0 : i32
    %c0_i32_0 = arith.constant 0 : i32
    %c0_i32_1 = arith.constant 0 : i32
    return %c0_i32, %c0_i32_0 : i32, i32
  }
  func.func @transform_3(%arg0: i32) -> (i32, i32) {
    %c0_i32 = arith.constant 0 : i32
    %c0_i32_0 = arith.constant 0 : i32
    %c0_i32_1 = arith.constant 0 : i32
    return %c0_i32, %c0_i32_0 : i32, i32
  }
  func.func @transform_4(%arg0: i32) -> (i32, i32) {
    %c0_i32 = arith.constant 0 : i32
    %c0_i32_0 = arith.constant 0 : i32
    %c0_i32_1 = arith.constant 0 : i32
    return %c0_i32, %c0_i32_0 : i32, i32
  }
  func.func @transform_5(%arg0: i32) -> (i32, i32, i32, i32) {
    %c0_i32 = arith.constant 0 : i32
    %c0_i32_0 = arith.constant 0 : i32
    %c0_i32_1 = arith.constant 0 : i32
    %c0_i32_2 = arith.constant 0 : i32
    return %arg0, %c0_i32, %c0_i32_0, %c0_i32_1 : i32, i32, i32, i32
  }
}

</mosaic_0001>

<bundles_post_ra>
// kernel: tpu_custom_call.1
= control target key start
LH: loop header
LB: loop body
LE: loop exit
PB: predicated region body
PF: predicated region fallthrough
CT: control target
= control target key end

     0   :  { %s4916_s18 = smov 0   ;;  %s7255_s0 = inlined_call_operand.vmem [shape: f32[2,16,16,4], index: 0, kind: input, shape index: {}]   ;;  %s7256_s1 = inlined_call_operand.vmem [shape: f32[36,8], index: 1, kind: input, shape index: {}]   ;;  %s7257_s2 = inlined_call_operand.vmem [shape: f32[1,8], index: 2, kind: input, shape index: {}]   ;;  %s7258_s3 = inlined_call_operand.vmem [shape: f32[72,8], index: 3, kind: input, shape index: {}]   ;;  %s7259_s4 = inlined_call_operand.vmem [shape: f32[1,8], index: 4, kind: input, shape index: {}]   ;;  %s7260_s5 = inlined_call_operand.vmem [shape: f32[2,16,16,8], index: 5, kind: output, shape index: {}]  }
   0x1 LB: > { %s4544_s19 = sadd.s32 4294967295, %s4871_s18   ;;  %p4548_p0 = scmp.ge.s32.totalorder %s4871_s18, 1  ;;  %s4871_s18 = sphi %s4916_s18, %s15_s18  }
   0x2   : > { %p187_p1 = scmp.lt.s32.totalorder %s4871_s18, 3 }
   0x4   : > { %p188_p2 = pnand %p4548_p0, %p187_p1 }
   0x6   : > { %191 = sbr.rel (%p188_p2) target bundleno = 1648 (0x670), region = 40 }
   0xb   : > { %vm225_vm0 = vcmask 31744   ;;  %p4926_p3 = scmp.lt.s32.totalorder %s4544_s19, 1  ;;  %vm228_vm1 = vcmask 25600   ;;  %v7261_v0 = vmov 0.0   ;;  %s4874_s25 = smov 4   ;;  %vm570_vm2 = vcmask 64544  }
   0xc   : > { %226 = vst.msk [vmem:[#allocation2] sm:$0xff] %vm225_vm0, %v7261_v0  ;;  %227 = vst.msk [vmem:[#allocation2 + $0x8] sm:$0xff] %vm225_vm0, %v7261_v0  ;;  %s4875_s26 = smov 8   ;;  %s4876_s27 = smov 12   ;;  %vm763_vm3 = vcmask 97344   ;;  %vm956_vm4 = vcmask 130144  }
   0xd   : > { %230 = vst.msk [vmem:[#allocation2 + $0x18] sm:$0xff] %vm225_vm0, %v7261_v0  ;;  %231 = vst.msk [vmem:[#allocation2 + $0x20] sm:$0xff] %vm225_vm0, %v7261_v0  ;;  %s7356_s19 = smov (!%p4926_p3, %s4544_s19), 1  ;;  %s4877_s28 = smov 16   ;;  %vm1149_vm5 = vcmask 162944   ;;  %vm1342_vm6 = vcmask 195744  }
   0xe   : > { %233 = vst.msk [vmem:[#allocation2 + $0x30] sm:$0xff] %vm225_vm0, %v7261_v0  ;;  %234 = vst.msk [vmem:[#allocation2 + $0x38] sm:$0xff] %vm225_vm0, %v7261_v0  ;;  %s4622_s21 = sshll.u32 %s7356_s19, 8  ;;  %s4878_s29 = smov 20   ;;  %vm2096_vm7 = vcmask 1043456   ;;  %vm1536_vm8 = vcmask 228544  }
   0xf   : > { %236 = vst.msk [vmem:[#allocation2 + $0x48] sm:$0xff] %vm225_vm0, %v7261_v0  ;;  %237 = vst.msk [vmem:[#allocation2 + $0x50] sm:$0xff] %vm225_vm0, %v7261_v0  ;;  %s5050_s24 = scalar_lea.vmem %s7255_s0, %s4622_s21  ;;  %s4879_s30 = smov 24   ;;  %vm1729_vm9 = vcmask 261344   ;;  %vm1922_vm10 = vcmask 294144   ;;  %vm1999_vm11 = vcmask 293888  }
  0x10   : > { %239 = vst.msk [vmem:[#allocation2 + $0x60] sm:$0xff] %vm225_vm0, %v7261_v0  ;;  %240 = vst.msk [vmem:[#allocation2 + $0x68] sm:$0xff] %vm225_vm0, %v7261_v0  ;;  %v281_v1 = vld [vmem:[%s5050_s24] sm:$0xff]  ;;  %v282_v2 = vld [vmem:[%s5050_s24 + $0x8] sm:$0xff]  ;;  %s4880_s6 = smov 28   ;;  %s4881_s17 = smov 32  }
  0x11   : > { %242 = vst.msk [vmem:[#allocation2 + $0x78] sm:$0xff] %vm225_vm0, %v7261_v0  ;;  %243 = vst.msk [vmem:[#allocation2 + $0x80] sm:$0xff] %vm225_vm0, %v7261_v0  ;;  %v283_v3 = vld [vmem:[%s5050_s24 + $0x10] sm:$0xff]  ;;  %v284_v4 = vld [vmem:[%s5050_s24 + $0x18] sm:$0xff]  ;;  %vm2357_vm12 = vcmask 64512   ;;  %vm2360_vm13 = vcmask 58368  }
  0x12   : > { %245 = vst.msk [vmem:[#allocation2 + $0x90] sm:$0xff] %vm225_vm0, %v7261_v0  ;;  %246 = vst.msk [vmem:[#allocation2 + $0x98] sm:$0xff] %vm225_vm0, %v7261_v0  ;;  %v285_v5 = vld [vmem:[%s5050_s24 + $0x20] sm:$0xff]  ;;  %v286_v6 = vld [vmem:[%s5050_s24 + $0x28] sm:$0xff]  ;;  %vm2670_vm14 = vcmask 130112   ;;  %vm2863_vm15 = vcmask 195712  }
  0x13   : > { %248 = vst.msk [vmem:[#allocation2 + $0xa8] sm:$0xff] %vm225_vm0, %v7261_v0  ;;  %249 = vst.msk [vmem:[#allocation2 + $0xb0] sm:$0xff] %vm225_vm0, %v7261_v0  ;;  %v410_v7 = vld [vmem:[#allocation2 + $0x1] sm:$0xff]  ;;  %v287_v9 = vld [vmem:[%s5050_s24 + $0x30] sm:$0xff]  ;;  %s4883_s8 = smov 48   ;;  %s4884_s13 = smov 56  }
  0x14   : > { %251 = vst.msk [vmem:[#allocation2 + $0xc0] sm:$0xff] %vm225_vm0, %v7261_v0  ;;  %252 = vst.msk [vmem:[#allocation2 + $0xc8] sm:$0xff] %vm225_vm0, %v7261_v0  ;;  %474 = vrot.lane.b32.xlu0 %v410_v7, %s4874_s25  ;;  %v288_v10 = vld [vmem:[%s5050_s24 + $0x38] sm:$0xff]  ;;  %v289_v11 = vld [vmem:[%s5050_s24 + $0x40] sm:$0xff] }
  0x15   : > { %254 = vst.msk [vmem:[#allocation2 + $0xd8] sm:$0xff] %vm225_vm0, %v7261_v0  ;;  %255 = vst.msk [vmem:[#allocation2 + $0xe0] sm:$0xff] %vm225_vm0, %v7261_v0  ;;  %v290_v12 = vld [vmem:[%s5050_s24 + $0x48] sm:$0xff]  ;;  %v291_v13 = vld [vmem:[%s5050_s24 + $0x50] sm:$0xff] }
  0x16   : > { %257 = vst.msk [vmem:[#allocation2 + $0xf0] sm:$0xff] %vm225_vm0, %v7261_v0  ;;  %258 = vst.msk [vmem:[#allocation2 + $0xf8] sm:$0xff] %vm225_vm0, %v7261_v0  ;;  %v292_v14 = vld [vmem:[%s5050_s24 + $0x58] sm:$0xff]  ;;  %v293_v15 = vld [vmem:[%s5050_s24 + $0x60] sm:$0xff] }
  0x17   : > { %260 = vst.msk [vmem:[#allocation2 + $0x108] sm:$0xff] %vm225_vm0, %v7261_v0  ;;  %261 = vst.msk [vmem:[#allocation2 + $0x110] sm:$0xff] %vm225_vm0, %v7261_v0  ;;  %v294_v16 = vld [vmem:[%s5050_s24 + $0x68] sm:$0xff]  ;;  %v295_v17 = vld [vmem:[%s5050_s24 + $0x70] sm:$0xff] }
  0x18   : > { %263 = vst.msk [vmem:[#allocation2 + $0x120] sm:$0xff] %vm225_vm0, %v7261_v0  ;;  %264 = vst.msk [vmem:[#allocation2 + $0x128] sm:$0xff] %vm225_vm0, %v7261_v0  ;;  %v296_v18 = vld [vmem:[%s5050_s24 + $0x78] sm:$0xff]  ;;  %v297_v19 = vld [vmem:[%s5050_s24 + $0x80] sm:$0xff] }
  0x19   : > { %266 = vst.msk [vmem:[#allocation2 + $0x138] sm:$0xff] %vm225_vm0, %v7261_v0  ;;  %267 = vst.msk [vmem:[#allocation2 + $0x140] sm:$0xff] %vm225_vm0, %v7261_v0  ;;  %v298_v20 = vld [vmem:[%s5050_s24 + $0x88] sm:$0xff]  ;;  %v299_v21 = vld [vmem:[%s5050_s24 + $0x90] sm:$0xff] }
  0x1a   : > { %269 = vst.msk [vmem:[#allocation2 + $0x150] sm:$0xff] %vm225_vm0, %v7261_v0  ;;  %270 = vst.msk [vmem:[#allocation2 + $0x158] sm:$0xff] %vm225_vm0, %v7261_v0  ;;  %v300_v22 = vld [vmem:[%s5050_s24 + $0x98] sm:$0xff]  ;;  %v301_v23 = vld [vmem:[%s5050_s24 + $0xa0] sm:$0xff] }
  0x1b   : > { %272 = vst.msk [vmem:[#allocation2 + $0x168] sm:$0xff] %vm225_vm0, %v7261_v0  ;;  %273 = vst.msk [vmem:[#allocation2 + $0x170] sm:$0xff] %vm225_vm0, %v7261_v0  ;;  %v302_v24 = vld [vmem:[%s5050_s24 + $0xa8] sm:$0xff]  ;;  %v303_v28 = vld [vmem:[%s5050_s24 + $0xb0] sm:$0xff] }
  0x1c   : > { %275 = vst.msk [vmem:[#allocation2 + $0x180] sm:$0xff] %vm225_vm0, %v7261_v0  ;;  %276 = vst.msk [vmem:[#allocation2 + $0x188] sm:$0xff] %vm225_vm0, %v7261_v0  ;;  %v304_v29 = vld [vmem:[%s5050_s24 + $0xb8] sm:$0xff]  ;;  %v305_v33 = vld [vmem:[%s5050_s24 + $0xc0] sm:$0xff] }
  0x1d   : > { %278 = vst.msk [vmem:[#allocation2 + $0x198] sm:$0xff] %vm225_vm0, %v7261_v0  ;;  %279 = vst.msk [vmem:[#allocation2 + $0x1a0] sm:$0xff] %vm225_vm0, %v7261_v0  ;;  %v306_v34 = vld [vmem:[%s5050_s24 + $0xc8] sm:$0xff]  ;;  %v307_v35 = vld [vmem:[%s5050_s24 + $0xd0] sm:$0xff] }
  0x1e   : > { %229 = vst.msk [vmem:[#allocation2 + $0x10] sm:$0x3] %vm228_vm1, %v7261_v0  ;;  %232 = vst.msk [vmem:[#allocation2 + $0x28] sm:$0x3] %vm228_vm1, %v7261_v0  ;;  %v308_v36 = vld [vmem:[%s5050_s24 + $0xd8] sm:$0xff]  ;;  %v309_v37 = vld [vmem:[%s5050_s24 + $0xe0] sm:$0xff] }
  0x1f   : > { %235 = vst.msk [vmem:[#allocation2 + $0x40] sm:$0x3] %vm228_vm1, %v7261_v0  ;;  %238 = vst.msk [vmem:[#allocation2 + $0x58] sm:$0x3] %vm228_vm1, %v7261_v0  ;;  %v310_v38 = vld [vmem:[%s5050_s24 + $0xe8] sm:$0xff]  ;;  %v346_v45 = vld [vmem:[#allocation2] sm:$0xff] }
  0x20   : > { %241 = vst.msk [vmem:[#allocation2 + $0x70] sm:$0x3] %vm228_vm1, %v7261_v0  ;;  %244 = vst.msk [vmem:[#allocation2 + $0x88] sm:$0x3] %vm228_vm1, %v7261_v0  ;;  %v347_v48 = vld [vmem:[#allocation2 + $0x8] sm:$0xff] }
  0x21   : > { %247 = vst.msk [vmem:[#allocation2 + $0xa0] sm:$0x3] %vm228_vm1, %v7261_v0  ;;  %250 = vst.msk [vmem:[#allocation2 + $0xb8] sm:$0x3] %vm228_vm1, %v7261_v0 }
  0x22   : > { %253 = vst.msk [vmem:[#allocation2 + $0xd0] sm:$0x3] %vm228_vm1, %v7261_v0  ;;  %256 = vst.msk [vmem:[#allocation2 + $0xe8] sm:$0x3] %vm228_vm1, %v7261_v0 }
  0x23   : > { %259 = vst.msk [vmem:[#allocation2 + $0x100] sm:$0x3] %vm228_vm1, %v7261_v0  ;;  %262 = vst.msk [vmem:[#allocation2 + $0x118] sm:$0x3] %vm228_vm1, %v7261_v0 }
  0x24   : > { %265 = vst.msk [vmem:[#allocation2 + $0x130] sm:$0x3] %vm228_vm1, %v7261_v0  ;;  %268 = vst.msk [vmem:[#allocation2 + $0x148] sm:$0x3] %vm228_vm1, %v7261_v0 }
  0x25   : > { %271 = vst.msk [vmem:[#allocation2 + $0x160] sm:$0x3] %vm228_vm1, %v7261_v0  ;;  %274 = vst.msk [vmem:[#allocation2 + $0x178] sm:$0x3] %vm228_vm1, %v7261_v0  ;;  %v411_v8 = vld [vmem:[#allocation2 + $0x9] sm:$0xff] }
  0x26   : > { %277 = vst.msk [vmem:[#allocation2 + $0x190] sm:$0x3] %vm228_vm1, %v7261_v0  ;;  %280 = vst.msk [vmem:[#allocation2 + $0x1a8] sm:$0x3] %vm228_vm1, %v7261_v0  ;;  %476 = vrot.lane.b32.xlu0 %v411_v8, %s4874_s25  ;;  %vm3249_vm1 = vcmask 326912  }
  0x27   : > { %314 = vst.msk [vmem:[#allocation2 + $0x19] sm:$0xff] %vm225_vm0, %v281_v1  ;;  %315 = vst.msk [vmem:[#allocation2 + $0x21] sm:$0xff] %vm225_vm0, %v282_v2 }
  0x28   : > { %316 = vst.msk [vmem:[#allocation2 + $0x31] sm:$0xff] %vm225_vm0, %v283_v3  ;;  %317 = vst.msk [vmem:[#allocation2 + $0x39] sm:$0xff] %vm225_vm0, %v284_v4 }
  0x29   : > { %318 = vst.msk [vmem:[#allocation2 + $0x49] sm:$0xff] %vm225_vm0, %v285_v5  ;;  %319 = vst.msk [vmem:[#allocation2 + $0x51] sm:$0xff] %vm225_vm0, %v286_v6 }
  0x2a   : > { %320 = vst.msk [vmem:[#allocation2 + $0x61] sm:$0xff] %vm225_vm0, %v287_v9  ;;  %321 = vst.msk [vmem:[#allocation2 + $0x69] sm:$0xff] %vm225_vm0, %v288_v10 }
  0x2b   : > { %322 = vst.msk [vmem:[#allocation2 + $0x79] sm:$0xff] %vm225_vm0, %v289_v11  ;;  %323 = vst.msk [vmem:[#allocation2 + $0x81] sm:$0xff] %vm225_vm0, %v290_v12 }
  0x2c   : > { %324 = vst.msk [vmem:[#allocation2 + $0x91] sm:$0xff] %vm225_vm0, %v291_v13  ;;  %325 = vst.msk [vmem:[#allocation2 + $0x99] sm:$0xff] %vm225_vm0, %v292_v14 }
  0x2d   : > { %326 = vst.msk [vmem:[#allocation2 + $0xa9] sm:$0xff] %vm225_vm0, %v293_v15  ;;  %327 = vst.msk [vmem:[#allocation2 + $0xb1] sm:$0xff] %vm225_vm0, %v294_v16 }
  0x2e   : > { %328 = vst.msk [vmem:[#allocation2 + $0xc1] sm:$0xff] %vm225_vm0, %v295_v17  ;;  %329 = vst.msk [vmem:[#allocation2 + $0xc9] sm:$0xff] %vm225_vm0, %v296_v18  ;;  %v5095_v25 = vld [vmem:[#allocation2 + $0x19] sm:$0xff]  ;;  %v5104_v27 = vld [vmem:[#allocation2 + $0x21] sm:$0xff] }
  0x2f   : > { %330 = vst.msk [vmem:[#allocation2 + $0xd9] sm:$0xff] %vm225_vm0, %v297_v19  ;;  %331 = vst.msk [vmem:[#allocation2 + $0xe1] sm:$0xff] %vm225_vm0, %v298_v20  ;;  %v5097_v26 = vld [vmem:[#allocation2 + $0x31] sm:$0xff]  ;;  %478 = vrot.lane.b32.xlu1 %v5095_v25, %s4874_s25  ;;  %v5116_v31 = vld [vmem:[#allocation2 + $0x39] sm:$0xff] }
  0x30   : > { %332 = vst.msk [vmem:[#allocation2 + $0xf1] sm:$0xff] %vm225_vm0, %v299_v21  ;;  %333 = vst.msk [vmem:[#allocation2 + $0xf9] sm:$0xff] %vm225_vm0, %v300_v22  ;;  %482 = vrot.lane.b32.xlu0 %v5097_v26, %s4874_s25  ;;  %v5112_v30 = vld [vmem:[#allocation2 + $0x49] sm:$0xff]  ;;  %v5133_v39 = vld [vmem:[#allocation2 + $0x51] sm:$0xff] }
  0x31   : > { %334 = vst.msk [vmem:[#allocation2 + $0x109] sm:$0xff] %vm225_vm0, %v301_v23  ;;  %335 = vst.msk [vmem:[#allocation2 + $0x111] sm:$0xff] %vm225_vm0, %v302_v24  ;;  %v5120_v32 = vld [vmem:[#allocation2 + $0x61] sm:$0xff]  ;;  %v5144_v41 = vld [vmem:[#allocation2 + $0x69] sm:$0xff] }
  0x32   : > { %336 = vst.msk [vmem:[#allocation2 + $0x121] sm:$0xff] %vm225_vm0, %v303_v28  ;;  %337 = vst.msk [vmem:[#allocation2 + $0x129] sm:$0xff] %vm225_vm0, %v304_v29  ;;  %v5140_v40 = vld [vmem:[#allocation2 + $0x79] sm:$0xff]  ;;  %v5152_v43 = vld [vmem:[#allocation2 + $0x81] sm:$0xff] }
  0x33   : > { %480 = vrot.lane.b32.xlu1 %v5104_v27, %s4874_s25  ;;  %338 = vst.msk [vmem:[#allocation2 + $0x139] sm:$0xff] %vm225_vm0, %v305_v33  ;;  %339 = vst.msk [vmem:[#allocation2 + $0x141] sm:$0xff] %vm225_vm0, %v306_v34  ;;  %v5148_v42 = vld [vmem:[#allocation2 + $0x91] sm:$0xff]  ;;  %v5160_v46 = vld [vmem:[#allocation2 + $0x99] sm:$0xff] }
  0x34   : > { %486 = vrot.lane.b32.xlu0 %v5112_v30, %s4874_s25  ;;  %340 = vst.msk [vmem:[#allocation2 + $0x151] sm:$0xff] %vm225_vm0, %v307_v35  ;;  %341 = vst.msk [vmem:[#allocation2 + $0x159] sm:$0xff] %vm225_vm0, %v308_v36  ;;  %v5156_v44 = vld [vmem:[#allocation2 + $0xa9] sm:$0xff]  ;;  %v5163_v47 = vld [vmem:[#allocation2 + $0x18] sm:$0xff] }
  0x35   : > { %342 = vst.msk [vmem:[#allocation2 + $0x169] sm:$0xff] %vm225_vm0, %v309_v37  ;;  %343 = vst.msk [vmem:[#allocation2 + $0x171] sm:$0xff] %vm225_vm0, %v310_v38  ;;  %v5170_v49 = vld [vmem:[#allocation2 + $0x20] sm:$0xff]  ;;  %v5172_v50 = vld [vmem:[#allocation2 + $0x30] sm:$0xff] }
  0x36   : > { %378 = vst.msk [vmem:[#allocation3] sm:$0xff] %vm225_vm0, %v346_v45  ;;  %380 = vst.msk [vmem:[#allocation3 + $0x10] sm:$0xff] %vm225_vm0, %v5163_v47  ;;  %v5174_v51 = vld [vmem:[#allocation2 + $0xc1] sm:$0xff]  ;;  %v5180_v52 = vld [vmem:[#allocation2 + $0x38] sm:$0xff] }
  0x37   : > { %484 = vrot.lane.b32.xlu1 %v5116_v31, %s4874_s25  ;;  %379 = vst.msk [vmem:[#allocation3 + $0x8] sm:$0xff] %vm225_vm0, %v347_v48  ;;  %381 = vst.msk [vmem:[#allocation3 + $0x18] sm:$0xff] %vm225_vm0, %v5170_v49  ;;  %v5184_v53 = vld [vmem:[#allocation2 + $0xb1] sm:$0xff]  ;;  %v5188_v54 = vld [vmem:[#allocation2 + $0x48] sm:$0xff] }
  0x38   : > { %490 = vrot.lane.b32.xlu0 %v5120_v32, %s4874_s25  ;;  %382 = vst.msk [vmem:[#allocation3 + $0x20] sm:$0xff] %vm225_vm0, %v5172_v50  ;;  %383 = vst.msk [vmem:[#allocation3 + $0x28] sm:$0xff] %vm225_vm0, %v5180_v52  ;;  %v5190_v55 = vld [vmem:[#allocation2 + $0x50] sm:$0xff]  ;;  %v5192_v56 = vld [vmem:[#allocation2 + $0xd9] sm:$0xff] }
  0x39   : > { %384 = vst.msk [vmem:[#allocation3 + $0x30] sm:$0xff] %vm225_vm0, %v5188_v54  ;;  %385 = vst.msk [vmem:[#allocation3 + $0x38] sm:$0xff] %vm225_vm0, %v5190_v55  ;;  %v5198_v57 = vld [vmem:[#allocation2 + $0x60] sm:$0xff]  ;;  %v5200_v58 = vld [vmem:[#allocation2 + $0x68] sm:$0xff] }
  0x3a   : > { %v5202_v59 = vld [vmem:[#allocation2 + $0x78] sm:$0xff]  ;;  %386 = vst.msk [vmem:[#allocation3 + $0x40] sm:$0xff] %vm225_vm0, %v5198_v57  ;;  %387 = vst.msk [vmem:[#allocation3 + $0x48] sm:$0xff] %vm225_vm0, %v5200_v58  ;;  %v5212_v60 = vld [vmem:[#allocation2 + $0x80] sm:$0xff] }
  0x3b   : > { %488 = vrot.lane.b32.xlu1 %v5133_v39, %s4874_s25  ;;  %388 = vst.msk [vmem:[#allocation3 + $0x50] sm:$0xff] %vm225_vm0, %v5202_v59  ;;  %v5214_v61 = vld [vmem:[#allocation2 + $0x90] sm:$0xff]  ;;  %v5216_v62 = vld [vmem:[#allocation2 + $0x98] sm:$0xff]  ;;  %389 = vst.msk [vmem:[#allocation3 + $0x58] sm:$0xff] %vm225_vm0, %v5212_v60 }
  0x3c   : > { %494 = vrot.lane.b32.xlu0 %v5140_v40, %s4874_s25  ;;  %v5218_v63 = vld [vmem:[#allocation2 + $0xc9] sm:$0xff]  ;;  %390 = vst.msk [vmem:[#allocation3 + $0x60] sm:$0xff] %vm225_vm0, %v5214_v61  ;;  %391 = vst.msk [vmem:[#allocation3 + $0x68] sm:$0xff] %vm225_vm0, %v5216_v62  ;;  %v5230_v3 = vld [vmem:[#allocation2 + $0xc0] sm:$0xff] }
  0x3d   : > { %v5226_v1 = vld [vmem:[#allocation2 + $0xa8] sm:$0xff]  ;;  %v5228_v2 = vld [vmem:[#allocation2 + $0xb0] sm:$0xff]  ;;  %394 = vst.msk [vmem:[#allocation3 + $0x80] sm:$0xff] %vm225_vm0, %v5230_v3  ;;  %v5242_v5 = vld [vmem:[#allocation2 + $0xd8] sm:$0xff] }
  0x3e   : > { %392 = vst.msk [vmem:[#allocation3 + $0x70] sm:$0xff] %vm225_vm0, %v5226_v1  ;;  %393 = vst.msk [vmem:[#allocation3 + $0x78] sm:$0xff] %vm225_vm0, %v5228_v2  ;;  %v5240_v4 = vld [vmem:[#allocation2 + $0xc8] sm:$0xff]  ;;  %v5244_v6 = vld [vmem:[#allocation2 + $0xe0] sm:$0xff] }
  0x3f   : > { %492 = vrot.lane.b32.xlu1 %v5144_v41, %s4874_s25  ;;  %395 = vst.msk [vmem:[#allocation3 + $0x88] sm:$0xff] %vm225_vm0, %v5240_v4  ;;  %396 = vst.msk [vmem:[#allocation3 + $0x90] sm:$0xff] %vm225_vm0, %v5242_v5  ;;  %v5252_v7 = vld [vmem:[#allocation2 + $0xf0] sm:$0xff]  ;;  %v5254_v8 = vld [vmem:[#allocation2 + $0xf8] sm:$0xff] }
  0x40   : > { %498 = vrot.lane.b32.xlu0 %v5148_v42, %s4874_s25  ;;  %397 = vst.msk [vmem:[#allocation3 + $0x98] sm:$0xff] %vm225_vm0, %v5244_v6  ;;  %v5256_v9 = vld [vmem:[#allocation2 + $0x108] sm:$0xff]  ;;  %398 = vst.msk [vmem:[#allocation3 + $0xa0] sm:$0xff] %vm225_vm0, %v5252_v7  ;;  %v5266_v10 = vld [vmem:[#allocation2 + $0x110] sm:$0xff] }
  0x41   : > { %399 = vst.msk [vmem:[#allocation3 + $0xa8] sm:$0xff] %vm225_vm0, %v5254_v8  ;;  %400 = vst.msk [vmem:[#allocation3 + $0xb0] sm:$0xff] %vm225_vm0, %v5256_v9  ;;  %v5268_v11 = vld [vmem:[#allocation2 + $0xf1] sm:$0xff]  ;;  %v5272_v12 = vld [vmem:[#allocation2 + $0x120] sm:$0xff] }
  0x42   : > { %401 = vst.msk [vmem:[#allocation3 + $0xb8] sm:$0xff] %vm225_vm0, %v5266_v10  ;;  %402 = vst.msk [vmem:[#allocation3 + $0xc0] sm:$0xff] %vm225_vm0, %v5272_v12  ;;  %v5278_v13 = vld [vmem:[#allocation2 + $0x128] sm:$0xff]  ;;  %v5288_v16 = vld [vmem:[#allocation2 + $0x138] sm:$0xff] }
  0x43   : > { %496 = vrot.lane.b32.xlu1 %v5152_v43, %s4874_s25  ;;  %v5280_v14 = vld [vmem:[#allocation2 + $0xe1] sm:$0xff]  ;;  %403 = vst.msk [vmem:[#allocation3 + $0xc8] sm:$0xff] %vm225_vm0, %v5278_v13  ;;  %v5286_v15 = vld [vmem:[#allocation2 + $0x109] sm:$0xff]  ;;  %404 = vst.msk [vmem:[#allocation3 + $0xd0] sm:$0xff] %vm225_vm0, %v5288_v16 }
  0x44   : > { %502 = vrot.lane.b32.xlu0 %v5156_v44, %s4874_s25  ;;  %v5294_v17 = vld [vmem:[#allocation2 + $0x140] sm:$0xff]  ;;  %v5304_v20 = vld [vmem:[#allocation2 + $0x150] sm:$0xff]  ;;  %v5310_v21 = vld [vmem:[#allocation2 + $0x158] sm:$0xff] }
  0x45   : > { %v5296_v18 = vld [vmem:[#allocation2 + $0xf9] sm:$0xff]  ;;  %405 = vst.msk [vmem:[#allocation3 + $0xd8] sm:$0xff] %vm225_vm0, %v5294_v17  ;;  %v5302_v19 = vld [vmem:[#allocation2 + $0x121] sm:$0xff]  ;;  %406 = vst.msk [vmem:[#allocation3 + $0xe0] sm:$0xff] %vm225_vm0, %v5304_v20 }
  0x46   : > { %v5312_v22 = vld [vmem:[#allocation2 + $0x111] sm:$0xff]  ;;  %407 = vst.msk [vmem:[#allocation3 + $0xe8] sm:$0xff] %vm225_vm0, %v5310_v21  ;;  %v5318_v23 = vld [vmem:[#allocation2 + $0x139] sm:$0xff]  ;;  %v5320_v24 = vld [vmem:[#allocation2 + $0x168] sm:$0xff] }
  0x47   : > { %500 = vrot.lane.b32.xlu1 %v5160_v46, %s4874_s25  ;;  %408 = vst.msk [vmem:[#allocation3 + $0xf0] sm:$0xff] %vm225_vm0, %v5320_v24  ;;  %v5326_v28 = vld [vmem:[#allocation2 + $0x170] sm:$0xff]  ;;  %v5339_v35 = vld [vmem:[#allocation2 + $0x141] sm:$0xff]  ;;  %v312_v37 = vld [vmem:[%s5050_s24 + $0xf8] sm:$0xff] }
  0x48   : > { %506 = vrot.lane.b32.xlu0 %v5174_v51, %s4874_s25  ;;  %v5328_v29 = vld [vmem:[#allocation2 + $0x129] sm:$0xff]  ;;  %409 = vst.msk [vmem:[#allocation3 + $0xf8] sm:$0xff] %vm225_vm0, %v5326_v28  ;;  %v5334_v33 = vld [vmem:[#allocation2 + $0x151] sm:$0xff]  ;;  %7294 = vst [vmem:[#allocation6_spill] sm:$0xff] %v5339_v35 }
  0x49   : > { %v311_v34 = vld [vmem:[%s5050_s24 + $0xf0] sm:$0xff]  ;;  %345 = vst.msk [vmem:[#allocation2 + $0x189] sm:$0xff] %vm225_vm0, %v312_v37  ;;  %v5350_v38 = vld [vmem:[#allocation2 + $0x159] sm:$0xff]  ;;  %v603_v45 = vld [vmem:[#allocation2 + $0x2] sm:$0xff]  ;;  %s4885_s24 = smov 64  }
  0x4a   : > { %344 = vst.msk [vmem:[#allocation2 + $0x181] sm:$0xff] %vm225_vm0, %v311_v34  ;;  %v5344_v36 = vld [vmem:[#allocation2 + $0x169] sm:$0xff]  ;;  %7296 = vst [vmem:[#allocation8_spill] sm:$0xff] %v5350_v38  ;;  %v5356_v48 = vld [vmem:[#allocation2 + $0x171] sm:$0xff]  ;;  %vm3056_vm0 = vcmask 261312  }
  0x4b   : > { %504 = vrot.lane.b32.xlu1 %v5184_v53, %s4874_s25  ;;  %7295 = vst [vmem:[#allocation7_spill] sm:$0xff] %v5344_v36  ;;  %7297 = vst [vmem:[#allocation9_spill] sm:$0xff] %v5356_v48  ;;  %v5359_v34 = vld [vmem:[#allocation2 + $0x1a] sm:$0xff]  ;;  %v604_v37 = vld [vmem:[#allocation2 + $0xa] sm:$0xff] }
  0x4c   : > { %510 = vrot.lane.b32.xlu0 %v5192_v56, %s4874_s25  ;;  %7298 = vst [vmem:[#allocation10_spill] sm:$0xff] %v5359_v34  ;;  %v5365_v0 = vld [vmem:[#allocation2 + $0x32] sm:$0xff] }
  0x4d   : > { %7299 = vst [vmem:[#allocation11_spill] sm:$0xff] %v5365_v0 }
  0x4f   : > { %508 = vrot.lane.b32.xlu1 %v5218_v63, %s4874_s25 }
  0x50   : > { %514 = vrot.lane.b32.xlu0 %v5268_v11, %s4874_s25 }
  0x53   : > { %512 = vrot.lane.b32.xlu1 %v5280_v14, %s4874_s25 }
  0x54   : > { %518 = vrot.lane.b32.xlu0 %v5286_v15, %s4874_s25 }
  0x57   : > { %516 = vrot.lane.b32.xlu1 %v5296_v18, %s4874_s25 }
  0x58   : > { %522 = vrot.lane.b32.xlu0 %v5302_v19, %s4874_s25 }
  0x5b   : > { %520 = vrot.lane.b32.xlu1 %v5312_v22, %s4874_s25 }
  0x5c   : > { %526 = vrot.lane.b32.xlu0 %v5318_v23, %s4874_s25 }
  0x5f   : > { %524 = vrot.lane.b32.xlu1 %v5328_v29, %s4874_s25 }
  0x60   : > { %530 = vrot.lane.b32.xlu0 %v5334_v33, %s4874_s25 }
  0x63   : > { %528 = vrot.lane.b32.xlu1 %v5339_v35, %s4874_s25 }
  0x64   : > { %534 = vrot.lane.b32.xlu0 %v5344_v36, %s4874_s25  ;;  %v5368_v36 = vld [vmem:[#allocation2 + $0x22] sm:$0xff] }
  0x65   : > { %7300 = vst [vmem:[#allocation12_spill] sm:$0xff] %v5368_v36 }
  0x67   : > { %532 = vrot.lane.b32.xlu1 %v5350_v38, %s4874_s25  ;;  %v5372_v38 = vld [vmem:[#allocation2 + $0x4a] sm:$0xff] }
  0x68   : > { %667 = vrot.lane.b32.xlu0 %v603_v45, %s4875_s26  ;;  %7301 = vst [vmem:[#allocation13_spill] sm:$0xff] %v5372_v38  ;;  %v5376_v45 = vld [vmem:[#allocation2 + $0x3a] sm:$0xff] }
  0x69   : > { %7302 = vst [vmem:[#allocation14_spill] sm:$0xff] %v5376_v45 }
  0x6b   : > { %536 = vrot.lane.b32.xlu1 %v5356_v48, %s4874_s25  ;;  %v5466_v48 = vld [vmem:[#allocation2 + $0x142] sm:$0xff] }
  0x6c   : > { %671 = vrot.lane.b32.xlu0 %v5359_v34, %s4875_s26  ;;  %v5380_v34 = vld [vmem:[#allocation2 + $0x62] sm:$0xff]  ;;  %7323 = vst [vmem:[#allocation35_spill] sm:$0xff] %v5466_v48 }
  0x6d   : > { %7303 = vst [vmem:[#allocation15_spill] sm:$0xff] %v5380_v34 }
  0x6f   : > { %669 = vrot.lane.b32.xlu1 %v604_v37, %s4875_s26  ;;  %v5384_v37 = vld [vmem:[#allocation2 + $0x52] sm:$0xff] }
  0x70   : > { %675 = vrot.lane.b32.xlu0 %v5365_v0, %s4875_s26  ;;  %7304 = vst [vmem:[#allocation16_spill] sm:$0xff] %v5384_v37  ;;  %v5388_v0 = vld [vmem:[#allocation2 + $0x7a] sm:$0xff] }
  0x71   : > { %7305 = vst [vmem:[#allocation17_spill] sm:$0xff] %v5388_v0 }
  0x73   : > { %673 = vrot.lane.b32.xlu1 %v5368_v36, %s4875_s26  ;;  %v5392_v36 = vld [vmem:[#allocation2 + $0x6a] sm:$0xff] }
  0x74   : > { %679 = vrot.lane.b32.xlu0 %v5372_v38, %s4875_s26  ;;  %7306 = vst [vmem:[#allocation18_spill] sm:$0xff] %v5392_v36  ;;  %v5396_v38 = vld [vmem:[#allocation2 + $0x92] sm:$0xff] }
  0x75   : > { %7307 = vst [vmem:[#allocation19_spill] sm:$0xff] %v5396_v38 }
  0x77   : > { %677 = vrot.lane.b32.xlu1 %v5376_v45, %s4875_s26  ;;  %v5400_v45 = vld [vmem:[#allocation2 + $0x82] sm:$0xff] }
  0x78   : > { %683 = vrot.lane.b32.xlu0 %v5380_v34, %s4875_s26  ;;  %7308 = vst [vmem:[#allocation20_spill] sm:$0xff] %v5400_v45  ;;  %v5404_v34 = vld [vmem:[#allocation2 + $0xaa] sm:$0xff] }
  0x79   : > { %7309 = vst [vmem:[#allocation21_spill] sm:$0xff] %v5404_v34 }
  0x7b   : > { %681 = vrot.lane.b32.xlu1 %v5384_v37, %s4875_s26  ;;  %v5408_v37 = vld [vmem:[#allocation2 + $0x9a] sm:$0xff] }
  0x7c   : > { %687 = vrot.lane.b32.xlu0 %v5388_v0, %s4875_s26  ;;  %7310 = vst [vmem:[#allocation22_spill] sm:$0xff] %v5408_v37  ;;  %v5412_v0 = vld [vmem:[#allocation2 + $0xc2] sm:$0xff] }
  0x7d   : > { %7311 = vst [vmem:[#allocation23_spill] sm:$0xff] %v5412_v0 }
  0x7f   : > { %685 = vrot.lane.b32.xlu1 %v5392_v36, %s4875_s26  ;;  %v5416_v36 = vld [vmem:[#allocation2 + $0xb2] sm:$0xff] }
  0x80   : > { %691 = vrot.lane.b32.xlu0 %v5396_v38, %s4875_s26  ;;  %7312 = vst [vmem:[#allocation24_spill] sm:$0xff] %v5416_v36  ;;  %v5420_v38 = vld [vmem:[#allocation2 + $0xda] sm:$0xff] }
  0x81   : > { %7313 = vst [vmem:[#allocation25_spill] sm:$0xff] %v5420_v38 }
  0x83   : > { %689 = vrot.lane.b32.xlu1 %v5400_v45, %s4875_s26  ;;  %v5424_v45 = vld [vmem:[#allocation2 + $0xca] sm:$0xff] }
  0x84   : > { %695 = vrot.lane.b32.xlu0 %v5404_v34, %s4875_s26  ;;  %7314 = vst [vmem:[#allocation26_spill] sm:$0xff] %v5424_v45  ;;  %v5428_v34 = vld [vmem:[#allocation2 + $0xf2] sm:$0xff] }
  0x85   : > { %7315 = vst [vmem:[#allocation27_spill] sm:$0xff] %v5428_v34 }
  0x87   : > { %693 = vrot.lane.b32.xlu1 %v5408_v37, %s4875_s26  ;;  %v5432_v37 = vld [vmem:[#allocation2 + $0xe2] sm:$0xff] }
  0x88   : > { %699 = vrot.lane.b32.xlu0 %v5412_v0, %s4875_s26  ;;  %7316 = vst [vmem:[#allocation28_spill] sm:$0xff] %v5432_v37  ;;  %v5436_v0 = vld [vmem:[#allocation2 + $0x10a] sm:$0xff] }
  0x89   : > { %7317 = vst [vmem:[#allocation29_spill] sm:$0xff] %v5436_v0 }
  0x8b   : > { %697 = vrot.lane.b32.xlu1 %v5416_v36, %s4875_s26  ;;  %v5440_v36 = vld [vmem:[#allocation2 + $0xfa] sm:$0xff] }
  0x8c   : > { %703 = vrot.lane.b32.xlu0 %v5420_v38, %s4875_s26  ;;  %7318 = vst [vmem:[#allocation30_spill] sm:$0xff] %v5440_v36  ;;  %v5444_v38 = vld [vmem:[#allocation2 + $0x122] sm:$0xff] }
  0x8d   : > { %7319 = vst [vmem:[#allocation31_spill] sm:$0xff] %v5444_v38 }
  0x8f   : > { %701 = vrot.lane.b32.xlu1 %v5424_v45, %s4875_s26  ;;  %v5448_v45 = vld [vmem:[#allocation2 + $0x112] sm:$0xff] }
  0x90   : > { %707 = vrot.lane.b32.xlu0 %v5428_v34, %s4875_s26  ;;  %7320 = vst [vmem:[#allocation32_spill] sm:$0xff] %v5448_v45  ;;  %v5452_v34 = vld [vmem:[#allocation2 + $0x13a] sm:$0xff] }
  0x91   : > { %7321 = vst [vmem:[#allocation33_spill] sm:$0xff] %v5452_v34 }
  0x93   : > { %705 = vrot.lane.b32.xlu1 %v5432_v37, %s4875_s26  ;;  %v475_v37 = vpop.permute.xlu0 %474 }
  0x94   : > { %711 = vrot.lane.b32.xlu0 %v5436_v0, %s4875_s26  ;;  %571 = vst.msk [vmem:[#allocation3] sm:$0xff] %vm570_vm2, %v475_v37  ;;  %v5457_v0 = vld [vmem:[#allocation2 + $0x12a] sm:$0xff] }
  0x95   : > { %7322 = vst [vmem:[#allocation34_spill] sm:$0xff] %v5457_v0  ;;  %v5471_v37 = vld [vmem:[#allocation2 + $0x16a] sm:$0xff] }
  0x97   : > { %709 = vrot.lane.b32.xlu1 %v5440_v36, %s4875_s26  ;;  %v5461_v36 = vld [vmem:[#allocation2 + $0x152] sm:$0xff] }
  0x98   : > { %715 = vrot.lane.b32.xlu0 %v5444_v38, %s4875_s26  ;;  %v477_v38 = vpop.permute.xlu0 %476 }
  0x99   : > { %572 = vst.msk [vmem:[#allocation3 + $0x8] sm:$0xff] %vm570_vm2, %v477_v38  ;;  %v5484_v38 = vld [vmem:[#allocation2 + $0x172] sm:$0xff] }
  0x9b   : > { %713 = vrot.lane.b32.xlu1 %v5448_v45, %s4875_s26 }
  0x9c   : > { %719 = vrot.lane.b32.xlu0 %v5452_v34, %s4875_s26 }
  0x9f   : > { %717 = vrot.lane.b32.xlu1 %v5457_v0, %s4875_s26  ;;  %v5476_v0 = vld [vmem:[#allocation2 + $0x15a] sm:$0xff] }
  0xa0   : > { %723 = vrot.lane.b32.xlu0 %v5461_v36, %s4875_s26 }
  0xa1   : > { %v479_v35 = vpop.permute.xlu1 %478 }
  0xa2   : > { %573 = vst.msk [vmem:[#allocation3 + $0x10] sm:$0xff] %vm570_vm2, %v479_v35  ;;  %v483_v34 = vpop.permute.xlu0 %482 }
  0xa3   : > { %721 = vrot.lane.b32.xlu1 %v5466_v48, %s4875_s26  ;;  %575 = vst.msk [vmem:[#allocation3 + $0x20] sm:$0xff] %vm570_vm2, %v483_v34 }
  0xa4   : > { %727 = vrot.lane.b32.xlu0 %v5471_v37, %s4875_s26 }
  0xa5   : > { %v481_v45 = vpop.permute.xlu1 %480 }
  0xa6   : > { %574 = vst.msk [vmem:[#allocation3 + $0x18] sm:$0xff] %vm570_vm2, %v481_v45  ;;  %v487_v35 = vpop.permute.xlu0 %486 }
  0xa7   : > { %725 = vrot.lane.b32.xlu1 %v5476_v0, %s4875_s26  ;;  %577 = vst.msk [vmem:[#allocation3 + $0x30] sm:$0xff] %vm570_vm2, %v487_v35 }
  0xa8   : > { %860 = vrot.lane.b32.xlu0 %v5163_v47, %s4876_s27 }
  0xa9   : > { %v485_v48 = vpop.permute.xlu1 %484 }
  0xaa   : > { %576 = vst.msk [vmem:[#allocation3 + $0x28] sm:$0xff] %vm570_vm2, %v485_v48  ;;  %v491_v34 = vpop.permute.xlu0 %490 }
  0xab   : > { %729 = vrot.lane.b32.xlu1 %v5484_v38, %s4875_s26  ;;  %579 = vst.msk [vmem:[#allocation3 + $0x40] sm:$0xff] %vm570_vm2, %v491_v34 }
  0xac   : > { %864 = vrot.lane.b32.xlu0 %v5172_v50, %s4876_s27 }
  0xad   : > { %v489_v45 = vpop.permute.xlu1 %488 }
  0xae   : > { %578 = vst.msk [vmem:[#allocation3 + $0x38] sm:$0xff] %vm570_vm2, %v489_v45  ;;  %v495_v35 = vpop.permute.xlu0 %494 }
  0xaf   : > { %862 = vrot.lane.b32.xlu1 %v5170_v49, %s4876_s27  ;;  %581 = vst.msk [vmem:[#allocation3 + $0x50] sm:$0xff] %vm570_vm2, %v495_v35 }
  0xb0   : > { %868 = vrot.lane.b32.xlu0 %v5188_v54, %s4876_s27 }
  0xb1   : > { %v493_v47 = vpop.permute.xlu1 %492 }
  0xb2   : > { %580 = vst.msk [vmem:[#allocation3 + $0x48] sm:$0xff] %vm570_vm2, %v493_v47  ;;  %v499_v48 = vpop.permute.xlu0 %498 }
  0xb3   : > { %866 = vrot.lane.b32.xlu1 %v5180_v52, %s4876_s27  ;;  %583 = vst.msk [vmem:[#allocation3 + $0x60] sm:$0xff] %vm570_vm2, %v499_v48 }
  0xb4   : > { %872 = vrot.lane.b32.xlu0 %v5198_v57, %s4876_s27 }
  0xb5   : > { %v497_v34 = vpop.permute.xlu1 %496 }
  0xb6   : > { %582 = vst.msk [vmem:[#allocation3 + $0x58] sm:$0xff] %vm570_vm2, %v497_v34  ;;  %v503_v49 = vpop.permute.xlu0 %502 }
  0xb7   : > { %870 = vrot.lane.b32.xlu1 %v5190_v55, %s4876_s27  ;;  %585 = vst.msk [vmem:[#allocation3 + $0x70] sm:$0xff] %vm570_vm2, %v503_v49 }
  0xb8   : > { %876 = vrot.lane.b32.xlu0 %v5202_v59, %s4876_s27 }
  0xb9   : > { %v501_v45 = vpop.permute.xlu1 %500 }
  0xba   : > { %584 = vst.msk [vmem:[#allocation3 + $0x68] sm:$0xff] %vm570_vm2, %v501_v45  ;;  %v507_v35 = vpop.permute.xlu0 %506 }
  0xbb   : > { %874 = vrot.lane.b32.xlu1 %v5200_v58, %s4876_s27  ;;  %587 = vst.msk [vmem:[#allocation3 + $0x80] sm:$0xff] %vm570_vm2, %v507_v35 }
  0xbc   : > { %880 = vrot.lane.b32.xlu0 %v5214_v61, %s4876_s27 }
  0xbd   : > { %v505_v47 = vpop.permute.xlu1 %504 }
  0xbe   : > { %586 = vst.msk [vmem:[#allocation3 + $0x78] sm:$0xff] %vm570_vm2, %v505_v47  ;;  %v511_v48 = vpop.permute.xlu0 %510 }
  0xbf   : > { %878 = vrot.lane.b32.xlu1 %v5212_v60, %s4876_s27  ;;  %589 = vst.msk [vmem:[#allocation3 + $0x90] sm:$0xff] %vm570_vm2, %v511_v48 }
  0xc0   : > { %884 = vrot.lane.b32.xlu0 %v5226_v1, %s4876_s27 }
  0xc1   : > { %v509_v34 = vpop.permute.xlu1 %508 }
  0xc2   : > { %588 = vst.msk [vmem:[#allocation3 + $0x88] sm:$0xff] %vm570_vm2, %v509_v34  ;;  %v515_v49 = vpop.permute.xlu0 %514 }
  0xc3   : > { %882 = vrot.lane.b32.xlu1 %v5216_v62, %s4876_s27  ;;  %591 = vst.msk [vmem:[#allocation3 + $0xa0] sm:$0xff] %vm570_vm2, %v515_v49 }
  0xc4   : > { %888 = vrot.lane.b32.xlu0 %v5230_v3, %s4876_s27 }
  0xc5   : > { %v513_v45 = vpop.permute.xlu1 %512 }
  0xc6   : > { %590 = vst.msk [vmem:[#allocation3 + $0x98] sm:$0xff] %vm570_vm2, %v513_v45  ;;  %v519_v35 = vpop.permute.xlu0 %518 }
  0xc7   : > { %886 = vrot.lane.b32.xlu1 %v5228_v2, %s4876_s27  ;;  %593 = vst.msk [vmem:[#allocation3 + $0xb0] sm:$0xff] %vm570_vm2, %v519_v35 }
  0xc8   : > { %892 = vrot.lane.b32.xlu0 %v5242_v5, %s4876_s27 }
  0xc9   : > { %v517_v47 = vpop.permute.xlu1 %516 }
  0xca   : > { %592 = vst.msk [vmem:[#allocation3 + $0xa8] sm:$0xff] %vm570_vm2, %v517_v47  ;;  %v523_v48 = vpop.permute.xlu0 %522 }
  0xcb   : > { %890 = vrot.lane.b32.xlu1 %v5240_v4, %s4876_s27  ;;  %595 = vst.msk [vmem:[#allocation3 + $0xc0] sm:$0xff] %vm570_vm2, %v523_v48 }
  0xcc   : > { %896 = vrot.lane.b32.xlu0 %v5252_v7, %s4876_s27 }
  0xcd   : > { %v521_v34 = vpop.permute.xlu1 %520 }
  0xce   : > { %594 = vst.msk [vmem:[#allocation3 + $0xb8] sm:$0xff] %vm570_vm2, %v521_v34  ;;  %v527_v49 = vpop.permute.xlu0 %526 }
  0xcf   : > { %894 = vrot.lane.b32.xlu1 %v5244_v6, %s4876_s27  ;;  %597 = vst.msk [vmem:[#allocation3 + $0xd0] sm:$0xff] %vm570_vm2, %v527_v49 }
  0xd0   : > { %900 = vrot.lane.b32.xlu0 %v5256_v9, %s4876_s27 }
  0xd1   : > { %v525_v45 = vpop.permute.xlu1 %524 }
  0xd2   : > { %596 = vst.msk [vmem:[#allocation3 + $0xc8] sm:$0xff] %vm570_vm2, %v525_v45  ;;  %v531_v35 = vpop.permute.xlu0 %530 }
  0xd3   : > { %898 = vrot.lane.b32.xlu1 %v5254_v8, %s4876_s27  ;;  %599 = vst.msk [vmem:[#allocation3 + $0xe0] sm:$0xff] %vm570_vm2, %v531_v35 }
  0xd4   : > { %904 = vrot.lane.b32.xlu0 %v5272_v12, %s4876_s27 }
  0xd5   : > { %v529_v47 = vpop.permute.xlu1 %528 }
  0xd6   : > { %598 = vst.msk [vmem:[#allocation3 + $0xd8] sm:$0xff] %vm570_vm2, %v529_v47  ;;  %v535_v48 = vpop.permute.xlu0 %534 }
  0xd7   : > { %902 = vrot.lane.b32.xlu1 %v5266_v10, %s4876_s27  ;;  %601 = vst.msk [vmem:[#allocation3 + $0xf0] sm:$0xff] %vm570_vm2, %v535_v48  ;;  %v5573_v48 = vld [vmem:[#allocation2 + $0x180] sm:$0xff] }
  0xd8   : > { %908 = vrot.lane.b32.xlu0 %v5288_v16, %s4876_s27 }
  0xd9   : > { %v533_v34 = vpop.permute.xlu1 %532 }
  0xda   : > { %600 = vst.msk [vmem:[#allocation3 + $0xe8] sm:$0xff] %vm570_vm2, %v533_v34  ;;  %v668_v49 = vpop.permute.xlu0 %667 }
  0xdb   : > { %906 = vrot.lane.b32.xlu1 %v5278_v13, %s4876_s27  ;;  %764 = vst.msk [vmem:[#allocation3] sm:$0xff] %vm763_vm3, %v668_v49 }
  0xdc   : > { %912 = vrot.lane.b32.xlu0 %v5304_v20, %s4876_s27 }
  0xdd   : > { %v537_v45 = vpop.permute.xlu1 %536 }
  0xde   : > { %602 = vst.msk [vmem:[#allocation3 + $0xf8] sm:$0xff] %vm570_vm2, %v537_v45  ;;  %v672_v35 = vpop.permute.xlu0 %671  ;;  %vm3442_vm2 = vcmask 392512  }
  0xdf   : > { %910 = vrot.lane.b32.xlu1 %v5294_v17, %s4876_s27  ;;  %766 = vst.msk [vmem:[#allocation3 + $0x10] sm:$0xff] %vm763_vm3, %v672_v35  ;;  %v5584_v35 = vld [vmem:[#allocation2 + $0x188] sm:$0xff] }
  0xe0   : > { %916 = vrot.lane.b32.xlu0 %v5320_v24, %s4876_s27 }
  0xe1   : > { %v670_v47 = vpop.permute.xlu1 %669 }
  0xe2   : > { %765 = vst.msk [vmem:[#allocation3 + $0x8] sm:$0xff] %vm763_vm3, %v670_v47  ;;  %v676_v34 = vpop.permute.xlu0 %675 }
  0xe3   : > { %914 = vrot.lane.b32.xlu1 %v5310_v21, %s4876_s27  ;;  %768 = vst.msk [vmem:[#allocation3 + $0x20] sm:$0xff] %vm763_vm3, %v676_v34 }
  0xe4   : > { %920 = vrot.lane.b32.xlu0 %v5573_v48, %s4876_s27 }
  0xe5   : > { %v674_v49 = vpop.permute.xlu1 %673 }
  0xe6   : > { %767 = vst.msk [vmem:[#allocation3 + $0x18] sm:$0xff] %vm763_vm3, %v674_v49  ;;  %v680_v45 = vpop.permute.xlu0 %679 }
  0xe7   : > { %918 = vrot.lane.b32.xlu1 %v5326_v28, %s4876_s27  ;;  %770 = vst.msk [vmem:[#allocation3 + $0x30] sm:$0xff] %vm763_vm3, %v680_v45 }
  0xe8   : > { %1053 = vrot.lane.b32.xlu0 %v5095_v25, %s4877_s28 }
  0xe9   : > { %v678_v47 = vpop.permute.xlu1 %677 }
  0xea   : > { %769 = vst.msk [vmem:[#allocation3 + $0x28] sm:$0xff] %vm763_vm3, %v678_v47  ;;  %v684_v34 = vpop.permute.xlu0 %683 }
  0xeb   : > { %922 = vrot.lane.b32.xlu1 %v5584_v35, %s4876_s27  ;;  %772 = vst.msk [vmem:[#allocation3 + $0x40] sm:$0xff] %vm763_vm3, %v684_v34  ;;  %s4882_s27 = smov 40  }
  0xec   : > { %1057 = vrot.lane.b32.xlu0 %v5097_v26, %s4877_s28 }
  0xed   : > { %v682_v49 = vpop.permute.xlu1 %681 }
  0xee   : > { %771 = vst.msk [vmem:[#allocation3 + $0x38] sm:$0xff] %vm763_vm3, %v682_v49  ;;  %v688_v45 = vpop.permute.xlu0 %687  ;;  %v7325_v49 = vld [vmem:[#allocation7_spill] sm:$0xff] }
  0xef   : > { %1055 = vrot.lane.b32.xlu1 %v5104_v27, %s4877_s28  ;;  %774 = vst.msk [vmem:[#allocation3 + $0x50] sm:$0xff] %vm763_vm3, %v688_v45  ;;  %v7326_v45 = vld [vmem:[#allocation8_spill] sm:$0xff] }
  0xf0   : > { %1061 = vrot.lane.b32.xlu0 %v5112_v30, %s4877_s28 }
  0xf1   : > { %v686_v25 = vpop.permute.xlu1 %685 }
  0xf2   : > { %773 = vst.msk [vmem:[#allocation3 + $0x48] sm:$0xff] %vm763_vm3, %v686_v25  ;;  %v692_v47 = vpop.permute.xlu0 %691 }
  0xf3   : > { %1059 = vrot.lane.b32.xlu1 %v5116_v31, %s4877_s28  ;;  %776 = vst.msk [vmem:[#allocation3 + $0x60] sm:$0xff] %vm763_vm3, %v692_v47  ;;  %v7327_v47 = vld [vmem:[#allocation9_spill] sm:$0xff] }
  0xf4   : > { %1065 = vrot.lane.b32.xlu0 %v5120_v32, %s4877_s28 }
  0xf5   : > { %v690_v26 = vpop.permute.xlu1 %689 }
  0xf6   : > { %775 = vst.msk [vmem:[#allocation3 + $0x58] sm:$0xff] %vm763_vm3, %v690_v26  ;;  %v696_v27 = vpop.permute.xlu0 %695 }
  0xf7   : > { %1063 = vrot.lane.b32.xlu1 %v5133_v39, %s4877_s28  ;;  %778 = vst.msk [vmem:[#allocation3 + $0x70] sm:$0xff] %vm763_vm3, %v696_v27  ;;  %v5684_v27 = vld [vmem:[#allocation2 + $0x189] sm:$0xff] }
  0xf8   : > { %1069 = vrot.lane.b32.xlu0 %v5140_v40, %s4877_s28 }
  0xf9   : > { %v694_v30 = vpop.permute.xlu1 %693 }
  0xfa   : > { %777 = vst.msk [vmem:[#allocation3 + $0x68] sm:$0xff] %vm763_vm3, %v694_v30  ;;  %v700_v31 = vpop.permute.xlu0 %699 }
  0xfb   : > { %1067 = vrot.lane.b32.xlu1 %v5144_v41, %s4877_s28  ;;  %780 = vst.msk [vmem:[#allocation3 + $0x80] sm:$0xff] %vm763_vm3, %v700_v31  ;;  %v7328_v31 = vld [vmem:[#allocation10_spill] sm:$0xff] }
  0xfc   : > { %1073 = vrot.lane.b32.xlu0 %v5148_v42, %s4877_s28 }
  0xfd   : > { %v698_v32 = vpop.permute.xlu1 %697 }
  0xfe   : > { %779 = vst.msk [vmem:[#allocation3 + $0x78] sm:$0xff] %vm763_vm3, %v698_v32  ;;  %v704_v39 = vpop.permute.xlu0 %703 }
  0xff   : > { %1071 = vrot.lane.b32.xlu1 %v5152_v43, %s4877_s28  ;;  %782 = vst.msk [vmem:[#allocation3 + $0x90] sm:$0xff] %vm763_vm3, %v704_v39 }
 0x100   : > { %1077 = vrot.lane.b32.xlu0 %v5156_v44, %s4877_s28 }
 0x101   : > { %v702_v40 = vpop.permute.xlu1 %701 }
 0x102   : > { %781 = vst.msk [vmem:[#allocation3 + $0x88] sm:$0xff] %vm763_vm3, %v702_v40  ;;  %v708_v41 = vpop.permute.xlu0 %707  ;;  %v7329_v40 = vld [vmem:[#allocation11_spill] sm:$0xff] }
 0x103   : > { %1075 = vrot.lane.b32.xlu1 %v5160_v46, %s4877_s28  ;;  %784 = vst.msk [vmem:[#allocation3 + $0xa0] sm:$0xff] %vm763_vm3, %v708_v41  ;;  %v7330_v41 = vld [vmem:[#allocation12_spill] sm:$0xff] }
 0x104   : > { %1081 = vrot.lane.b32.xlu0 %v5174_v51, %s4877_s28 }
 0x105   : > { %v706_v42 = vpop.permute.xlu1 %705 }
 0x106   : > { %783 = vst.msk [vmem:[#allocation3 + $0x98] sm:$0xff] %vm763_vm3, %v706_v42  ;;  %v712_v43 = vpop.permute.xlu0 %711 }
 0x107   : > { %1079 = vrot.lane.b32.xlu1 %v5184_v53, %s4877_s28  ;;  %786 = vst.msk [vmem:[#allocation3 + $0xb0] sm:$0xff] %vm763_vm3, %v712_v43 }
 0x108   : > { %1085 = vrot.lane.b32.xlu0 %v5192_v56, %s4877_s28 }
 0x109   : > { %v710_v44 = vpop.permute.xlu1 %709 }
 0x10a   : > { %785 = vst.msk [vmem:[#allocation3 + $0xa8] sm:$0xff] %vm763_vm3, %v710_v44  ;;  %v716_v46 = vpop.permute.xlu0 %715  ;;  %v7331_v44 = vld [vmem:[#allocation13_spill] sm:$0xff] }
 0x10b   : > { %1083 = vrot.lane.b32.xlu1 %v5218_v63, %s4877_s28  ;;  %788 = vst.msk [vmem:[#allocation3 + $0xc0] sm:$0xff] %vm763_vm3, %v716_v46  ;;  %v7332_v46 = vld [vmem:[#allocation14_spill] sm:$0xff] }
 0x10c   : > { %1089 = vrot.lane.b32.xlu0 %v5268_v11, %s4877_s28 }
 0x10d   : > { %v714_v51 = vpop.permute.xlu1 %713 }
 0x10e   : > { %787 = vst.msk [vmem:[#allocation3 + $0xb8] sm:$0xff] %vm763_vm3, %v714_v51  ;;  %v720_v53 = vpop.permute.xlu0 %719 }
 0x10f   : > { %1087 = vrot.lane.b32.xlu1 %v5280_v14, %s4877_s28  ;;  %790 = vst.msk [vmem:[#allocation3 + $0xd0] sm:$0xff] %vm763_vm3, %v720_v53 }
 0x110   : > { %1093 = vrot.lane.b32.xlu0 %v5286_v15, %s4877_s28 }
 0x111   : > { %v718_v56 = vpop.permute.xlu1 %717 }
 0x112   : > { %789 = vst.msk [vmem:[#allocation3 + $0xc8] sm:$0xff] %vm763_vm3, %v718_v56  ;;  %v724_v63 = vpop.permute.xlu0 %723  ;;  %v7333_v56 = vld [vmem:[#allocation15_spill] sm:$0xff] }
 0x113   : > { %1091 = vrot.lane.b32.xlu1 %v5296_v18, %s4877_s28  ;;  %792 = vst.msk [vmem:[#allocation3 + $0xe0] sm:$0xff] %vm763_vm3, %v724_v63  ;;  %v7334_v63 = vld [vmem:[#allocation16_spill] sm:$0xff] }
 0x114   : > { %1097 = vrot.lane.b32.xlu0 %v5302_v19, %s4877_s28 }
 0x115   : > { %v722_v11 = vpop.permute.xlu1 %721 }
 0x116   : > { %791 = vst.msk [vmem:[#allocation3 + $0xd8] sm:$0xff] %vm763_vm3, %v722_v11  ;;  %v728_v14 = vpop.permute.xlu0 %727 }
 0x117   : > { %1095 = vrot.lane.b32.xlu1 %v5312_v22, %s4877_s28  ;;  %794 = vst.msk [vmem:[#allocation3 + $0xf0] sm:$0xff] %vm763_vm3, %v728_v14  ;;  %v7324_v22 = vld [vmem:[#allocation6_spill] sm:$0xff] }
 0x118   : > { %1101 = vrot.lane.b32.xlu0 %v5318_v23, %s4877_s28 }
 0x119   : > { %v726_v15 = vpop.permute.xlu1 %725 }
 0x11a   : > { %793 = vst.msk [vmem:[#allocation3 + $0xe8] sm:$0xff] %vm763_vm3, %v726_v15  ;;  %v861_v18 = vpop.permute.xlu0 %860  ;;  %v7335_v15 = vld [vmem:[#allocation17_spill] sm:$0xff] }
 0x11b   : > { %1099 = vrot.lane.b32.xlu1 %v5328_v29, %s4877_s28  ;;  %957 = vst.msk [vmem:[#allocation3] sm:$0xff] %vm956_vm4, %v861_v18  ;;  %v5673_v29 = vld [vmem:[#allocation2 + $0x181] sm:$0xff] }
 0x11c   : > { %1105 = vrot.lane.b32.xlu0 %v5334_v33, %s4877_s28  ;;  %v7336_v18 = vld [vmem:[#allocation18_spill] sm:$0xff] }
 0x11d   : > { %v730_v19 = vpop.permute.xlu1 %729 }
 0x11e   : > { %795 = vst.msk [vmem:[#allocation3 + $0xf8] sm:$0xff] %vm763_vm3, %v730_v19  ;;  %v865_v34 = vpop.permute.xlu0 %864  ;;  %vm3636_vm3 = vcmask 458112  }
 0x11f   : > { %1103 = vrot.lane.b32.xlu1 %v7324_v22, %s4877_s28  ;;  %959 = vst.msk [vmem:[#allocation3 + $0x10] sm:$0xff] %vm956_vm4, %v865_v34  ;;  %v7337_v34 = vld [vmem:[#allocation19_spill] sm:$0xff] }
 0x120   : > { %1109 = vrot.lane.b32.xlu0 %v7325_v49, %s4877_s28 }
 0x121   : > { %v863_v23 = vpop.permute.xlu1 %862 }
 0x122   : > { %958 = vst.msk [vmem:[#allocation3 + $0x8] sm:$0xff] %vm956_vm4, %v863_v23  ;;  %v869_v33 = vpop.permute.xlu0 %868  ;;  %v7338_v23 = vld [vmem:[#allocation20_spill] sm:$0xff] }
 0x123   : > { %1107 = vrot.lane.b32.xlu1 %v7326_v45, %s4877_s28  ;;  %961 = vst.msk [vmem:[#allocation3 + $0x20] sm:$0xff] %vm956_vm4, %v869_v33  ;;  %v7339_v33 = vld [vmem:[#allocation21_spill] sm:$0xff] }
 0x124   : > { %1113 = vrot.lane.b32.xlu0 %v5673_v29, %s4877_s28 }
 0x125   : > { %v867_v25 = vpop.permute.xlu1 %866 }
 0x126   : > { %960 = vst.msk [vmem:[#allocation3 + $0x18] sm:$0xff] %vm956_vm4, %v867_v25  ;;  %v873_v26 = vpop.permute.xlu0 %872  ;;  %v7340_v25 = vld [vmem:[#allocation22_spill] sm:$0xff] }
 0x127   : > { %1111 = vrot.lane.b32.xlu1 %v7327_v47, %s4877_s28  ;;  %963 = vst.msk [vmem:[#allocation3 + $0x30] sm:$0xff] %vm956_vm4, %v873_v26 }
 0x128   : > { %1246 = vrot.lane.b32.xlu0 %v7328_v31, %s4878_s29  ;;  %v7342_v31 = vld [vmem:[#allocation24_spill] sm:$0xff] }
 0x129   : > { %v871_v30 = vpop.permute.xlu1 %870 }
 0x12a   : > { %962 = vst.msk [vmem:[#allocation3 + $0x28] sm:$0xff] %vm956_vm4, %v871_v30  ;;  %v877_v32 = vpop.permute.xlu0 %876  ;;  %v7341_v30 = vld [vmem:[#allocation23_spill] sm:$0xff] }
 0x12b   : > { %1115 = vrot.lane.b32.xlu1 %v5684_v27, %s4877_s28  ;;  %965 = vst.msk [vmem:[#allocation3 + $0x40] sm:$0xff] %vm956_vm4, %v877_v32 }
 0x12c   : > { %1250 = vrot.lane.b32.xlu0 %v7329_v40, %s4878_s29  ;;  %v7343_v40 = vld [vmem:[#allocation25_spill] sm:$0xff] }
 0x12d   : > { %v875_v39 = vpop.permute.xlu1 %874 }
 0x12e   : > { %964 = vst.msk [vmem:[#allocation3 + $0x38] sm:$0xff] %vm956_vm4, %v875_v39  ;;  %v881_v42 = vpop.permute.xlu0 %880 }
 0x12f   : > { %1248 = vrot.lane.b32.xlu1 %v7330_v41, %s4878_s29  ;;  %967 = vst.msk [vmem:[#allocation3 + $0x50] sm:$0xff] %vm956_vm4, %v881_v42  ;;  %v7344_v41 = vld [vmem:[#allocation26_spill] sm:$0xff] }
 0x130   : > { %1254 = vrot.lane.b32.xlu0 %v7331_v44, %s4878_s29  ;;  %v7345_v44 = vld [vmem:[#allocation27_spill] sm:$0xff] }
 0x131   : > { %v879_v43 = vpop.permute.xlu1 %878 }
 0x132   : > { %966 = vst.msk [vmem:[#allocation3 + $0x48] sm:$0xff] %vm956_vm4, %v879_v43  ;;  %v885_v51 = vpop.permute.xlu0 %884 }
 0x133   : > { %1252 = vrot.lane.b32.xlu1 %v7332_v46, %s4878_s29  ;;  %969 = vst.msk [vmem:[#allocation3 + $0x60] sm:$0xff] %vm956_vm4, %v885_v51  ;;  %v7346_v46 = vld [vmem:[#allocation28_spill] sm:$0xff] }
 0x134   : > { %1258 = vrot.lane.b32.xlu0 %v7333_v56, %s4878_s29  ;;  %v7347_v56 = vld [vmem:[#allocation29_spill] sm:$0xff] }
 0x135   : > { %v883_v53 = vpop.permute.xlu1 %882 }
 0x136   : > { %968 = vst.msk [vmem:[#allocation3 + $0x58] sm:$0xff] %vm956_vm4, %v883_v53  ;;  %v889_v11 = vpop.permute.xlu0 %888 }
 0x137   : > { %1256 = vrot.lane.b32.xlu1 %v7334_v63, %s4878_s29  ;;  %971 = vst.msk [vmem:[#allocation3 + $0x70] sm:$0xff] %vm956_vm4, %v889_v11  ;;  %v7348_v63 = vld [vmem:[#allocation30_spill] sm:$0xff] }
 0x138   : > { %1262 = vrot.lane.b32.xlu0 %v7335_v15, %s4878_s29  ;;  %v7349_v15 = vld [vmem:[#allocation31_spill] sm:$0xff] }
 0x139   : > { %v887_v14 = vpop.permute.xlu1 %886 }
 0x13a   : > { %970 = vst.msk [vmem:[#allocation3 + $0x68] sm:$0xff] %vm956_vm4, %v887_v14  ;;  %v893_v19 = vpop.permute.xlu0 %892 }
 0x13b   : > { %1260 = vrot.lane.b32.xlu1 %v7336_v18, %s4878_s29  ;;  %973 = vst.msk [vmem:[#allocation3 + $0x80] sm:$0xff] %vm956_vm4, %v893_v19  ;;  %v7350_v18 = vld [vmem:[#allocation32_spill] sm:$0xff] }
 0x13c   : > { %1266 = vrot.lane.b32.xlu0 %v7337_v34, %s4878_s29  ;;  %v7351_v34 = vld [vmem:[#allocation33_spill] sm:$0xff] }
 0x13d   : > { %v891_v22 = vpop.permute.xlu1 %890 }
 0x13e   : > { %972 = vst.msk [vmem:[#allocation3 + $0x78] sm:$0xff] %vm956_vm4, %v891_v22  ;;  %v897_v49 = vpop.permute.xlu0 %896 }
 0x13f   : > { %1264 = vrot.lane.b32.xlu1 %v7338_v23, %s4878_s29  ;;  %975 = vst.msk [vmem:[#allocation3 + $0x90] sm:$0xff] %vm956_vm4, %v897_v49  ;;  %v7352_v23 = vld [vmem:[#allocation34_spill] sm:$0xff] }
 0x140   : > { %1270 = vrot.lane.b32.xlu0 %v7339_v33, %s4878_s29  ;;  %v7353_v33 = vld [vmem:[#allocation35_spill] sm:$0xff] }
 0x141   : > { %v895_v45 = vpop.permute.xlu1 %894 }
 0x142   : > { %974 = vst.msk [vmem:[#allocation3 + $0x88] sm:$0xff] %vm956_vm4, %v895_v45  ;;  %v901_v47 = vpop.permute.xlu0 %900 }
 0x143   : > { %1268 = vrot.lane.b32.xlu1 %v7340_v25, %s4878_s29  ;;  %977 = vst.msk [vmem:[#allocation3 + $0xa0] sm:$0xff] %vm956_vm4, %v901_v47 }
 0x144   : > { %1274 = vrot.lane.b32.xlu0 %v7341_v30, %s4878_s29 }
 0x145   : > { %v899_v26 = vpop.permute.xlu1 %898 }
 0x146   : > { %976 = vst.msk [vmem:[#allocation3 + $0x98] sm:$0xff] %vm956_vm4, %v899_v26  ;;  %v905_v32 = vpop.permute.xlu0 %904  ;;  %v5773_v26 = vld [vmem:[#allocation2 + $0x182] sm:$0xff] }
 0x147   : > { %1272 = vrot.lane.b32.xlu1 %v7342_v31, %s4878_s29  ;;  %979 = vst.msk [vmem:[#allocation3 + $0xb0] sm:$0xff] %vm956_vm4, %v905_v32  ;;  %v5784_v31 = vld [vmem:[#allocation2 + $0x18a] sm:$0xff] }
 0x148   : > { %1278 = vrot.lane.b32.xlu0 %v7343_v40, %s4878_s29 }
 0x149   : > { %v903_v39 = vpop.permute.xlu1 %902 }
 0x14a   : > { %978 = vst.msk [vmem:[#allocation3 + $0xa8] sm:$0xff] %vm956_vm4, %v903_v39  ;;  %v909_v42 = vpop.permute.xlu0 %908 }
 0x14b   : > { %1276 = vrot.lane.b32.xlu1 %v7344_v41, %s4878_s29  ;;  %981 = vst.msk [vmem:[#allocation3 + $0xc0] sm:$0xff] %vm956_vm4, %v909_v42 }
 0x14c   : > { %1282 = vrot.lane.b32.xlu0 %v7345_v44, %s4878_s29 }
 0x14d   : > { %v907_v43 = vpop.permute.xlu1 %906 }
 0x14e   : > { %980 = vst.msk [vmem:[#allocation3 + $0xb8] sm:$0xff] %vm956_vm4, %v907_v43  ;;  %v913_v51 = vpop.permute.xlu0 %912 }
 0x14f   : > { %1280 = vrot.lane.b32.xlu1 %v7346_v46, %s4878_s29  ;;  %983 = vst.msk [vmem:[#allocation3 + $0xd0] sm:$0xff] %vm956_vm4, %v913_v51  ;;  %v1570_v46 = vld [vmem:[#allocation2 + $0x39] sm:$0xff] }
 0x150   : > { %1286 = vrot.lane.b32.xlu0 %v7347_v56, %s4878_s29  ;;  %v1572_v56 = vld [vmem:[#allocation2 + $0x51] sm:$0xff] }
 0x151   : > { %v911_v53 = vpop.permute.xlu1 %910 }
 0x152   : > { %982 = vst.msk [vmem:[#allocation3 + $0xc8] sm:$0xff] %vm956_vm4, %v911_v53  ;;  %v917_v11 = vpop.permute.xlu0 %916 }
 0x153   : > { %1284 = vrot.lane.b32.xlu1 %v7348_v63, %s4878_s29  ;;  %985 = vst.msk [vmem:[#allocation3 + $0xe0] sm:$0xff] %vm956_vm4, %v917_v11  ;;  %v1575_v11 = vld [vmem:[#allocation2 + $0x79] sm:$0xff] }
 0x154   : > { %1290 = vrot.lane.b32.xlu0 %v7349_v15, %s4878_s29  ;;  %v1574_v15 = vld [vmem:[#allocation2 + $0x69] sm:$0xff] }
 0x155   : > { %v915_v14 = vpop.permute.xlu1 %914 }
 0x156   : > { %984 = vst.msk [vmem:[#allocation3 + $0xd8] sm:$0xff] %vm956_vm4, %v915_v14  ;;  %v921_v19 = vpop.permute.xlu0 %920 }
 0x157   : > { %1288 = vrot.lane.b32.xlu1 %v7350_v18, %s4878_s29  ;;  %987 = vst.msk [vmem:[#allocation3 + $0xf0] sm:$0xff] %vm956_vm4, %v921_v19  ;;  %v1577_v19 = vld [vmem:[#allocation2 + $0x91] sm:$0xff] }
 0x158   : > { %1294 = vrot.lane.b32.xlu0 %v7351_v34, %s4878_s29  ;;  %v1576_v34 = vld [vmem:[#allocation2 + $0x81] sm:$0xff] }
 0x159   : > { %v919_v22 = vpop.permute.xlu1 %918 }
 0x15a   : > { %986 = vst.msk [vmem:[#allocation3 + $0xe8] sm:$0xff] %vm956_vm4, %v919_v22  ;;  %v1054_v49 = vpop.permute.xlu0 %1053 }
 0x15b   : > { %1292 = vrot.lane.b32.xlu1 %v7352_v23, %s4878_s29  ;;  %1150 = vst.msk [vmem:[#allocation3] sm:$0xff] %vm1149_vm5, %v1054_v49  ;;  %v1579_v49 = vld [vmem:[#allocation2 + $0xa9] sm:$0xff] }
 0x15c   : > { %1298 = vrot.lane.b32.xlu0 %v5461_v36, %s4878_s29 }
 0x15d   : > { %v923_v45 = vpop.permute.xlu1 %922 }
 0x15e   : > { %988 = vst.msk [vmem:[#allocation3 + $0xf8] sm:$0xff] %vm956_vm4, %v923_v45  ;;  %v1058_v25 = vpop.permute.xlu0 %1057  ;;  %vm3829_vm4 = vcmask 523712  }
 0x15f   : > { %1296 = vrot.lane.b32.xlu1 %v7353_v33, %s4878_s29  ;;  %1152 = vst.msk [vmem:[#allocation3 + $0x10] sm:$0xff] %vm1149_vm5, %v1058_v25  ;;  %v1578_v33 = vld [vmem:[#allocation2 + $0x99] sm:$0xff] }
 0x160   : > { %1302 = vrot.lane.b32.xlu0 %v5471_v37, %s4878_s29 }
 0x161   : > { %v1056_v47 = vpop.permute.xlu1 %1055 }
 0x162   : > { %1151 = vst.msk [vmem:[#allocation3 + $0x8] sm:$0xff] %vm1149_vm5, %v1056_v47  ;;  %v1062_v36 = vpop.permute.xlu0 %1061  ;;  %v1581_v47 = vld [vmem:[#allocation2 + $0xc1] sm:$0xff] }
 0x163   : > { %1300 = vrot.lane.b32.xlu1 %v5476_v0, %s4878_s29  ;;  %1154 = vst.msk [vmem:[#allocation3 + $0x20] sm:$0xff] %vm1149_vm5, %v1062_v36  ;;  %v1991_v36 = vld [vmem:[%s7256_s1 + $0x20] sm:$0xf] }
 0x164   : > { %1306 = vrot.lane.b32.xlu0 %v5773_v26, %s4878_s29  ;;  %4702 = vmatprep.subr.msk.mxu0 %vm2096_vm7, %v1991_v36 }
 0x165   : > { %v1060_v30 = vpop.permute.xlu1 %1059  ;;  %4703 = vmatpush3.msk.msra.mxu0 %vm2096_vm7, %v1991_v36  ;;  %v1589_v36 = vld [vmem:[#allocation2 + $0x121] sm:$0xff] }
 0x166   : > { %1153 = vst.msk [vmem:[#allocation3 + $0x18] sm:$0xff] %vm1149_vm5, %v1060_v30  ;;  %v1066_v37 = vpop.permute.xlu0 %1065 }
 0x167   : > { %1304 = vrot.lane.b32.xlu1 %v5484_v38, %s4878_s29  ;;  %1156 = vst.msk [vmem:[#allocation3 + $0x30] sm:$0xff] %vm1149_vm5, %v1066_v37  ;;  %v1580_v37 = vld [vmem:[#allocation2 + $0xb1] sm:$0xff] }
 0x168   : > { %1440 = vrot.lane.b32.xlu0 %v5172_v50, %s4879_s30 }
 0x169   : > { %v1064_v32 = vpop.permute.xlu1 %1063 }
 0x16a   : > { %1155 = vst.msk [vmem:[#allocation3 + $0x28] sm:$0xff] %vm1149_vm5, %v1064_v32  ;;  %v1070_v0 = vpop.permute.xlu0 %1069 }
 0x16b   : > { %1308 = vrot.lane.b32.xlu1 %v5784_v31, %s4878_s29  ;;  %1158 = vst.msk [vmem:[#allocation3 + $0x40] sm:$0xff] %vm1149_vm5, %v1070_v0  ;;  %v1583_v0 = vld [vmem:[#allocation2 + $0xd9] sm:$0xff] }
 0x16c   : > { %1444 = vrot.lane.b32.xlu0 %v5188_v54, %s4879_s30 }
 0x16d   : > { %v1068_v39 = vpop.permute.xlu1 %1067 }
 0x16e   : > { %1157 = vst.msk [vmem:[#allocation3 + $0x38] sm:$0xff] %vm1149_vm5, %v1068_v39  ;;  %v1074_v38 = vpop.permute.xlu0 %1073  ;;  %v1990_v39 = vld [vmem:[%s7256_s1 + $0x18] sm:$0xff] }
 0x16f   : > { %1442 = vrot.lane.b32.xlu1 %v5180_v52, %s4879_s30  ;;  %1160 = vst.msk [vmem:[#allocation3 + $0x50] sm:$0xff] %vm1149_vm5, %v1074_v38  ;;  %v1989_v38 = vld [vmem:[%s7256_s1 + $0x10] sm:$0xff]  ;;  %4704 = vmatprep.subr.mxu0 %v1990_v39 }
 0x170   : > { %1448 = vrot.lane.b32.xlu0 %v5198_v57, %s4879_s30  ;;  %4705 = vmatpush3.msra.mxu0 %v1990_v39 }
 0x171   : > { %v1072_v50 = vpop.permute.xlu1 %1071  ;;  %4706 = vmatprep.subr.mxu0 %v1989_v38 }
 0x172   : > { %1159 = vst.msk [vmem:[#allocation3 + $0x48] sm:$0xff] %vm1149_vm5, %v1072_v50  ;;  %v1078_v40 = vpop.permute.xlu0 %1077  ;;  %4707 = vmatpush3.msra.mxu0 %v1989_v38  ;;  %v1590_v38 = vld [vmem:[#allocation2 + $0x129] sm:$0xff] }
 0x173   : > { %1446 = vrot.lane.b32.xlu1 %v5190_v55, %s4879_s30  ;;  %1162 = vst.msk [vmem:[#allocation3 + $0x60] sm:$0xff] %vm1149_vm5, %v1078_v40  ;;  %v1582_v40 = vld [vmem:[#allocation2 + $0xc9] sm:$0xff] }
 0x174   : > { %1452 = vrot.lane.b32.xlu0 %v5202_v59, %s4879_s30 }
 0x175   : > { %v1076_v54 = vpop.permute.xlu1 %1075 }
 0x176   : > { %1161 = vst.msk [vmem:[#allocation3 + $0x58] sm:$0xff] %vm1149_vm5, %v1076_v54  ;;  %v1082_v52 = vpop.permute.xlu0 %1081 }
 0x177   : > { %1450 = vrot.lane.b32.xlu1 %v5200_v58, %s4879_s30  ;;  %1164 = vst.msk [vmem:[#allocation3 + $0x70] sm:$0xff] %vm1149_vm5, %v1082_v52  ;;  %v1585_v52 = vld [vmem:[#allocation2 + $0xf1] sm:$0xff] }
 0x178   : > { %1456 = vrot.lane.b32.xlu0 %v5214_v61, %s4879_s30 }
 0x179   : > { %v1080_v57 = vpop.permute.xlu1 %1079 }
 0x17a   : > { %1163 = vst.msk [vmem:[#allocation3 + $0x68] sm:$0xff] %vm1149_vm5, %v1080_v57  ;;  %v1086_v55 = vpop.permute.xlu0 %1085  ;;  %v1988_v57 = vld [vmem:[%s7256_s1 + $0x8] sm:$0xff] }
 0x17b   : > { %1454 = vrot.lane.b32.xlu1 %v5212_v60, %s4879_s30  ;;  %1166 = vst.msk [vmem:[#allocation3 + $0x80] sm:$0xff] %vm1149_vm5, %v1086_v55  ;;  %v1987_v55 = vld [vmem:[%s7256_s1] sm:$0xff]  ;;  %4708 = vmatprep.subr.mxu0 %v1988_v57 }
 0x17c   : > { %1460 = vrot.lane.b32.xlu0 %v5226_v1, %s4879_s30  ;;  %4709 = vmatpush3.msra.mxu0 %v1988_v57 }
 0x17d   : > { %v1084_v59 = vpop.permute.xlu1 %1083  ;;  %4710 = vmatprep.subr.mxu0 %v1987_v55 }
 0x17e   : > { %1165 = vst.msk [vmem:[#allocation3 + $0x78] sm:$0xff] %vm1149_vm5, %v1084_v59  ;;  %v1090_v58 = vpop.permute.xlu0 %1089  ;;  %4711 = vmatpush3.msra.mxu0 %v1987_v55  ;;  %v1784_v55 = vld [vmem:[#allocation2 + $0x13a] sm:$0xff] }
 0x17f   : > { %1458 = vrot.lane.b32.xlu1 %v5216_v62, %s4879_s30  ;;  %1168 = vst.msk [vmem:[#allocation3 + $0x90] sm:$0xff] %vm1149_vm5, %v1090_v58  ;;  %v1584_v58 = vld [vmem:[#allocation2 + $0xe1] sm:$0xff] }
 0x180   : > { %1464 = vrot.lane.b32.xlu0 %v5230_v3, %s4879_s30 }
 0x181   : > { %v1088_v61 = vpop.permute.xlu1 %1087 }
 0x182   : > { %1167 = vst.msk [vmem:[#allocation3 + $0x88] sm:$0xff] %vm1149_vm5, %v1088_v61  ;;  %v1094_v60 = vpop.permute.xlu0 %1093 }
 0x183   : > { %1462 = vrot.lane.b32.xlu1 %v5228_v2, %s4879_s30  ;;  %1170 = vst.msk [vmem:[#allocation3 + $0xa0] sm:$0xff] %vm1149_vm5, %v1094_v60  ;;  %v1763_v60 = vld [vmem:[#allocation2 + $0x3a] sm:$0xff] }
 0x184   : > { %1468 = vrot.lane.b32.xlu0 %v5242_v5, %s4879_s30 }
 0x185   : > { %v1092_v1 = vpop.permute.xlu1 %1091 }
 0x186   : > { %1169 = vst.msk [vmem:[#allocation3 + $0x98] sm:$0xff] %vm1149_vm5, %v1092_v1  ;;  %v1098_v62 = vpop.permute.xlu0 %1097 }
 0x187   : > { %1466 = vrot.lane.b32.xlu1 %v5240_v4, %s4879_s30  ;;  %1172 = vst.msk [vmem:[#allocation3 + $0xb0] sm:$0xff] %vm1149_vm5, %v1098_v62  ;;  %v1762_v62 = vld [vmem:[#allocation2 + $0x32] sm:$0xff] }
 0x188   : > { %1472 = vrot.lane.b32.xlu0 %v5252_v7, %s4879_s30 }
 0x189   : > { %v1096_v3 = vpop.permute.xlu1 %1095 }
 0x18a   : > { %1171 = vst.msk [vmem:[#allocation3 + $0xa8] sm:$0xff] %vm1149_vm5, %v1096_v3  ;;  %v1102_v2 = vpop.permute.xlu0 %1101 }
 0x18b   : > { %1470 = vrot.lane.b32.xlu1 %v5244_v6, %s4879_s30  ;;  %1174 = vst.msk [vmem:[#allocation3 + $0xc0] sm:$0xff] %vm1149_vm5, %v1102_v2  ;;  %v1765_v2 = vld [vmem:[#allocation2 + $0x52] sm:$0xff] }
 0x18c   : > { %1476 = vrot.lane.b32.xlu0 %v5256_v9, %s4879_s30 }
 0x18d   : > { %v1100_v5 = vpop.permute.xlu1 %1099 }
 0x18e   : > { %1173 = vst.msk [vmem:[#allocation3 + $0xb8] sm:$0xff] %vm1149_vm5, %v1100_v5  ;;  %v1106_v4 = vpop.permute.xlu0 %1105 }
 0x18f   : > { %1474 = vrot.lane.b32.xlu1 %v5254_v8, %s4879_s30  ;;  %1176 = vst.msk [vmem:[#allocation3 + $0xd0] sm:$0xff] %vm1149_vm5, %v1106_v4  ;;  %v1764_v4 = vld [vmem:[#allocation2 + $0x4a] sm:$0xff] }
 0x190   : > { %1480 = vrot.lane.b32.xlu0 %v5272_v12, %s4879_s30 }
 0x191   : > { %v1104_v7 = vpop.permute.xlu1 %1103 }
 0x192   : > { %1175 = vst.msk [vmem:[#allocation3 + $0xc8] sm:$0xff] %vm1149_vm5, %v1104_v7  ;;  %v1110_v6 = vpop.permute.xlu0 %1109 }
 0x193   : > { %1478 = vrot.lane.b32.xlu1 %v5266_v10, %s4879_s30  ;;  %1178 = vst.msk [vmem:[#allocation3 + $0xe0] sm:$0xff] %vm1149_vm5, %v1110_v6  ;;  %v1767_v6 = vld [vmem:[#allocation2 + $0x6a] sm:$0xff] }
 0x194   : > { %1484 = vrot.lane.b32.xlu0 %v5288_v16, %s4879_s30 }
 0x195   : > { %v1108_v9 = vpop.permute.xlu1 %1107 }
 0x196   : > { %1177 = vst.msk [vmem:[#allocation3 + $0xd8] sm:$0xff] %vm1149_vm5, %v1108_v9  ;;  %v1114_v8 = vpop.permute.xlu0 %1113 }
 0x197   : > { %1482 = vrot.lane.b32.xlu1 %v5278_v13, %s4879_s30  ;;  %1180 = vst.msk [vmem:[#allocation3 + $0xf0] sm:$0xff] %vm1149_vm5, %v1114_v8  ;;  %v1766_v8 = vld [vmem:[#allocation2 + $0x62] sm:$0xff] }
 0x198   : > { %1488 = vrot.lane.b32.xlu0 %v5304_v20, %s4879_s30 }
 0x199   : > { %v1112_v12 = vpop.permute.xlu1 %1111 }
 0x19a   : > { %1179 = vst.msk [vmem:[#allocation3 + $0xe8] sm:$0xff] %vm1149_vm5, %v1112_v12  ;;  %v1247_v10 = vpop.permute.xlu0 %1246 }
 0x19b   : > { %1486 = vrot.lane.b32.xlu1 %v5294_v17, %s4879_s30  ;;  %1343 = vst.msk [vmem:[#allocation3] sm:$0xff] %vm1342_vm6, %v1247_v10  ;;  %v1406_v17 = vld [vmem:[#allocation2 + $0x198] sm:$0xff]  ;;  %v1769_v10 = vld [vmem:[#allocation2 + $0x82] sm:$0xff] }
 0x19c   : > { %1492 = vrot.lane.b32.xlu0 %v5320_v24, %s4879_s30 }
 0x19d   : > { %v1116_v16 = vpop.permute.xlu1 %1115 }
 0x19e   : > { %1181 = vst.msk [vmem:[#allocation3 + $0xf8] sm:$0xff] %vm1149_vm5, %v1116_v16  ;;  %v1251_v13 = vpop.permute.xlu0 %1250  ;;  %vm4022_vm5 = vcmask 589312  }
 0x19f   : > { %1490 = vrot.lane.b32.xlu1 %v5310_v21, %s4879_s30  ;;  %1345 = vst.msk [vmem:[#allocation3 + $0x10] sm:$0xff] %vm1342_vm6, %v1251_v13  ;;  %v1569_v21 = vld [vmem:[#allocation2 + $0x31] sm:$0xff]  ;;  %v1768_v13 = vld [vmem:[#allocation2 + $0x7a] sm:$0xff] }
 0x1a0   : > { %1496 = vrot.lane.b32.xlu0 %v5573_v48, %s4879_s30  ;;  %v1407_v48 = vld [vmem:[#allocation2 + $0x1a0] sm:$0xff] }
 0x1a1   : > { %v1249_v20 = vpop.permute.xlu1 %1248 }
 0x1a2   : > { %1344 = vst.msk [vmem:[#allocation3 + $0x8] sm:$0xff] %vm1342_vm6, %v1249_v20  ;;  %v1255_v41 = vpop.permute.xlu0 %1254 }
 0x1a3   : > { %1494 = vrot.lane.b32.xlu1 %v5326_v28, %s4879_s30  ;;  %1347 = vst.msk [vmem:[#allocation3 + $0x20] sm:$0xff] %vm1342_vm6, %v1255_v41  ;;  %v1571_v28 = vld [vmem:[#allocation2 + $0x49] sm:$0xff] }
 0x1a4   : > { %1500 = vrot.lane.b32.xlu0 %v1406_v17, %s4879_s30  ;;  %v1771_v17 = vld [vmem:[#allocation2 + $0x9a] sm:$0xff] }
 0x1a5   : > { %v1253_v24 = vpop.permute.xlu1 %1252 }
 0x1a6   : > { %1346 = vst.msk [vmem:[#allocation3 + $0x18] sm:$0xff] %vm1342_vm6, %v1253_v24  ;;  %v1259_v42 = vpop.permute.xlu0 %1258  ;;  %v1770_v24 = vld [vmem:[#allocation2 + $0x92] sm:$0xff] }
 0x1a7   : > { %1498 = vrot.lane.b32.xlu1 %v5584_v35, %s4879_s30  ;;  %1349 = vst.msk [vmem:[#allocation3 + $0x30] sm:$0xff] %vm1342_vm6, %v1259_v42  ;;  %v1573_v35 = vld [vmem:[#allocation2 + $0x61] sm:$0xff]  ;;  %v1773_v42 = vld [vmem:[#allocation2 + $0xb2] sm:$0xff] }
 0x1a8   : > { %1633 = vrot.lane.b32.xlu0 %v1569_v21, %s4880_s6 }
 0x1a9   : > { %v1257_v43 = vpop.permute.xlu1 %1256 }
 0x1aa   : > { %1348 = vst.msk [vmem:[#allocation3 + $0x28] sm:$0xff] %vm1342_vm6, %v1257_v43  ;;  %v1263_v44 = vpop.permute.xlu0 %1262  ;;  %v1772_v43 = vld [vmem:[#allocation2 + $0xaa] sm:$0xff] }
 0x1ab   : > { %1502 = vrot.lane.b32.xlu1 %v1407_v48, %s4879_s30  ;;  %1351 = vst.msk [vmem:[#allocation3 + $0x40] sm:$0xff] %vm1342_vm6, %v1263_v44  ;;  %v1775_v44 = vld [vmem:[#allocation2 + $0xca] sm:$0xff] }
 0x1ac   : > { %1637 = vrot.lane.b32.xlu0 %v1571_v28, %s4880_s6 }
 0x1ad   : > { %v1261_v51 = vpop.permute.xlu1 %1260 }
 0x1ae   : > { %1350 = vst.msk [vmem:[#allocation3 + $0x38] sm:$0xff] %vm1342_vm6, %v1261_v51  ;;  %v1267_v53 = vpop.permute.xlu0 %1266  ;;  %v1774_v51 = vld [vmem:[#allocation2 + $0xc2] sm:$0xff] }
 0x1af   : > { %1635 = vrot.lane.b32.xlu1 %v1570_v46, %s4880_s6  ;;  %1353 = vst.msk [vmem:[#allocation3 + $0x50] sm:$0xff] %vm1342_vm6, %v1267_v53  ;;  %v1777_v53 = vld [vmem:[#allocation2 + $0xe2] sm:$0xff] }
 0x1b0   : > { %1641 = vrot.lane.b32.xlu0 %v1573_v35, %s4880_s6 }
 0x1b1   : > { %v1265_v63 = vpop.permute.xlu1 %1264 }
 0x1b2   : > { %1352 = vst.msk [vmem:[#allocation3 + $0x48] sm:$0xff] %vm1342_vm6, %v1265_v63  ;;  %v1271_v14 = vpop.permute.xlu0 %1270  ;;  %v1776_v63 = vld [vmem:[#allocation2 + $0xda] sm:$0xff] }
 0x1b3   : > { %1639 = vrot.lane.b32.xlu1 %v1572_v56, %s4880_s6  ;;  %1355 = vst.msk [vmem:[#allocation3 + $0x60] sm:$0xff] %vm1342_vm6, %v1271_v14  ;;  %v1778_v14 = vld [vmem:[#allocation2 + $0xf2] sm:$0xff] }
 0x1b4   : > { %1645 = vrot.lane.b32.xlu0 %v1575_v11, %s4880_s6 }
 0x1b5   : > { %v1269_v18 = vpop.permute.xlu1 %1268 }
 0x1b6   : > { %1354 = vst.msk [vmem:[#allocation3 + $0x58] sm:$0xff] %vm1342_vm6, %v1269_v18  ;;  %v1275_v22 = vpop.permute.xlu0 %1274  ;;  %v1586_v18 = vld [vmem:[#allocation2 + $0xf9] sm:$0xff] }
 0x1b7   : > { %1643 = vrot.lane.b32.xlu1 %v1574_v15, %s4880_s6  ;;  %1357 = vst.msk [vmem:[#allocation3 + $0x70] sm:$0xff] %vm1342_vm6, %v1275_v22  ;;  %v1587_v22 = vld [vmem:[#allocation2 + $0x109] sm:$0xff] }
 0x1b8   : > { %1649 = vrot.lane.b32.xlu0 %v1577_v19, %s4880_s6 }
 0x1b9   : > { %v1273_v23 = vpop.permute.xlu1 %1272 }
 0x1ba   : > { %1356 = vst.msk [vmem:[#allocation3 + $0x68] sm:$0xff] %vm1342_vm6, %v1273_v23  ;;  %v1279_v45 = vpop.permute.xlu0 %1278  ;;  %v1779_v23 = vld [vmem:[#allocation2 + $0xfa] sm:$0xff] }
 0x1bb   : > { %1647 = vrot.lane.b32.xlu1 %v1576_v34, %s4880_s6  ;;  %1359 = vst.msk [vmem:[#allocation3 + $0x80] sm:$0xff] %vm1342_vm6, %v1279_v45  ;;  %v1780_v45 = vld [vmem:[#allocation2 + $0x10a] sm:$0xff] }
 0x1bc   : > { %1653 = vrot.lane.b32.xlu0 %v1579_v49, %s4880_s6 }
 0x1bd   : > { %v1277_v25 = vpop.permute.xlu1 %1276 }
 0x1be   : > { %1358 = vst.msk [vmem:[#allocation3 + $0x78] sm:$0xff] %vm1342_vm6, %v1277_v25  ;;  %v1283_v30 = vpop.permute.xlu0 %1282  ;;  %v1588_v25 = vld [vmem:[#allocation2 + $0x111] sm:$0xff] }
 0x1bf   : > { %1651 = vrot.lane.b32.xlu1 %v1578_v33, %s4880_s6  ;;  %1361 = vst.msk [vmem:[#allocation3 + $0x90] sm:$0xff] %vm1342_vm6, %v1283_v30 }
 0x1c0   : > { %1657 = vrot.lane.b32.xlu0 %v1581_v47, %s4880_s6 }
 0x1c1   : > { %v1281_v32 = vpop.permute.xlu1 %1280 }
 0x1c2   : > { %1360 = vst.msk [vmem:[#allocation3 + $0x88] sm:$0xff] %vm1342_vm6, %v1281_v32  ;;  %v1287_v50 = vpop.permute.xlu0 %1286 }
 0x1c3   : > { %1655 = vrot.lane.b32.xlu1 %v1580_v37, %s4880_s6  ;;  %1363 = vst.msk [vmem:[#allocation3 + $0xa0] sm:$0xff] %vm1342_vm6, %v1287_v50  ;;  %v1781_v37 = vld [vmem:[#allocation2 + $0x112] sm:$0xff] }
 0x1c4   : > { %1661 = vrot.lane.b32.xlu0 %v1583_v0, %s4880_s6  ;;  %v1782_v0 = vld [vmem:[#allocation2 + $0x122] sm:$0xff] }
 0x1c5   : > { %v1285_v54 = vpop.permute.xlu1 %1284 }
 0x1c6   : > { %1362 = vst.msk [vmem:[#allocation3 + $0x98] sm:$0xff] %vm1342_vm6, %v1285_v54  ;;  %v1291_v59 = vpop.permute.xlu0 %1290 }
 0x1c7   : > { %1659 = vrot.lane.b32.xlu1 %v1582_v40, %s4880_s6  ;;  %1365 = vst.msk [vmem:[#allocation3 + $0xb0] sm:$0xff] %vm1342_vm6, %v1291_v59  ;;  %v1591_v40 = vld [vmem:[#allocation2 + $0x139] sm:$0xff] }
 0x1c8   : > { %1665 = vrot.lane.b32.xlu0 %v1585_v52, %s4880_s6  ;;  %v1783_v52 = vld [vmem:[#allocation2 + $0x12a] sm:$0xff] }
 0x1c9   : > { %v1289_v61 = vpop.permute.xlu1 %1288 }
 0x1ca   : > { %1364 = vst.msk [vmem:[#allocation3 + $0xa8] sm:$0xff] %vm1342_vm6, %v1289_v61  ;;  %v1295_v1 = vpop.permute.xlu0 %1294 }
 0x1cb   : > { %1663 = vrot.lane.b32.xlu1 %v1584_v58, %s4880_s6  ;;  %1367 = vst.msk [vmem:[#allocation3 + $0xc0] sm:$0xff] %vm1342_vm6, %v1295_v1  ;;  %v1592_v58 = vld [vmem:[#allocation2 + $0x141] sm:$0xff] }
 0x1cc   : > { %1828 = vrot.lane.b32.xlu0 %v1763_v60, %s4881_s17  ;;  %v1593_v60 = vld [vmem:[#allocation2 + $0x151] sm:$0xff] }
 0x1cd   : > { %v1293_v3 = vpop.permute.xlu1 %1292 }
 0x1ce   : > { %1366 = vst.msk [vmem:[#allocation3 + $0xb8] sm:$0xff] %vm1342_vm6, %v1293_v3  ;;  %v1299_v5 = vpop.permute.xlu0 %1298 }
 0x1cf   : > { %1826 = vrot.lane.b32.xlu1 %v1762_v62, %s4881_s17  ;;  %1369 = vst.msk [vmem:[#allocation3 + $0xd0] sm:$0xff] %vm1342_vm6, %v1299_v5  ;;  %v1785_v62 = vld [vmem:[#allocation2 + $0x142] sm:$0xff] }
 0x1d0   : > { %1832 = vrot.lane.b32.xlu0 %v1765_v2, %s4881_s17  ;;  %v1786_v2 = vld [vmem:[#allocation2 + $0x152] sm:$0xff] }
 0x1d1   : > { %v1297_v7 = vpop.permute.xlu1 %1296 }
 0x1d2   : > { %1368 = vst.msk [vmem:[#allocation3 + $0xc8] sm:$0xff] %vm1342_vm6, %v1297_v7  ;;  %v1303_v9 = vpop.permute.xlu0 %1302 }
 0x1d3   : > { %1830 = vrot.lane.b32.xlu1 %v1764_v4, %s4881_s17  ;;  %1371 = vst.msk [vmem:[#allocation3 + $0xe0] sm:$0xff] %vm1342_vm6, %v1303_v9  ;;  %v1594_v4 = vld [vmem:[#allocation2 + $0x159] sm:$0xff] }
 0x1d4   : > { %1836 = vrot.lane.b32.xlu0 %v1767_v6, %s4881_s17  ;;  %v1595_v6 = vld [vmem:[#allocation2 + $0x169] sm:$0xff] }
 0x1d5   : > { %v1301_v12 = vpop.permute.xlu1 %1300 }
 0x1d6   : > { %1370 = vst.msk [vmem:[#allocation3 + $0xd8] sm:$0xff] %vm1342_vm6, %v1301_v12  ;;  %v1307_v16 = vpop.permute.xlu0 %1306 }
 0x1d7   : > { %1834 = vrot.lane.b32.xlu1 %v1766_v8, %s4881_s17  ;;  %1373 = vst.msk [vmem:[#allocation3 + $0xf0] sm:$0xff] %vm1342_vm6, %v1307_v16  ;;  %v1787_v8 = vld [vmem:[#allocation2 + $0x15a] sm:$0xff] }
 0x1d8   : > { %1840 = vrot.lane.b32.xlu0 %v1769_v10, %s4881_s17  ;;  %v1788_v10 = vld [vmem:[#allocation2 + $0x16a] sm:$0xff] }
 0x1d9   : > { %v1305_v20 = vpop.permute.xlu1 %1304 }
 0x1da   : > { %1372 = vst.msk [vmem:[#allocation3 + $0xe8] sm:$0xff] %vm1342_vm6, %v1305_v20  ;;  %v1441_v41 = vpop.permute.xlu0 %1440 }
 0x1db   : > { %1838 = vrot.lane.b32.xlu1 %v1768_v13, %s4881_s17  ;;  %1537 = vst.msk [vmem:[#allocation3] sm:$0xff] %vm1536_vm8, %v1441_v41  ;;  %v1596_v13 = vld [vmem:[#allocation2 + $0x171] sm:$0xff] }
 0x1dc   : > { %1844 = vrot.lane.b32.xlu0 %v1771_v17, %s4881_s17  ;;  %v1789_v41 = vld [vmem:[#allocation2 + $0x172] sm:$0xff] }
 0x1dd   : > { %v1309_v21 = vpop.permute.xlu1 %1308 }
 0x1de   : > { %1374 = vst.msk [vmem:[#allocation3 + $0xf8] sm:$0xff] %vm1342_vm6, %v1309_v21  ;;  %v1445_v48 = vpop.permute.xlu0 %1444  ;;  %vm4103_vm6 = vcmask 588800  }
 0x1df   : > { %1842 = vrot.lane.b32.xlu1 %v1770_v24, %s4881_s17  ;;  %1539 = vst.msk [vmem:[#allocation3 + $0x10] sm:$0xff] %vm1536_vm8, %v1445_v48 }
 0x1e0   : > { %1848 = vrot.lane.b32.xlu0 %v1773_v42, %s4881_s17 }
 0x1e1   : > { %v1443_v28 = vpop.permute.xlu1 %1442 }
 0x1e2   : > { %1538 = vst.msk [vmem:[#allocation3 + $0x8] sm:$0xff] %vm1536_vm8, %v1443_v28  ;;  %v1449_v46 = vpop.permute.xlu0 %1448 }
 0x1e3   : > { %1846 = vrot.lane.b32.xlu1 %v1772_v43, %s4881_s17  ;;  %1541 = vst.msk [vmem:[#allocation3 + $0x20] sm:$0xff] %vm1536_vm8, %v1449_v46 }
 0x1e4   : > { %1852 = vrot.lane.b32.xlu0 %v1775_v44, %s4881_s17 }
 0x1e5   : > { %v1447_v35 = vpop.permute.xlu1 %1446 }
 0x1e6   : > { %1540 = vst.msk [vmem:[#allocation3 + $0x18] sm:$0xff] %vm1536_vm8, %v1447_v35  ;;  %v1453_v56 = vpop.permute.xlu0 %1452 }
 0x1e7   : > { %1850 = vrot.lane.b32.xlu1 %v1774_v51, %s4881_s17  ;;  %1543 = vst.msk [vmem:[#allocation3 + $0x30] sm:$0xff] %vm1536_vm8, %v1453_v56 }
 0x1e8   : > { %1856 = vrot.lane.b32.xlu0 %v1777_v53, %s4881_s17 }
 0x1e9   : > { %v1451_v11 = vpop.permute.xlu1 %1450 }
 0x1ea   : > { %1542 = vst.msk [vmem:[#allocation3 + $0x28] sm:$0xff] %vm1536_vm8, %v1451_v11  ;;  %v1457_v15 = vpop.permute.xlu0 %1456 }
 0x1eb   : > { %1854 = vrot.lane.b32.xlu1 %v1776_v63, %s4881_s17  ;;  %1545 = vst.msk [vmem:[#allocation3 + $0x40] sm:$0xff] %vm1536_vm8, %v1457_v15 }
 0x1ec   : > { %1858 = vrot.lane.b32.xlu0 %v1778_v14, %s4881_s17 }
 0x1ed   : > { %v1455_v19 = vpop.permute.xlu1 %1454 }
 0x1ee   : > { %1544 = vst.msk [vmem:[#allocation3 + $0x38] sm:$0xff] %vm1536_vm8, %v1455_v19  ;;  %v1461_v34 = vpop.permute.xlu0 %1460 }
 0x1ef   : > { %1667 = vrot.lane.b32.xlu1 %v1586_v18, %s4880_s6  ;;  %1547 = vst.msk [vmem:[#allocation3 + $0x50] sm:$0xff] %vm1536_vm8, %v1461_v34 }
 0x1f0   : > { %1669 = vrot.lane.b32.xlu0 %v1587_v22, %s4880_s6 }
 0x1f1   : > { %v1459_v49 = vpop.permute.xlu1 %1458 }
 0x1f2   : > { %1546 = vst.msk [vmem:[#allocation3 + $0x48] sm:$0xff] %vm1536_vm8, %v1459_v49  ;;  %v1465_v33 = vpop.permute.xlu0 %1464 }
 0x1f3   : > { %1860 = vrot.lane.b32.xlu1 %v1779_v23, %s4881_s17  ;;  %1549 = vst.msk [vmem:[#allocation3 + $0x60] sm:$0xff] %vm1536_vm8, %v1465_v33 }
 0x1f4   : > { %1862 = vrot.lane.b32.xlu0 %v1780_v45, %s4881_s17 }
 0x1f5   : > { %v1463_v47 = vpop.permute.xlu1 %1462 }
 0x1f6   : > { %1548 = vst.msk [vmem:[#allocation3 + $0x58] sm:$0xff] %vm1536_vm8, %v1463_v47  ;;  %v1469_v30 = vpop.permute.xlu0 %1468 }
 0x1f7   : > { %1671 = vrot.lane.b32.xlu1 %v1588_v25, %s4880_s6  ;;  %1551 = vst.msk [vmem:[#allocation3 + $0x70] sm:$0xff] %vm1536_vm8, %v1469_v30 }
 0x1f8   : > { %1673 = vrot.lane.b32.xlu0 %v1589_v36, %s4880_s6 }
 0x1f9   : > { %v1467_v32 = vpop.permute.xlu1 %1466 }
 0x1fa   : > { %1550 = vst.msk [vmem:[#allocation3 + $0x68] sm:$0xff] %vm1536_vm8, %v1467_v32  ;;  %v1473_v39 = vpop.permute.xlu0 %1472 }
 0x1fb   : > { %1864 = vrot.lane.b32.xlu1 %v1781_v37, %s4881_s17  ;;  %1553 = vst.msk [vmem:[#allocation3 + $0x80] sm:$0xff] %vm1536_vm8, %v1473_v39 }
 0x1fc   : > { %1866 = vrot.lane.b32.xlu0 %v1782_v0, %s4881_s17 }
 0x1fd   : > { %v1471_v50 = vpop.permute.xlu1 %1470 }
 0x1fe   : > { %1552 = vst.msk [vmem:[#allocation3 + $0x78] sm:$0xff] %vm1536_vm8, %v1471_v50  ;;  %v1477_v54 = vpop.permute.xlu0 %1476 }
 0x1ff   : > { %1675 = vrot.lane.b32.xlu1 %v1590_v38, %s4880_s6  ;;  %1555 = vst.msk [vmem:[#allocation3 + $0x90] sm:$0xff] %vm1536_vm8, %v1477_v54 }
 0x200   : > { %1677 = vrot.lane.b32.xlu0 %v1591_v40, %s4880_s6 }
 0x201   : > { %v1475_v57 = vpop.permute.xlu1 %1474 }
 0x202   : > { %1554 = vst.msk [vmem:[#allocation3 + $0x88] sm:$0xff] %vm1536_vm8, %v1475_v57  ;;  %v1481_v59 = vpop.permute.xlu0 %1480 }
 0x203   : > { %1868 = vrot.lane.b32.xlu1 %v1783_v52, %s4881_s17  ;;  %1557 = vst.msk [vmem:[#allocation3 + $0xa0] sm:$0xff] %vm1536_vm8, %v1481_v59 }
 0x204   : > { %1870 = vrot.lane.b32.xlu0 %v1784_v55, %s4881_s17 }
 0x205   : > { %v1479_v61 = vpop.permute.xlu1 %1478 }
 0x206   : > { %1556 = vst.msk [vmem:[#allocation3 + $0x98] sm:$0xff] %vm1536_vm8, %v1479_v61  ;;  %v1485_v1 = vpop.permute.xlu0 %1484 }
 0x207   : > { %1679 = vrot.lane.b32.xlu1 %v1592_v58, %s4880_s6  ;;  %1559 = vst.msk [vmem:[#allocation3 + $0xb0] sm:$0xff] %vm1536_vm8, %v1485_v1 }
 0x208   : > { %1681 = vrot.lane.b32.xlu0 %v1593_v60, %s4880_s6 }
 0x209   : > { %v1483_v3 = vpop.permute.xlu1 %1482 }
 0x20a   : > { %1558 = vst.msk [vmem:[#allocation3 + $0xa8] sm:$0xff] %vm1536_vm8, %v1483_v3  ;;  %v1489_v5 = vpop.permute.xlu0 %1488 }
 0x20b   : > { %1872 = vrot.lane.b32.xlu1 %v1785_v62, %s4881_s17  ;;  %1561 = vst.msk [vmem:[#allocation3 + $0xc0] sm:$0xff] %vm1536_vm8, %v1489_v5 }
 0x20c   : > { %1874 = vrot.lane.b32.xlu0 %v1786_v2, %s4881_s17 }
 0x20d   : > { %v1487_v7 = vpop.permute.xlu1 %1486 }
 0x20e   : > { %1560 = vst.msk [vmem:[#allocation3 + $0xb8] sm:$0xff] %vm1536_vm8, %v1487_v7  ;;  %v1493_v9 = vpop.permute.xlu0 %1492 }
 0x20f   : > { %1683 = vrot.lane.b32.xlu1 %v1594_v4, %s4880_s6  ;;  %1563 = vst.msk [vmem:[#allocation3 + $0xd0] sm:$0xff] %vm1536_vm8, %v1493_v9 }
 0x210   : > { %1685 = vrot.lane.b32.xlu0 %v1595_v6, %s4880_s6 }
 0x211   : > { %v1491_v12 = vpop.permute.xlu1 %1490 }
 0x212   : > { %1562 = vst.msk [vmem:[#allocation3 + $0xc8] sm:$0xff] %vm1536_vm8, %v1491_v12  ;;  %v1497_v16 = vpop.permute.xlu0 %1496 }
 0x213   : > { %1876 = vrot.lane.b32.xlu1 %v1787_v8, %s4881_s17  ;;  %1565 = vst.msk [vmem:[#allocation3 + $0xe0] sm:$0xff] %vm1536_vm8, %v1497_v16 }
 0x214   : > { %1878 = vrot.lane.b32.xlu0 %v1788_v10, %s4881_s17 }
 0x215   : > { %v1495_v20 = vpop.permute.xlu1 %1494 }
 0x216   : > { %1564 = vst.msk [vmem:[#allocation3 + $0xd8] sm:$0xff] %vm1536_vm8, %v1495_v20  ;;  %v1501_v17 = vpop.permute.xlu0 %1500 }
 0x217   : > { %1687 = vrot.lane.b32.xlu1 %v1596_v13, %s4880_s6  ;;  %1567 = vst.msk [vmem:[#allocation3 + $0xf0] sm:$0xff] %vm1536_vm8, %v1501_v17 }
 0x218   : > { %1689 = vrot.lane.b32.xlu0 %v5673_v29, %s4880_s6 }
 0x219   : > { %v1499_v24 = vpop.permute.xlu1 %1498 }
 0x21a   : > { %1566 = vst.msk [vmem:[#allocation3 + $0xe8] sm:$0xff] %vm1536_vm8, %v1499_v24  ;;  %v1634_v21 = vpop.permute.xlu0 %1633 }
 0x21b   : > { %1880 = vrot.lane.b32.xlu1 %v1789_v41, %s4881_s17  ;;  %1730 = vst.msk [vmem:[#allocation3] sm:$0xff] %vm1729_vm9, %v1634_v21 }
 0x21c   : > { %1882 = vrot.lane.b32.xlu0 %v5773_v26, %s4881_s17 }
 0x21d   : > { %v1503_v42 = vpop.permute.xlu1 %1502 }
 0x21e   : > { %1568 = vst.msk [vmem:[#allocation3 + $0xf8] sm:$0xff] %vm1536_vm8, %v1503_v42  ;;  %v1638_v48 = vpop.permute.xlu0 %1637 }
 0x21f   : > { %1691 = vrot.lane.b32.xlu1 %v5684_v27, %s4880_s6  ;;  %1732 = vst.msk [vmem:[#allocation3 + $0x10] sm:$0xff] %vm1729_vm9, %v1638_v48 }
 0x221   : > { %v1636_v29 = vpop.permute.xlu1 %1635 }
 0x222   : > { %1731 = vst.msk [vmem:[#allocation3 + $0x8] sm:$0xff] %vm1729_vm9, %v1636_v29  ;;  %v1642_v43 = vpop.permute.xlu0 %1641 }
 0x223   : > { %1884 = vrot.lane.b32.xlu1 %v5784_v31, %s4881_s17  ;;  %1734 = vst.msk [vmem:[#allocation3 + $0x20] sm:$0xff] %vm1729_vm9, %v1642_v43 }
 0x225   : > { %v1640_v28 = vpop.permute.xlu1 %1639 }
 0x226   : > { %1733 = vst.msk [vmem:[#allocation3 + $0x18] sm:$0xff] %vm1729_vm9, %v1640_v28  ;;  %v1646_v26 = vpop.permute.xlu0 %1645 }
 0x227   : > { %1736 = vst.msk [vmem:[#allocation3 + $0x30] sm:$0xff] %vm1729_vm9, %v1646_v26 }
 0x229   : > { %v1644_v44 = vpop.permute.xlu1 %1643 }
 0x22a   : > { %1735 = vst.msk [vmem:[#allocation3 + $0x28] sm:$0xff] %vm1729_vm9, %v1644_v44  ;;  %v1650_v27 = vpop.permute.xlu0 %1649 }
 0x22b   : > { %1738 = vst.msk [vmem:[#allocation3 + $0x40] sm:$0xff] %vm1729_vm9, %v1650_v27 }
 0x22d   : > { %v1648_v46 = vpop.permute.xlu1 %1647 }
 0x22e   : > { %1737 = vst.msk [vmem:[#allocation3 + $0x38] sm:$0xff] %vm1729_vm9, %v1648_v46  ;;  %v1654_v51 = vpop.permute.xlu0 %1653 }
 0x22f   : > { %1740 = vst.msk [vmem:[#allocation3 + $0x50] sm:$0xff] %vm1729_vm9, %v1654_v51 }
 0x231   : > { %v1652_v31 = vpop.permute.xlu1 %1651 }
 0x232   : > { %1739 = vst.msk [vmem:[#allocation3 + $0x48] sm:$0xff] %vm1729_vm9, %v1652_v31  ;;  %v1658_v35 = vpop.permute.xlu0 %1657 }
 0x233   : > { %1742 = vst.msk [vmem:[#allocation3 + $0x60] sm:$0xff] %vm1729_vm9, %v1658_v35 }
 0x235   : > { %v1656_v53 = vpop.permute.xlu1 %1655 }
 0x236   : > { %1741 = vst.msk [vmem:[#allocation3 + $0x58] sm:$0xff] %vm1729_vm9, %v1656_v53  ;;  %v1662_v56 = vpop.permute.xlu0 %1661 }
 0x237   : > { %1744 = vst.msk [vmem:[#allocation3 + $0x70] sm:$0xff] %vm1729_vm9, %v1662_v56 }
 0x239   : > { %v1660_v63 = vpop.permute.xlu1 %1659 }
 0x23a   : > { %1743 = vst.msk [vmem:[#allocation3 + $0x68] sm:$0xff] %vm1729_vm9, %v1660_v63  ;;  %v1666_v11 = vpop.permute.xlu0 %1665 }
 0x23b   : > { %1746 = vst.msk [vmem:[#allocation3 + $0x80] sm:$0xff] %vm1729_vm9, %v1666_v11 }
 0x23d   : > { %v1664_v14 = vpop.permute.xlu1 %1663 }
 0x23e   : > { %1745 = vst.msk [vmem:[#allocation3 + $0x78] sm:$0xff] %vm1729_vm9, %v1664_v14  ;;  %v1829_v15 = vpop.permute.xlu0 %1828 }
 0x23f   : > { %1924 = vst.msk [vmem:[#allocation3 + $0x8] sm:$0xff] %vm1922_vm10, %v1829_v15 }
 0x241   : > { %v1827_v18 = vpop.permute.xlu1 %1826 }
 0x242   : > { %1923 = vst.msk [vmem:[#allocation3] sm:$0xff] %vm1922_vm10, %v1827_v18  ;;  %v1833_v19 = vpop.permute.xlu0 %1832 }
 0x243   : > { %1926 = vst.msk [vmem:[#allocation3 + $0x18] sm:$0xff] %vm1922_vm10, %v1833_v19  ;;  %v1599_v19 = vld [vmem:[#allocation2 + $0x199] sm:$0xff] }
 0x244   : > { %1693 = vrot.lane.b32.xlu0 %v1599_v19, %s4880_s6 }
 0x245   : > { %v1831_v22 = vpop.permute.xlu1 %1830 }
 0x246   : > { %1925 = vst.msk [vmem:[#allocation3 + $0x10] sm:$0xff] %vm1922_vm10, %v1831_v22  ;;  %v1837_v34 = vpop.permute.xlu0 %1836  ;;  %v1956_v23 = vld [vmem:[#allocation3 + $0x8] sm:$0xff]  ;;  %v1600_v22 = vld [vmem:[#allocation2 + $0x1a1] sm:$0xff] }
 0x247   : > { %1928 = vst.msk [vmem:[#allocation3 + $0x28] sm:$0xff] %vm1922_vm10, %v1837_v34  ;;  %v7354_v34 = vmov 0.0   ;;  %1695 = vrot.lane.b32.xlu1 %v1600_v22, %s4880_s6 }
 0x248   : > { %2363 = vst.msk [vmem:[#allocation4 + $0x20] sm:$0xff] %vm2357_vm12, %v7354_v34  ;;  %2358 = vst.msk [vmem:[#allocation4] sm:$0xff] %vm2357_vm12, %v7354_v34 }
 0x249   : > { %v1835_v49 = vpop.permute.xlu1 %1834  ;;  %v1955_v45 = vld [vmem:[#allocation3] sm:$0xff]  ;;  %2364 = vst.msk [vmem:[#allocation4 + $0x28] sm:$0x3] %vm2360_vm13, %v7354_v34  ;;  %2361 = vst.msk [vmem:[#allocation4 + $0x10] sm:$0x3] %vm2360_vm13, %v7354_v34 }
 0x24a   : > { %1927 = vst.msk [vmem:[#allocation3 + $0x20] sm:$0xff] %vm1922_vm10, %v1835_v49  ;;  %4712 = vmatprep.mubr.msk.f32.mxu0 %vm1999_vm11, %v1955_v45  ;;  %v1841_v33 = vpop.permute.xlu0 %1840  ;;  %v1958_v25 = vld [vmem:[#allocation3 + $0x18] sm:$0xff] }
 0x24b   : > { %4713 = vmatmul.mubr.msk.f32.vlgmr.msra.gmra.mxu0 %vm1999_vm11, %v1956_v23  ;;  %1930 = vst.msk [vmem:[#allocation3 + $0x38] sm:$0xff] %vm1922_vm10, %v1841_v33  ;;  %v1792_v33 = vld [vmem:[#allocation2 + $0x19a] sm:$0xff] }
 0x24c   : > { %2359 = vst.msk [vmem:[#allocation4 + $0x8] sm:$0xff] %vm2357_vm12, %v7354_v34  ;;  %2362 = vst.msk [vmem:[#allocation4 + $0x18] sm:$0xff] %vm2357_vm12, %v7354_v34  ;;  %1886 = vrot.lane.b32.xlu0 %v1792_v33, %s4881_s17 }
 0x24d   : > { %v1839_v47 = vpop.permute.xlu1 %1838  ;;  %v1957_v36 = vld [vmem:[#allocation3 + $0x10] sm:$0xff]  ;;  %2365 = vst.msk [vmem:[#allocation4 + $0x30] sm:$0xff] %vm2357_vm12, %v7354_v34  ;;  %2366 = vst.msk [vmem:[#allocation4 + $0x38] sm:$0xff] %vm2357_vm12, %v7354_v34 }
 0x24e   : > { %1929 = vst.msk [vmem:[#allocation3 + $0x30] sm:$0xff] %vm1922_vm10, %v1839_v47  ;;  %4715 = vmatprep.mubr.msk.f32.mxu0 %vm1999_vm11, %v1957_v36  ;;  %v1845_v30 = vpop.permute.xlu0 %1844  ;;  %v1960_v37 = vld [vmem:[#allocation3 + $0x28] sm:$0xff] }
 0x24f   : > { %4716 = vmatmul.mubr.msk.f32.gmra.mxu0 %vm1999_vm11, %v1958_v25  ;;  %1932 = vst.msk [vmem:[#allocation3 + $0x48] sm:$0xff] %vm1922_vm10, %v1845_v30  ;;  %v1793_v25 = vld [vmem:[#allocation2 + $0x1a2] sm:$0xff] }
 0x250   : > { %2367 = vst.msk [vmem:[#allocation4 + $0x40] sm:$0x3] %vm2360_vm13, %v7354_v34  ;;  %2370 = vst.msk [vmem:[#allocation4 + $0x58] sm:$0x3] %vm2360_vm13, %v7354_v34  ;;  %1888 = vrot.lane.b32.xlu1 %v1793_v25, %s4881_s17 }
 0x251   : > { %v1843_v32 = vpop.permute.xlu1 %1842  ;;  %v1959_v0 = vld [vmem:[#allocation3 + $0x20] sm:$0xff]  ;;  %2368 = vst.msk [vmem:[#allocation4 + $0x48] sm:$0xff] %vm2357_vm12, %v7354_v34  ;;  %2369 = vst.msk [vmem:[#allocation4 + $0x50] sm:$0xff] %vm2357_vm12, %v7354_v34 }
 0x252   : > { %1931 = vst.msk [vmem:[#allocation3 + $0x40] sm:$0xff] %vm1922_vm10, %v1843_v32  ;;  %4718 = vmatprep.mubr.msk.f32.mxu0 %vm1999_vm11, %v1959_v0  ;;  %v1849_v39 = vpop.permute.xlu0 %1848  ;;  %v1962_v38 = vld [vmem:[#allocation3 + $0x38] sm:$0xff] }
 0x253   : > { %4719 = vmatmul.mubr.msk.f32.gmra.mxu0 %vm1999_vm11, %v1960_v37  ;;  %1934 = vst.msk [vmem:[#allocation3 + $0x58] sm:$0xff] %vm1922_vm10, %v1849_v39  ;;  %v2510_v30 = vld [vmem:[#allocation4 + $0x1] sm:$0xff]  ;;  %v2511_v37 = vld [vmem:[#allocation4 + $0x9] sm:$0xff] }
 0x254   : > { %2371 = vst.msk [vmem:[#allocation4 + $0x60] sm:$0xff] %vm2357_vm12, %v7354_v34  ;;  %2372 = vst.msk [vmem:[#allocation4 + $0x68] sm:$0xff] %vm2357_vm12, %v7354_v34  ;;  %2574 = vrot.lane.b32.xlu0 %v2510_v30, %s4875_s26  ;;  %2576 = vrot.lane.b32.xlu1 %v2511_v37, %s4875_s26 }
 0x255   : > { %v1847_v50 = vpop.permute.xlu1 %1846  ;;  %v1961_v40 = vld [vmem:[#allocation3 + $0x30] sm:$0xff]  ;;  %2373 = vst.msk [vmem:[#allocation4 + $0x70] sm:$0x3] %vm2360_vm13, %v7354_v34  ;;  %2376 = vst.msk [vmem:[#allocation4 + $0x88] sm:$0x3] %vm2360_vm13, %v7354_v34 }
 0x256   : > { %1933 = vst.msk [vmem:[#allocation3 + $0x50] sm:$0xff] %vm1922_vm10, %v1847_v50  ;;  %4721 = vmatprep.mubr.msk.f32.mxu0 %vm1999_vm11, %v1961_v40  ;;  %v1853_v54 = vpop.permute.xlu0 %1852  ;;  %v1964_v52 = vld [vmem:[#allocation3 + $0x48] sm:$0xff] }
 0x257   : > { %4722 = vmatmul.mubr.msk.f32.gmra.mxu0 %vm1999_vm11, %v1962_v38  ;;  %1936 = vst.msk [vmem:[#allocation3 + $0x68] sm:$0xff] %vm1922_vm10, %v1853_v54  ;;  %v2446_v54 = vld [vmem:[#allocation4] sm:$0xff] }
 0x258   : > { %2374 = vst.msk [vmem:[#allocation4 + $0x78] sm:$0xff] %vm2357_vm12, %v7354_v34  ;;  %2375 = vst.msk [vmem:[#allocation4 + $0x80] sm:$0xff] %vm2357_vm12, %v7354_v34 }
 0x259   : > { %v1851_v57 = vpop.permute.xlu1 %1850  ;;  %v1963_v55 = vld [vmem:[#allocation3 + $0x40] sm:$0xff]  ;;  %2377 = vst.msk [vmem:[#allocation4 + $0x90] sm:$0xff] %vm2357_vm12, %v7354_v34  ;;  %2378 = vst.msk [vmem:[#allocation4 + $0x98] sm:$0xff] %vm2357_vm12, %v7354_v34 }
 0x25a   : > { %1935 = vst.msk [vmem:[#allocation3 + $0x60] sm:$0xff] %vm1922_vm10, %v1851_v57  ;;  %4724 = vmatprep.mubr.msk.f32.mxu0 %vm1999_vm11, %v1963_v55  ;;  %v1857_v59 = vpop.permute.xlu0 %1856  ;;  %v1966_v58 = vld [vmem:[#allocation3 + $0x58] sm:$0xff]  ;;  %v6232_v55 = vld [vmem:[%s7257_s2] ss:$0 sm:$0xff] }
 0x25b   : > { %4725 = vmatmul.mubr.msk.f32.gmra.mxu0 %vm1999_vm11, %v1964_v52  ;;  %1938 = vst.msk [vmem:[#allocation3 + $0x78] sm:$0xff] %vm1922_vm10, %v1857_v59  ;;  %v2447_v52 = vld [vmem:[#allocation4 + $0x8] sm:$0xff] }
 0x25c   : > { %2379 = vst.msk [vmem:[#allocation4 + $0xa0] sm:$0x3] %vm2360_vm13, %v7354_v34  ;;  %2382 = vst.msk [vmem:[#allocation4 + $0xb8] sm:$0x3] %vm2360_vm13, %v7354_v34 }
 0x25d   : > { %v1855_v61 = vpop.permute.xlu1 %1854  ;;  %v1965_v60 = vld [vmem:[#allocation3 + $0x50] sm:$0xff]  ;;  %2380 = vst.msk [vmem:[#allocation4 + $0xa8] sm:$0xff] %vm2357_vm12, %v7354_v34  ;;  %2381 = vst.msk [vmem:[#allocation4 + $0xb0] sm:$0xff] %vm2357_vm12, %v7354_v34 }
 0x25e   : > { %1937 = vst.msk [vmem:[#allocation3 + $0x70] sm:$0xff] %vm1922_vm10, %v1855_v61  ;;  %4727 = vmatprep.mubr.msk.f32.mxu0 %vm1999_vm11, %v1965_v60  ;;  %v1859_v1 = vpop.permute.xlu0 %1858  ;;  %v1968_v62 = vld [vmem:[#allocation3 + $0x68] sm:$0xff] }
 0x25f   : > { %4728 = vmatmul.mubr.msk.f32.gmra.mxu0 %vm1999_vm11, %v1966_v58  ;;  %1939 = vst.msk [vmem:[#allocation3 + $0x80] sm:$0xff] %vm1922_vm10, %v1859_v1 }
 0x260   : > { %2383 = vst.msk [vmem:[#allocation4 + $0xc0] sm:$0xff] %vm2357_vm12, %v7354_v34  ;;  %2384 = vst.msk [vmem:[#allocation4 + $0xc8] sm:$0xff] %vm2357_vm12, %v7354_v34 }
 0x261   : > { %v1668_v3 = vpop.permute.xlu1 %1667  ;;  %v1967_v2 = vld [vmem:[#allocation3 + $0x60] sm:$0xff]  ;;  %2385 = vst.msk [vmem:[#allocation4 + $0xd0] sm:$0x3] %vm2360_vm13, %v7354_v34  ;;  %2388 = vst.msk [vmem:[#allocation4 + $0xe8] sm:$0x3] %vm2360_vm13, %v7354_v34 }
 0x262   : > { %1747 = vst.msk [vmem:[#allocation3 + $0x88] sm:$0xff] %vm1729_vm9, %v1668_v3  ;;  %4730 = vmatprep.mubr.msk.f32.mxu0 %vm1999_vm11, %v1967_v2  ;;  %v1670_v5 = vpop.permute.xlu0 %1669  ;;  %v1970_v4 = vld [vmem:[#allocation3 + $0x78] sm:$0xff] }
 0x263   : > { %4731 = vmatmul.mubr.msk.f32.gmra.mxu0 %vm1999_vm11, %v1968_v62  ;;  %1748 = vst.msk [vmem:[#allocation3 + $0x90] sm:$0xff] %vm1729_vm9, %v1670_v5 }
 0x264   : > { %2386 = vst.msk [vmem:[#allocation4 + $0xd8] sm:$0xff] %vm2357_vm12, %v7354_v34  ;;  %2387 = vst.msk [vmem:[#allocation4 + $0xe0] sm:$0xff] %vm2357_vm12, %v7354_v34 }
 0x265   : > { %v1861_v7 = vpop.permute.xlu1 %1860  ;;  %v1969_v6 = vld [vmem:[#allocation3 + $0x70] sm:$0xff]  ;;  %2389 = vst.msk [vmem:[#allocation4 + $0xf0] sm:$0xff] %vm2357_vm12, %v7354_v34  ;;  %2390 = vst.msk [vmem:[#allocation4 + $0xf8] sm:$0xff] %vm2357_vm12, %v7354_v34 }
 0x266   : > { %1940 = vst.msk [vmem:[#allocation3 + $0x88] sm:$0xff] %vm1922_vm10, %v1861_v7  ;;  %4733 = vmatprep.mubr.msk.f32.mxu0 %vm1999_vm11, %v1969_v6  ;;  %v1863_v9 = vpop.permute.xlu0 %1862  ;;  %v1971_v8 = vld [vmem:[#allocation3 + $0x80] sm:$0xff] }
 0x267   : > { %4734 = vmatmul.mubr.msk.f32.gmra.mxu0 %vm1999_vm11, %v1970_v4  ;;  %1941 = vst.msk [vmem:[#allocation3 + $0x90] sm:$0xff] %vm1922_vm10, %v1863_v9 }
 0x268   : > { %4736 = vmatprep.mubr.msk.f32.mxu0 %vm1999_vm11, %v1971_v8  ;;  %2391 = vst.msk [vmem:[#allocation4 + $0x100] sm:$0x3] %vm2360_vm13, %v7354_v34  ;;  %2394 = vst.msk [vmem:[#allocation4 + $0x118] sm:$0x3] %vm2360_vm13, %v7354_v34 }
 0x269   : > { %v1672_v12 = vpop.permute.xlu1 %1671  ;;  %2392 = vst.msk [vmem:[#allocation4 + $0x108] sm:$0xff] %vm2357_vm12, %v7354_v34  ;;  %2393 = vst.msk [vmem:[#allocation4 + $0x110] sm:$0xff] %vm2357_vm12, %v7354_v34 }
 0x26a   : > { %1749 = vst.msk [vmem:[#allocation3 + $0x98] sm:$0xff] %vm1729_vm9, %v1672_v12  ;;  %v1674_v10 = vpop.permute.xlu0 %1673 }
 0x26b   : > { %1750 = vst.msk [vmem:[#allocation3 + $0xa0] sm:$0xff] %vm1729_vm9, %v1674_v10 }
 0x26c   : > { %2395 = vst.msk [vmem:[#allocation4 + $0x120] sm:$0xff] %vm2357_vm12, %v7354_v34  ;;  %2396 = vst.msk [vmem:[#allocation4 + $0x128] sm:$0xff] %vm2357_vm12, %v7354_v34 }
 0x26d   : > { %v1865_v16 = vpop.permute.xlu1 %1864  ;;  %v1972_v13 = vld [vmem:[#allocation3 + $0x88] sm:$0xff]  ;;  %2397 = vst.msk [vmem:[#allocation4 + $0x130] sm:$0x3] %vm2360_vm13, %v7354_v34  ;;  %2400 = vst.msk [vmem:[#allocation4 + $0x148] sm:$0x3] %vm2360_vm13, %v7354_v34 }
 0x26e   : > { %1942 = vst.msk [vmem:[#allocation3 + $0x98] sm:$0xff] %vm1922_vm10, %v1865_v16  ;;  %4737 = vmatmul.mubr.msk.f32.gmra.mxu0 %vm1999_vm11, %v1972_v13  ;;  %v1867_v20 = vpop.permute.xlu0 %1866  ;;  %v1973_v17 = vld [vmem:[#allocation3 + $0x90] sm:$0xff] }
 0x26f   : > { %1943 = vst.msk [vmem:[#allocation3 + $0xa0] sm:$0xff] %vm1922_vm10, %v1867_v20  ;;  %4739 = vmatprep.mubr.msk.f32.mxu0 %vm1999_vm11, %v1973_v17 }
 0x270   : > { %2398 = vst.msk [vmem:[#allocation4 + $0x138] sm:$0xff] %vm2357_vm12, %v7354_v34  ;;  %2399 = vst.msk [vmem:[#allocation4 + $0x140] sm:$0xff] %vm2357_vm12, %v7354_v34 }
 0x271   : > { %v1676_v41 = vpop.permute.xlu1 %1675  ;;  %2401 = vst.msk [vmem:[#allocation4 + $0x150] sm:$0xff] %vm2357_vm12, %v7354_v34  ;;  %2402 = vst.msk [vmem:[#allocation4 + $0x158] sm:$0xff] %vm2357_vm12, %v7354_v34 }
 0x272   : > { %1751 = vst.msk [vmem:[#allocation3 + $0xa8] sm:$0xff] %vm1729_vm9, %v1676_v41  ;;  %v1678_v24 = vpop.permute.xlu0 %1677 }
 0x273   : > { %1752 = vst.msk [vmem:[#allocation3 + $0xb0] sm:$0xff] %vm1729_vm9, %v1678_v24 }
 0x274   : > { %2403 = vst.msk [vmem:[#allocation4 + $0x160] sm:$0x3] %vm2360_vm13, %v7354_v34  ;;  %2406 = vst.msk [vmem:[#allocation4 + $0x178] sm:$0x3] %vm2360_vm13, %v7354_v34 }
 0x275   : > { %v1869_v21 = vpop.permute.xlu1 %1868  ;;  %v1974_v42 = vld [vmem:[#allocation3 + $0x98] sm:$0xff]  ;;  %2404 = vst.msk [vmem:[#allocation4 + $0x168] sm:$0xff] %vm2357_vm12, %v7354_v34  ;;  %2405 = vst.msk [vmem:[#allocation4 + $0x170] sm:$0xff] %vm2357_vm12, %v7354_v34 }
 0x276   : > { %1944 = vst.msk [vmem:[#allocation3 + $0xa8] sm:$0xff] %vm1922_vm10, %v1869_v21  ;;  %4740 = vmatmul.mubr.msk.f32.gmra.mxu0 %vm1999_vm11, %v1974_v42  ;;  %v1871_v48 = vpop.permute.xlu0 %1870  ;;  %v1975_v29 = vld [vmem:[#allocation3 + $0xa0] sm:$0xff] }
 0x277   : > { %1945 = vst.msk [vmem:[#allocation3 + $0xb0] sm:$0xff] %vm1922_vm10, %v1871_v48  ;;  %4742 = vmatprep.mubr.msk.f32.mxu0 %vm1999_vm11, %v1975_v29 }
 0x278   : > { %2407 = vst.msk [vmem:[#allocation4 + $0x180] sm:$0xff] %vm2357_vm12, %v7354_v34  ;;  %2408 = vst.msk [vmem:[#allocation4 + $0x188] sm:$0xff] %vm2357_vm12, %v7354_v34 }
 0x279   : > { %v1680_v43 = vpop.permute.xlu1 %1679  ;;  %2409 = vst.msk [vmem:[#allocation4 + $0x190] sm:$0x3] %vm2360_vm13, %v7354_v34  ;;  %2412 = vst.msk [vmem:[#allocation4 + $0x1a8] sm:$0x3] %vm2360_vm13, %v7354_v34 }
 0x27a   : > { %1753 = vst.msk [vmem:[#allocation3 + $0xb8] sm:$0xff] %vm1729_vm9, %v1680_v43  ;;  %v1682_v28 = vpop.permute.xlu0 %1681 }
 0x27b   : > { %1754 = vst.msk [vmem:[#allocation3 + $0xc0] sm:$0xff] %vm1729_vm9, %v1682_v28 }
 0x27c   : > { %2410 = vst.msk [vmem:[#allocation4 + $0x198] sm:$0xff] %vm2357_vm12, %v7354_v34  ;;  %2411 = vst.msk [vmem:[#allocation4 + $0x1a0] sm:$0xff] %vm2357_vm12, %v7354_v34 }
 0x27d   : > { %v1873_v26 = vpop.permute.xlu1 %1872  ;;  %v1976_v44 = vld [vmem:[#allocation3 + $0xa8] sm:$0xff]  ;;  %2478 = vst.msk [vmem:[#allocation5] sm:$0xff] %vm2357_vm12, %v2446_v54  ;;  %2479 = vst.msk [vmem:[#allocation5 + $0x8] sm:$0xff] %vm2357_vm12, %v2447_v52 }
 0x27e   : > { %1946 = vst.msk [vmem:[#allocation3 + $0xb8] sm:$0xff] %vm1922_vm10, %v1873_v26  ;;  %4743 = vmatmul.mubr.msk.f32.gmra.mxu0 %vm1999_vm11, %v1976_v44  ;;  %v1875_v27 = vpop.permute.xlu0 %1874  ;;  %v1977_v46 = vld [vmem:[#allocation3 + $0xb0] sm:$0xff] }
 0x27f   : > { %1947 = vst.msk [vmem:[#allocation3 + $0xc0] sm:$0xff] %vm1922_vm10, %v1875_v27  ;;  %4745 = vmatprep.mubr.msk.f32.mxu0 %vm1999_vm11, %v1977_v46 }
 0x281   : > { %v1684_v51 = vpop.permute.xlu1 %1683 }
 0x282   : > { %1755 = vst.msk [vmem:[#allocation3 + $0xc8] sm:$0xff] %vm1729_vm9, %v1684_v51  ;;  %v1686_v31 = vpop.permute.xlu0 %1685 }
 0x283   : > { %1756 = vst.msk [vmem:[#allocation3 + $0xd0] sm:$0xff] %vm1729_vm9, %v1686_v31 }
 0x285   : > { %v1877_v35 = vpop.permute.xlu1 %1876  ;;  %v1978_v53 = vld [vmem:[#allocation3 + $0xb8] sm:$0xff] }
 0x286   : > { %1948 = vst.msk [vmem:[#allocation3 + $0xc8] sm:$0xff] %vm1922_vm10, %v1877_v35  ;;  %4746 = vmatmul.mubr.msk.f32.gmra.mxu0 %vm1999_vm11, %v1978_v53  ;;  %v1879_v56 = vpop.permute.xlu0 %1878  ;;  %v1979_v63 = vld [vmem:[#allocation3 + $0xc0] sm:$0xff] }
 0x287   : > { %1949 = vst.msk [vmem:[#allocation3 + $0xd0] sm:$0xff] %vm1922_vm10, %v1879_v56  ;;  %4748 = vmatprep.mubr.msk.f32.mxu0 %vm1999_vm11, %v1979_v63 }
 0x289   : > { %v1688_v11 = vpop.permute.xlu1 %1687 }
 0x28a   : > { %1757 = vst.msk [vmem:[#allocation3 + $0xd8] sm:$0xff] %vm1729_vm9, %v1688_v11  ;;  %v1690_v14 = vpop.permute.xlu0 %1689 }
 0x28b   : > { %1758 = vst.msk [vmem:[#allocation3 + $0xe0] sm:$0xff] %vm1729_vm9, %v1690_v14 }
 0x28d   : > { %v1881_v15 = vpop.permute.xlu1 %1880  ;;  %v1980_v18 = vld [vmem:[#allocation3 + $0xc8] sm:$0xff] }
 0x28e   : > { %1950 = vst.msk [vmem:[#allocation3 + $0xd8] sm:$0xff] %vm1922_vm10, %v1881_v15  ;;  %4749 = vmatmul.mubr.msk.f32.gmra.mxu0 %vm1999_vm11, %v1980_v18  ;;  %v1883_v23 = vpop.permute.xlu0 %1882  ;;  %v1981_v49 = vld [vmem:[#allocation3 + $0xd0] sm:$0xff] }
 0x28f   : > { %1951 = vst.msk [vmem:[#allocation3 + $0xe0] sm:$0xff] %vm1922_vm10, %v1883_v23  ;;  %4751 = vmatprep.mubr.msk.f32.mxu0 %vm1999_vm11, %v1981_v49 }
 0x291   : > { %v1692_v45 = vpop.permute.xlu1 %1691 }
 0x292   : > { %1759 = vst.msk [vmem:[#allocation3 + $0xe8] sm:$0xff] %vm1729_vm9, %v1692_v45 }
 0x295   : > { %v1885_v47 = vpop.permute.xlu1 %1884  ;;  %v1982_v36 = vld [vmem:[#allocation3 + $0xd8] sm:$0xff] }
 0x296   : > { %1952 = vst.msk [vmem:[#allocation3 + $0xe8] sm:$0xff] %vm1922_vm10, %v1885_v47  ;;  %4752 = vmatmul.mubr.msk.f32.gmra.mxu0 %vm1999_vm11, %v1982_v36  ;;  %v1983_v32 = vld [vmem:[#allocation3 + $0xe0] sm:$0xff] }
 0x297   : > { %4754 = vmatprep.mubr.msk.f32.mxu0 %vm1999_vm11, %v1983_v32 }
 0x29d   : > { %v1984_v0 = vld [vmem:[#allocation3 + $0xe8] sm:$0xff] }
 0x29e   : > { %4755 = vmatmul.mubr.msk.f32.gmra.mxu0 %vm1999_vm11, %v1984_v0 }
 0x2b6   : > { %v1694_v39 = vpop.permute.xlu0 %1693 }
 0x2b7   : > { %1760 = vst.msk [vmem:[#allocation3 + $0xf0] sm:$0xff] %vm1729_vm9, %v1694_v39 }
 0x2b9   : > { %v1696_v38 = vpop.permute.xlu1 %1695 }
 0x2ba   : > { %1761 = vst.msk [vmem:[#allocation3 + $0xf8] sm:$0xff] %vm1729_vm9, %v1696_v38 }
 0x2be   : > { %v1887_v50 = vpop.permute.xlu0 %1886 }
 0x2bf   : > { %1953 = vst.msk [vmem:[#allocation3 + $0xf0] sm:$0xff] %vm1922_vm10, %v1887_v50 }
 0x2c2   : > { %v1889_v40 = vpop.permute.xlu1 %1888 }
 0x2c3   : > { %1954 = vst.msk [vmem:[#allocation3 + $0xf8] sm:$0xff] %vm1922_vm10, %v1889_v40 }
 0x2c6   : > { %v2575_v57 = vpop.permute.xlu0 %2574  ;;  %v2577_v59 = vpop.permute.xlu1 %2576  ;;  %v1985_v50 = vld [vmem:[#allocation3 + $0xf0] sm:$0xff] }
 0x2c7   : > { %2671 = vst.msk [vmem:[#allocation5] sm:$0xff] %vm2670_vm14, %v2575_v57  ;;  %2672 = vst.msk [vmem:[#allocation5 + $0x8] sm:$0xff] %vm2670_vm14, %v2577_v59  ;;  %4757 = vmatprep.mubr.msk.f32.mxu0 %vm1999_vm11, %v1985_v50 }
 0x2ca   : > { %v1986_v40 = vld [vmem:[#allocation3 + $0xf8] sm:$0xff] }
 0x2cb   : > { %4758 = vmatmul.mubr.msk.f32.gmra.mxu0 %vm1999_vm11, %v1986_v40 }
 0x30b   : > { %v4714_v58 = vpop.f32.mrf.mxu0 }
 0x30c   : > { %v2172_v61 = vadd.f32 %v4714_v58, %v6232_v55 }
 0x30d   : > { %v2166_v60 = vpop.f32.mrf.mxu0 }
 0x30e   : > { %v2326_v1 = vmax.f32 %v2172_v61, 0.0  ;;  %v2167_v62 = vadd.f32 %v6232_v55, %v2166_v60 }
 0x30f   : > { %v4717_v3 = vpop.f32.mrf.mxu0 }
 0x310   : > { %2415 = vst.msk [vmem:[#allocation4 + $0x21] sm:$0xff] %vm2357_vm12, %v2326_v1  ;;  %v2325_v2 = vmax.f32 %v2167_v62, 0.0  ;;  %v2182_v5 = vadd.f32 %v4717_v3, %v6232_v55 }
 0x311   : > { %v2176_v4 = vpop.f32.mrf.mxu0 }
 0x312   : > { %2414 = vst.msk [vmem:[#allocation4 + $0x19] sm:$0xff] %vm2357_vm12, %v2325_v2  ;;  %v2328_v7 = vmax.f32 %v2182_v5, 0.0  ;;  %v2177_v6 = vadd.f32 %v6232_v55, %v2176_v4 }
 0x313   : > { %v4720_v9 = vpop.f32.mrf.mxu0 }
 0x314   : > { %2417 = vst.msk [vmem:[#allocation4 + $0x39] sm:$0xff] %vm2357_vm12, %v2328_v7  ;;  %v2327_v8 = vmax.f32 %v2177_v6, 0.0  ;;  %v2192_v12 = vadd.f32 %v4720_v9, %v6232_v55 }
 0x315   : > { %v2186_v10 = vpop.f32.mrf.mxu0 }
 0x316   : > { %2416 = vst.msk [vmem:[#allocation4 + $0x31] sm:$0xff] %vm2357_vm12, %v2327_v8  ;;  %v2330_v16 = vmax.f32 %v2192_v12, 0.0  ;;  %v2187_v13 = vadd.f32 %v6232_v55, %v2186_v10 }
 0x317   : > { %v4723_v20 = vpop.f32.mrf.mxu0  ;;  %v2513_v17 = vld [vmem:[#allocation4 + $0x21] sm:$0xff] }
 0x318   : > { %2419 = vst.msk [vmem:[#allocation4 + $0x51] sm:$0xff] %vm2357_vm12, %v2330_v16  ;;  %v2329_v41 = vmax.f32 %v2187_v13, 0.0  ;;  %v2202_v24 = vadd.f32 %v4723_v20, %v6232_v55  ;;  %2580 = vrot.lane.b32.xlu1 %v2513_v17, %s4875_s26 }
 0x319   : > { %v2196_v21 = vpop.f32.mrf.mxu0  ;;  %v2512_v42 = vld [vmem:[#allocation4 + $0x19] sm:$0xff] }
 0x31a   : > { %v6249_v48 = vld [vmem:[#allocation4 + $0x18] sm:$0xff]  ;;  %2418 = vst.msk [vmem:[#allocation4 + $0x49] sm:$0xff] %vm2357_vm12, %v2329_v41  ;;  %v2332_v29 = vmax.f32 %v2202_v24, 0.0  ;;  %v2197_v43 = vadd.f32 %v6232_v55, %v2196_v21  ;;  %2578 = vrot.lane.b32.xlu0 %v2512_v42, %s4875_s26  ;;  %v6256_v28 = vld [vmem:[#allocation4 + $0x20] sm:$0xff] }
 0x31b   : > { %2480 = vst.msk [vmem:[#allocation5 + $0x10] sm:$0xff] %vm2357_vm12, %v6249_v48  ;;  %v4726_v26 = vpop.f32.mrf.mxu0  ;;  %v6258_v44 = vld [vmem:[#allocation4 + $0x39] sm:$0xff]  ;;  %2481 = vst.msk [vmem:[#allocation5 + $0x18] sm:$0xff] %vm2357_vm12, %v6256_v28 }
 0x31c   : > { %2421 = vst.msk [vmem:[#allocation4 + $0x69] sm:$0xff] %vm2357_vm12, %v2332_v29  ;;  %v2331_v27 = vmax.f32 %v2197_v43, 0.0  ;;  %v2212_v46 = vadd.f32 %v4726_v26, %v6232_v55  ;;  %2584 = vrot.lane.b32.xlu1 %v6258_v44, %s4875_s26 }
 0x31d   : > { %v2206_v51 = vpop.f32.mrf.mxu0  ;;  %v6266_v31 = vld [vmem:[#allocation4 + $0x31] sm:$0xff] }
 0x31e   : > { %v6268_v35 = vld [vmem:[#allocation4 + $0x38] sm:$0xff]  ;;  %2420 = vst.msk [vmem:[#allocation4 + $0x61] sm:$0xff] %vm2357_vm12, %v2331_v27  ;;  %v2334_v53 = vmax.f32 %v2212_v46, 0.0  ;;  %v2207_v56 = vadd.f32 %v6232_v55, %v2206_v51  ;;  %2582 = vrot.lane.b32.xlu0 %v6266_v31, %s4875_s26  ;;  %v6276_v63 = vld [vmem:[#allocation4 + $0x30] sm:$0xff] }
 0x31f   : > { %2483 = vst.msk [vmem:[#allocation5 + $0x28] sm:$0xff] %vm2357_vm12, %v6268_v35  ;;  %v4729_v11 = vpop.f32.mrf.mxu0  ;;  %v6278_v14 = vld [vmem:[#allocation4 + $0x51] sm:$0xff]  ;;  %2482 = vst.msk [vmem:[#allocation5 + $0x20] sm:$0xff] %vm2357_vm12, %v6276_v63 }
 0x320   : > { %2423 = vst.msk [vmem:[#allocation4 + $0x81] sm:$0xff] %vm2357_vm12, %v2334_v53  ;;  %v2333_v15 = vmax.f32 %v2207_v56, 0.0  ;;  %v2222_v18 = vadd.f32 %v4729_v11, %v6232_v55  ;;  %2588 = vrot.lane.b32.xlu1 %v6278_v14, %s4875_s26 }
 0x321   : > { %v2216_v19 = vpop.f32.mrf.mxu0  ;;  %v6286_v22 = vld [vmem:[#allocation4 + $0x49] sm:$0xff] }
 0x322   : > { %v6288_v34 = vld [vmem:[#allocation4 + $0x50] sm:$0xff]  ;;  %2422 = vst.msk [vmem:[#allocation4 + $0x79] sm:$0xff] %vm2357_vm12, %v2333_v15  ;;  %v2336_v23 = vmax.f32 %v2222_v18, 0.0  ;;  %v2217_v49 = vadd.f32 %v6232_v55, %v2216_v19  ;;  %2586 = vrot.lane.b32.xlu0 %v6286_v22, %s4875_s26  ;;  %v6296_v45 = vld [vmem:[#allocation4 + $0x48] sm:$0xff] }
 0x323   : > { %2485 = vst.msk [vmem:[#allocation5 + $0x38] sm:$0xff] %vm2357_vm12, %v6288_v34  ;;  %v4732_v33 = vpop.f32.mrf.mxu0  ;;  %v6298_v25 = vld [vmem:[#allocation4 + $0x69] sm:$0xff]  ;;  %2484 = vst.msk [vmem:[#allocation5 + $0x30] sm:$0xff] %vm2357_vm12, %v6296_v45 }
 0x324   : > { %2425 = vst.msk [vmem:[#allocation4 + $0x99] sm:$0xff] %vm2357_vm12, %v2336_v23  ;;  %v2335_v47 = vmax.f32 %v2217_v49, 0.0  ;;  %v2232_v36 = vadd.f32 %v4732_v33, %v6232_v55  ;;  %2592 = vrot.lane.b32.xlu1 %v6298_v25, %s4875_s26 }
 0x325   : > { %v2226_v30 = vpop.f32.mrf.mxu0  ;;  %v6306_v37 = vld [vmem:[#allocation4 + $0x61] sm:$0xff] }
 0x326   : > { %v6308_v32 = vld [vmem:[#allocation4 + $0x68] sm:$0xff]  ;;  %2424 = vst.msk [vmem:[#allocation4 + $0x91] sm:$0xff] %vm2357_vm12, %v2335_v47  ;;  %v2338_v0 = vmax.f32 %v2232_v36, 0.0  ;;  %v2227_v39 = vadd.f32 %v6232_v55, %v2226_v30  ;;  %2590 = vrot.lane.b32.xlu0 %v6306_v37, %s4875_s26  ;;  %v6316_v38 = vld [vmem:[#allocation4 + $0x60] sm:$0xff] }
 0x327   : > { %2487 = vst.msk [vmem:[#allocation5 + $0x48] sm:$0xff] %vm2357_vm12, %v6308_v32  ;;  %v4735_v54 = vpop.f32.mrf.mxu0  ;;  %v6318_v52 = vld [vmem:[#allocation4 + $0x81] sm:$0xff]  ;;  %2486 = vst.msk [vmem:[#allocation5 + $0x40] sm:$0xff] %vm2357_vm12, %v6316_v38 }
 0x328   : > { %2427 = vst.msk [vmem:[#allocation4 + $0xb1] sm:$0xff] %vm2357_vm12, %v2338_v0  ;;  %v2337_v57 = vmax.f32 %v2227_v39, 0.0  ;;  %v2242_v59 = vadd.f32 %v4735_v54, %v6232_v55  ;;  %2596 = vrot.lane.b32.xlu1 %v6318_v52, %s4875_s26 }
 0x329   : > { %v2236_v58 = vpop.f32.mrf.mxu0  ;;  %v6328_v61 = vld [vmem:[#allocation4 + $0x79] sm:$0xff] }
 0x32a   : > { %v6330_v60 = vld [vmem:[#allocation4 + $0x80] sm:$0xff]  ;;  %2426 = vst.msk [vmem:[#allocation4 + $0xa9] sm:$0xff] %vm2357_vm12, %v2337_v57  ;;  %v2340_v1 = vmax.f32 %v2242_v59, 0.0  ;;  %v2237_v62 = vadd.f32 %v6232_v55, %v2236_v58  ;;  %2594 = vrot.lane.b32.xlu0 %v6328_v61, %s4875_s26  ;;  %v6338_v3 = vld [vmem:[#allocation4 + $0x78] sm:$0xff] }
 0x32b   : > { %2489 = vst.msk [vmem:[#allocation5 + $0x58] sm:$0xff] %vm2357_vm12, %v6330_v60  ;;  %v2523_v2 = vld [vmem:[#allocation4 + $0x99] sm:$0xff]  ;;  %2488 = vst.msk [vmem:[#allocation5 + $0x50] sm:$0xff] %vm2357_vm12, %v6338_v3 }
 0x32c   : > { %2429 = vst.msk [vmem:[#allocation4 + $0xc9] sm:$0xff] %vm2357_vm12, %v2340_v1  ;;  %v2339_v5 = vmax.f32 %v2237_v62, 0.0  ;;  %2600 = vrot.lane.b32.xlu1 %v2523_v2, %s4875_s26 }
 0x32d   : > { %v6344_v4 = vld [vmem:[#allocation4 + $0x91] sm:$0xff] }
 0x32e   : > { %v6346_v7 = vld [vmem:[#allocation4 + $0x98] sm:$0xff]  ;;  %2428 = vst.msk [vmem:[#allocation4 + $0xc1] sm:$0xff] %vm2357_vm12, %v2339_v5  ;;  %v4738_v6 = vpop.f32.mrf.mxu0  ;;  %2598 = vrot.lane.b32.xlu0 %v6344_v4, %s4875_s26  ;;  %v6353_v9 = vld [vmem:[#allocation4 + $0x90] sm:$0xff] }
 0x32f   : > { %2491 = vst.msk [vmem:[#allocation5 + $0x68] sm:$0xff] %vm2357_vm12, %v6346_v7  ;;  %v2252_v8 = vadd.f32 %v4738_v6, %v6232_v55  ;;  %v2525_v12 = vld [vmem:[#allocation4 + $0xb1] sm:$0xff]  ;;  %2490 = vst.msk [vmem:[#allocation5 + $0x60] sm:$0xff] %vm2357_vm12, %v6353_v9 }
 0x330   : > { %v2246_v10 = vpop.f32.mrf.mxu0  ;;  %2604 = vrot.lane.b32.xlu1 %v2525_v12, %s4875_s26 }
 0x331   : > { %v2342_v16 = vmax.f32 %v2252_v8, 0.0  ;;  %v2247_v13 = vadd.f32 %v6232_v55, %v2246_v10  ;;  %v2524_v20 = vld [vmem:[#allocation4 + $0xa9] sm:$0xff] }
 0x332   : > { %v6360_v17 = vld [vmem:[#allocation4 + $0xb0] sm:$0xff]  ;;  %2602 = vrot.lane.b32.xlu0 %v2524_v20, %s4875_s26  ;;  %v6365_v41 = vld [vmem:[#allocation4 + $0xa8] sm:$0xff] }
 0x333   : > { %2493 = vst.msk [vmem:[#allocation5 + $0x78] sm:$0xff] %vm2357_vm12, %v6360_v17  ;;  %2431 = vst.msk [vmem:[#allocation4 + $0xe1] sm:$0xff] %vm2357_vm12, %v2342_v16  ;;  %v2341_v24 = vmax.f32 %v2247_v13, 0.0  ;;  %v2527_v21 = vld [vmem:[#allocation4 + $0xc9] sm:$0xff] }
 0x334   : > { %2492 = vst.msk [vmem:[#allocation5 + $0x70] sm:$0xff] %vm2357_vm12, %v6365_v41  ;;  %2608 = vrot.lane.b32.xlu1 %v2527_v21, %s4875_s26 }
 0x335   : > { %2430 = vst.msk [vmem:[#allocation4 + $0xd9] sm:$0xff] %vm2357_vm12, %v2341_v24  ;;  %v2526_v42 = vld [vmem:[#allocation4 + $0xc1] sm:$0xff] }
 0x336   : > { %v6372_v29 = vld [vmem:[#allocation4 + $0xc8] sm:$0xff]  ;;  %v4741_v43 = vpop.f32.mrf.mxu0  ;;  %2606 = vrot.lane.b32.xlu0 %v2526_v42, %s4875_s26  ;;  %v6377_v26 = vld [vmem:[#allocation4 + $0xc0] sm:$0xff] }
 0x337   : > { %2495 = vst.msk [vmem:[#allocation5 + $0x88] sm:$0xff] %vm2357_vm12, %v6372_v29  ;;  %v2262_v27 = vadd.f32 %v4741_v43, %v6232_v55  ;;  %2494 = vst.msk [vmem:[#allocation5 + $0x80] sm:$0xff] %vm2357_vm12, %v6377_v26 }
 0x338   : > { %v2256_v46 = vpop.f32.mrf.mxu0 }
 0x339   : > { %v2344_v51 = vmax.f32 %v2262_v27, 0.0  ;;  %v2257_v53 = vadd.f32 %v6232_v55, %v2256_v46 }
 0x33a   : > { %v2529_v56 = vld [vmem:[#allocation4 + $0xe1] sm:$0xff] }
 0x33b   : > { %2433 = vst.msk [vmem:[#allocation4 + $0xf9] sm:$0xff] %vm2357_vm12, %v2344_v51  ;;  %v2343_v11 = vmax.f32 %v2257_v53, 0.0  ;;  %2612 = vrot.lane.b32.xlu1 %v2529_v56, %s4875_s26 }
 0x33c   : > { %v2528_v15 = vld [vmem:[#allocation4 + $0xd9] sm:$0xff] }
 0x33d   : > { %v6385_v18 = vld [vmem:[#allocation4 + $0xe0] sm:$0xff]  ;;  %2432 = vst.msk [vmem:[#allocation4 + $0xf1] sm:$0xff] %vm2357_vm12, %v2343_v11  ;;  %2610 = vrot.lane.b32.xlu0 %v2528_v15, %s4875_s26  ;;  %v6391_v19 = vld [vmem:[#allocation4 + $0xd8] sm:$0xff] }
 0x33e   : > { %2497 = vst.msk [vmem:[#allocation5 + $0x98] sm:$0xff] %vm2357_vm12, %v6385_v18  ;;  %v4744_v23 = vpop.f32.mrf.mxu0  ;;  %2496 = vst.msk [vmem:[#allocation5 + $0x90] sm:$0xff] %vm2357_vm12, %v6391_v19 }
 0x33f   : > { %v2272_v49 = vadd.f32 %v4744_v23, %v6232_v55 }
 0x340   : > { %v2266_v33 = vpop.f32.mrf.mxu0 }
 0x341   : > { %v2346_v47 = vmax.f32 %v2272_v49, 0.0  ;;  %v2267_v36 = vadd.f32 %v6232_v55, %v2266_v33 }
 0x342   : > { %v2531_v30 = vld [vmem:[#allocation4 + $0xf9] sm:$0xff] }
 0x343   : > { %2435 = vst.msk [vmem:[#allocation4 + $0x111] sm:$0xff] %vm2357_vm12, %v2346_v47  ;;  %v2345_v0 = vmax.f32 %v2267_v36, 0.0  ;;  %2616 = vrot.lane.b32.xlu1 %v2531_v30, %s4875_s26 }
 0x344   : > { %v2530_v39 = vld [vmem:[#allocation4 + $0xf1] sm:$0xff] }
 0x345   : > { %v6399_v50 = vld [vmem:[#allocation4 + $0xf8] sm:$0xff]  ;;  %2434 = vst.msk [vmem:[#allocation4 + $0x109] sm:$0xff] %vm2357_vm12, %v2345_v0  ;;  %2614 = vrot.lane.b32.xlu0 %v2530_v39, %s4875_s26  ;;  %v6405_v40 = vld [vmem:[#allocation4 + $0xf0] sm:$0xff] }
 0x346   : > { %2499 = vst.msk [vmem:[#allocation5 + $0xa8] sm:$0xff] %vm2357_vm12, %v6399_v50  ;;  %v4747_v54 = vpop.f32.mrf.mxu0  ;;  %2498 = vst.msk [vmem:[#allocation5 + $0xa0] sm:$0xff] %vm2357_vm12, %v6405_v40 }
 0x347   : > { %v2282_v57 = vadd.f32 %v4747_v54, %v6232_v55 }
 0x348   : > { %v2276_v59 = vpop.f32.mrf.mxu0 }
 0x349   : > { %v2348_v58 = vmax.f32 %v2282_v57, 0.0  ;;  %v2277_v1 = vadd.f32 %v6232_v55, %v2276_v59 }
 0x34a   : > { %v2533_v62 = vld [vmem:[#allocation4 + $0x111] sm:$0xff] }
 0x34b   : > { %2437 = vst.msk [vmem:[#allocation4 + $0x129] sm:$0xff] %vm2357_vm12, %v2348_v58  ;;  %v2347_v2 = vmax.f32 %v2277_v1, 0.0  ;;  %2620 = vrot.lane.b32.xlu1 %v2533_v62, %s4875_s26 }
 0x34c   : > { %v2532_v5 = vld [vmem:[#allocation4 + $0x109] sm:$0xff] }
 0x34d   : > { %v6413_v6 = vld [vmem:[#allocation4 + $0x110] sm:$0xff]  ;;  %2436 = vst.msk [vmem:[#allocation4 + $0x121] sm:$0xff] %vm2357_vm12, %v2347_v2  ;;  %2618 = vrot.lane.b32.xlu0 %v2532_v5, %s4875_s26  ;;  %v6419_v8 = vld [vmem:[#allocation4 + $0x108] sm:$0xff] }
 0x34e   : > { %2501 = vst.msk [vmem:[#allocation5 + $0xb8] sm:$0xff] %vm2357_vm12, %v6413_v6  ;;  %v4750_v12 = vpop.f32.mrf.mxu0  ;;  %2500 = vst.msk [vmem:[#allocation5 + $0xb0] sm:$0xff] %vm2357_vm12, %v6419_v8 }
 0x34f   : > { %v2292_v10 = vadd.f32 %v4750_v12, %v6232_v55  ;;  %v2704_v12 = vld [vmem:[#allocation4 + $0xa] sm:$0xff] }
 0x350   : > { %v2286_v16 = vpop.f32.mrf.mxu0 }
 0x351   : > { %v2350_v13 = vmax.f32 %v2292_v10, 0.0  ;;  %v2287_v20 = vadd.f32 %v6232_v55, %v2286_v16 }
 0x352   : > { %v2535_v24 = vld [vmem:[#allocation4 + $0x129] sm:$0xff] }
 0x353   : > { %2439 = vst.msk [vmem:[#allocation4 + $0x141] sm:$0xff] %vm2357_vm12, %v2350_v13  ;;  %v2349_v21 = vmax.f32 %v2287_v20, 0.0  ;;  %2624 = vrot.lane.b32.xlu1 %v2535_v24, %s4875_s26  ;;  %v2703_v13 = vld [vmem:[#allocation4 + $0x2] sm:$0xff]  ;;  %v2705_v24 = vld [vmem:[#allocation4 + $0x1a] sm:$0xff] }
 0x354   : > { %v2534_v42 = vld [vmem:[#allocation4 + $0x121] sm:$0xff] }
 0x355   : > { %v6427_v43 = vld [vmem:[#allocation4 + $0x128] sm:$0xff]  ;;  %2438 = vst.msk [vmem:[#allocation4 + $0x139] sm:$0xff] %vm2357_vm12, %v2349_v21  ;;  %2622 = vrot.lane.b32.xlu0 %v2534_v42, %s4875_s26  ;;  %v6433_v27 = vld [vmem:[#allocation4 + $0x120] sm:$0xff]  ;;  %v6480_v42 = vld [vmem:[#allocation4 + $0x32] sm:$0xff] }
 0x356   : > { %2503 = vst.msk [vmem:[#allocation5 + $0xc8] sm:$0xff] %vm2357_vm12, %v6427_v43  ;;  %v4753_v46 = vpop.f32.mrf.mxu0  ;;  %2502 = vst.msk [vmem:[#allocation5 + $0xc0] sm:$0xff] %vm2357_vm12, %v6433_v27  ;;  %v2706_v20 = vld [vmem:[#allocation4 + $0x22] sm:$0xff]  ;;  %v6476_v21 = vld [vmem:[#allocation4 + $0x3a] sm:$0xff] }
 0x357   : > { %v2302_v51 = vadd.f32 %v4753_v46, %v6232_v55  ;;  %v6484_v46 = vld [vmem:[#allocation4 + $0x52] sm:$0xff] }
 0x358   : > { %v2296_v53 = vpop.f32.mrf.mxu0 }
 0x359   : > { %v2352_v56 = vmax.f32 %v2302_v51, 0.0  ;;  %v2297_v11 = vadd.f32 %v6232_v55, %v2296_v53  ;;  %v6488_v51 = vld [vmem:[#allocation4 + $0x4a] sm:$0xff] }
 0x35a   : > { %v2537_v15 = vld [vmem:[#allocation4 + $0x141] sm:$0xff]  ;;  %v6492_v53 = vld [vmem:[#allocation4 + $0x6a] sm:$0xff] }
 0x35b   : > { %2441 = vst.msk [vmem:[#allocation4 + $0x159] sm:$0xff] %vm2357_vm12, %v2352_v56  ;;  %v2351_v23 = vmax.f32 %v2297_v11, 0.0  ;;  %2628 = vrot.lane.b32.xlu1 %v2537_v15, %s4875_s26  ;;  %v6496_v56 = vld [vmem:[#allocation4 + $0x62] sm:$0xff]  ;;  %v6504_v15 = vld [vmem:[#allocation4 + $0x7a] sm:$0xff] }
 0x35c   : > { %v2536_v49 = vld [vmem:[#allocation4 + $0x139] sm:$0xff]  ;;  %v6500_v11 = vld [vmem:[#allocation4 + $0x82] sm:$0xff] }
 0x35d   : > { %v6441_v33 = vld [vmem:[#allocation4 + $0x140] sm:$0xff]  ;;  %2440 = vst.msk [vmem:[#allocation4 + $0x151] sm:$0xff] %vm2357_vm12, %v2351_v23  ;;  %2626 = vrot.lane.b32.xlu0 %v2536_v49, %s4875_s26  ;;  %v6447_v47 = vld [vmem:[#allocation4 + $0x138] sm:$0xff] }
 0x35e   : > { %2505 = vst.msk [vmem:[#allocation5 + $0xd8] sm:$0xff] %vm2357_vm12, %v6441_v33  ;;  %v4756_v36 = vpop.f32.mrf.mxu0  ;;  %2504 = vst.msk [vmem:[#allocation5 + $0xd0] sm:$0xff] %vm2357_vm12, %v6447_v47  ;;  %v6508_v23 = vld [vmem:[#allocation4 + $0x9a] sm:$0xff]  ;;  %v6512_v49 = vld [vmem:[#allocation4 + $0x92] sm:$0xff] }
 0x35f   : > { %v2312_v30 = vadd.f32 %v4756_v36, %v6232_v55  ;;  %v6516_v36 = vld [vmem:[#allocation4 + $0xb2] sm:$0xff] }
 0x360   : > { %v2306_v0 = vpop.f32.mrf.mxu0 }
 0x361   : > { %v2354_v39 = vmax.f32 %v2312_v30, 0.0  ;;  %v2307_v54 = vadd.f32 %v6232_v55, %v2306_v0 }
 0x362   : > { %v2539_v57 = vld [vmem:[#allocation4 + $0x159] sm:$0xff] }
 0x363   : > { %2443 = vst.msk [vmem:[#allocation4 + $0x171] sm:$0xff] %vm2357_vm12, %v2354_v39  ;;  %v2353_v59 = vmax.f32 %v2307_v54, 0.0  ;;  %2632 = vrot.lane.b32.xlu1 %v2539_v57, %s4875_s26  ;;  %v6521_v39 = vld [vmem:[#allocation4 + $0xaa] sm:$0xff] }
 0x364   : > { %v2538_v58 = vld [vmem:[#allocation4 + $0x151] sm:$0xff] }
 0x365   : > { %v6455_v1 = vld [vmem:[#allocation4 + $0x158] sm:$0xff]  ;;  %2442 = vst.msk [vmem:[#allocation4 + $0x169] sm:$0xff] %vm2357_vm12, %v2353_v59  ;;  %2630 = vrot.lane.b32.xlu0 %v2538_v58, %s4875_s26  ;;  %v6461_v62 = vld [vmem:[#allocation4 + $0x150] sm:$0xff]  ;;  %v6531_v58 = vld [vmem:[#allocation4 + $0xc2] sm:$0xff] }
 0x366   : > { %2507 = vst.msk [vmem:[#allocation5 + $0xe8] sm:$0xff] %vm2357_vm12, %v6455_v1  ;;  %2506 = vst.msk [vmem:[#allocation5 + $0xe0] sm:$0xff] %vm2357_vm12, %v6461_v62  ;;  %v6526_v54 = vld [vmem:[#allocation4 + $0xca] sm:$0xff] }
 0x36a   : > { %v2541_v2 = vld [vmem:[#allocation4 + $0x171] sm:$0xff] }
 0x36b   : > { %2636 = vrot.lane.b32.xlu1 %v2541_v2, %s4875_s26  ;;  %v2722_v2 = vld [vmem:[#allocation4 + $0xe2] sm:$0xff] }
 0x36c   : > { %v2540_v5 = vld [vmem:[#allocation4 + $0x169] sm:$0xff] }
 0x36d   : > { %v2477_v10 = vld [vmem:[#allocation4 + $0x170] sm:$0xff]  ;;  %2634 = vrot.lane.b32.xlu0 %v2540_v5, %s4875_s26  ;;  %v6468_v16 = vld [vmem:[#allocation4 + $0x168] sm:$0xff] }
 0x36e   : > { %2509 = vst.msk [vmem:[#allocation5 + $0xf8] sm:$0xff] %vm2357_vm12, %v2477_v10  ;;  %2508 = vst.msk [vmem:[#allocation5 + $0xf0] sm:$0xff] %vm2357_vm12, %v6468_v16  ;;  %v2721_v10 = vld [vmem:[#allocation4 + $0xda] sm:$0xff] }
 0x36f   : > { %2769 = vrot.lane.b32.xlu1 %v2704_v12, %s4877_s28 }
 0x371   : > { %2767 = vrot.lane.b32.xlu0 %v2703_v13, %s4877_s28  ;;  %v2724_v13 = vld [vmem:[#allocation4 + $0xfa] sm:$0xff] }
 0x373   : > { %2773 = vrot.lane.b32.xlu1 %v2706_v20, %s4877_s28 }
 0x375   : > { %2771 = vrot.lane.b32.xlu0 %v2705_v24, %s4877_s28 }
 0x377   : > { %2777 = vrot.lane.b32.xlu1 %v6476_v21, %s4877_s28 }
 0x379   : > { %2775 = vrot.lane.b32.xlu0 %v6480_v42, %s4877_s28 }
 0x37b   : > { %2781 = vrot.lane.b32.xlu1 %v6484_v46, %s4877_s28 }
 0x37d   : > { %2779 = vrot.lane.b32.xlu0 %v6488_v51, %s4877_s28 }
 0x37f   : > { %2785 = vrot.lane.b32.xlu1 %v6492_v53, %s4877_s28 }
 0x381   : > { %2783 = vrot.lane.b32.xlu0 %v6496_v56, %s4877_s28 }
 0x383   : > { %2789 = vrot.lane.b32.xlu1 %v6500_v11, %s4877_s28 }
 0x385   : > { %2787 = vrot.lane.b32.xlu0 %v6504_v15, %s4877_s28 }
 0x387   : > { %2793 = vrot.lane.b32.xlu1 %v6508_v23, %s4877_s28 }
 0x389   : > { %2791 = vrot.lane.b32.xlu0 %v6512_v49, %s4877_s28 }
 0x38a   : > { %v2581_v30 = vpop.permute.xlu1 %2580 }
 0x38b   : > { %2797 = vrot.lane.b32.xlu1 %v6516_v36, %s4877_s28  ;;  %2674 = vst.msk [vmem:[#allocation5 + $0x18] sm:$0xff] %vm2670_vm14, %v2581_v30  ;;  %v2723_v30 = vld [vmem:[#allocation4 + $0xf2] sm:$0xff] }
 0x38c   : > { %v2579_v0 = vpop.permute.xlu0 %2578 }
 0x38d   : > { %2673 = vst.msk [vmem:[#allocation5 + $0x10] sm:$0xff] %vm2670_vm14, %v2579_v0  ;;  %2795 = vrot.lane.b32.xlu0 %v6521_v39, %s4877_s28  ;;  %v2726_v0 = vld [vmem:[#allocation4 + $0x112] sm:$0xff] }
 0x38e   : > { %v2585_v57 = vpop.permute.xlu1 %2584 }
 0x38f   : > { %2801 = vrot.lane.b32.xlu1 %v6526_v54, %s4877_s28  ;;  %2676 = vst.msk [vmem:[#allocation5 + $0x28] sm:$0xff] %vm2670_vm14, %v2585_v57 }
 0x390   : > { %v2583_v59 = vpop.permute.xlu0 %2582 }
 0x391   : > { %2675 = vst.msk [vmem:[#allocation5 + $0x20] sm:$0xff] %vm2670_vm14, %v2583_v59  ;;  %2799 = vrot.lane.b32.xlu0 %v6531_v58, %s4877_s28 }
 0x392   : > { %v2589_v5 = vpop.permute.xlu1 %2588 }
 0x393   : > { %2805 = vrot.lane.b32.xlu1 %v2722_v2, %s4877_s28  ;;  %2678 = vst.msk [vmem:[#allocation5 + $0x38] sm:$0xff] %vm2670_vm14, %v2589_v5  ;;  %v2725_v2 = vld [vmem:[#allocation4 + $0x10a] sm:$0xff] }
 0x394   : > { %v2587_v12 = vpop.permute.xlu0 %2586  ;;  %v2728_v5 = vld [vmem:[#allocation4 + $0x12a] sm:$0xff] }
 0x395   : > { %2677 = vst.msk [vmem:[#allocation5 + $0x30] sm:$0xff] %vm2670_vm14, %v2587_v12  ;;  %2803 = vrot.lane.b32.xlu0 %v2721_v10, %s4877_s28 }
 0x396   : > { %v2593_v20 = vpop.permute.xlu1 %2592 }
 0x397   : > { %2809 = vrot.lane.b32.xlu1 %v2724_v13, %s4877_s28  ;;  %2680 = vst.msk [vmem:[#allocation5 + $0x48] sm:$0xff] %vm2670_vm14, %v2593_v20  ;;  %v2727_v13 = vld [vmem:[#allocation4 + $0x122] sm:$0xff] }
 0x398   : > { %v2591_v24 = vpop.permute.xlu0 %2590  ;;  %v2730_v20 = vld [vmem:[#allocation4 + $0x142] sm:$0xff] }
 0x399   : > { %2679 = vst.msk [vmem:[#allocation5 + $0x40] sm:$0xff] %vm2670_vm14, %v2591_v24  ;;  %2807 = vrot.lane.b32.xlu0 %v2723_v30, %s4877_s28 }
 0x39a   : > { %v2597_v57 = vpop.permute.xlu1 %2596 }
 0x39b   : > { %2813 = vrot.lane.b32.xlu1 %v2726_v0, %s4877_s28  ;;  %2682 = vst.msk [vmem:[#allocation5 + $0x58] sm:$0xff] %vm2670_vm14, %v2597_v57  ;;  %v2729_v0 = vld [vmem:[#allocation4 + $0x13a] sm:$0xff] }
 0x39c   : > { %v2595_v59 = vpop.permute.xlu0 %2594  ;;  %v2732_v57 = vld [vmem:[#allocation4 + $0x15a] sm:$0xff] }
 0x39d   : > { %2681 = vst.msk [vmem:[#allocation5 + $0x50] sm:$0xff] %vm2670_vm14, %v2595_v59  ;;  %2811 = vrot.lane.b32.xlu0 %v2725_v2, %s4877_s28 }
 0x39e   : > { %v2601_v12 = vpop.permute.xlu1 %2600 }
 0x39f   : > { %2817 = vrot.lane.b32.xlu1 %v2728_v5, %s4877_s28  ;;  %2684 = vst.msk [vmem:[#allocation5 + $0x68] sm:$0xff] %vm2670_vm14, %v2601_v12  ;;  %v2731_v5 = vld [vmem:[#allocation4 + $0x152] sm:$0xff] }
 0x3a0   : > { %v2599_v10 = vpop.permute.xlu0 %2598  ;;  %v2734_v12 = vld [vmem:[#allocation4 + $0x172] sm:$0xff] }
 0x3a1   : > { %2683 = vst.msk [vmem:[#allocation5 + $0x60] sm:$0xff] %vm2670_vm14, %v2599_v10  ;;  %2815 = vrot.lane.b32.xlu0 %v2727_v13, %s4877_s28  ;;  %v2733_v10 = vld [vmem:[#allocation4 + $0x16a] sm:$0xff] }
 0x3a2   : > { %v2605_v24 = vpop.permute.xlu1 %2604 }
 0x3a3   : > { %2821 = vrot.lane.b32.xlu1 %v2730_v20, %s4877_s28  ;;  %2686 = vst.msk [vmem:[#allocation5 + $0x78] sm:$0xff] %vm2670_vm14, %v2605_v24 }
 0x3a4   : > { %v2603_v30 = vpop.permute.xlu0 %2602 }
 0x3a5   : > { %2685 = vst.msk [vmem:[#allocation5 + $0x70] sm:$0xff] %vm2670_vm14, %v2603_v30  ;;  %2819 = vrot.lane.b32.xlu0 %v2729_v0, %s4877_s28 }
 0x3a6   : > { %v2609_v59 = vpop.permute.xlu1 %2608 }
 0x3a7   : > { %2825 = vrot.lane.b32.xlu1 %v2732_v57, %s4877_s28  ;;  %2688 = vst.msk [vmem:[#allocation5 + $0x88] sm:$0xff] %vm2670_vm14, %v2609_v59 }
 0x3a8   : > { %v2607_v2 = vpop.permute.xlu0 %2606 }
 0x3a9   : > { %2687 = vst.msk [vmem:[#allocation5 + $0x80] sm:$0xff] %vm2670_vm14, %v2607_v2  ;;  %2823 = vrot.lane.b32.xlu0 %v2731_v5, %s4877_s28 }
 0x3ab   : > { %2829 = vrot.lane.b32.xlu1 %v2734_v12, %s4877_s28 }
 0x3ad   : > { %v2613_v13 = vpop.permute.xlu1 %2612  ;;  %2827 = vrot.lane.b32.xlu0 %v2733_v10, %s4877_s28 }
 0x3ae   : > { %2690 = vst.msk [vmem:[#allocation5 + $0x98] sm:$0xff] %vm2670_vm14, %v2613_v13 }
 0x3af   : > { %2962 = vrot.lane.b32.xlu1 %v6256_v28, %s4879_s30  ;;  %v2611_v20 = vpop.permute.xlu0 %2610 }
 0x3b0   : > { %2689 = vst.msk [vmem:[#allocation5 + $0x90] sm:$0xff] %vm2670_vm14, %v2611_v20 }
 0x3b1   : > { %2960 = vrot.lane.b32.xlu0 %v6249_v48, %s4879_s30 }
 0x3b3   : > { %2966 = vrot.lane.b32.xlu1 %v6268_v35, %s4879_s30 }
 0x3b5   : > { %v2617_v24 = vpop.permute.xlu1 %2616  ;;  %2964 = vrot.lane.b32.xlu0 %v6276_v63, %s4879_s30 }
 0x3b6   : > { %2692 = vst.msk [vmem:[#allocation5 + $0xa8] sm:$0xff] %vm2670_vm14, %v2617_v24 }
 0x3b7   : > { %2970 = vrot.lane.b32.xlu1 %v6288_v34, %s4879_s30  ;;  %v2615_v30 = vpop.permute.xlu0 %2614 }
 0x3b8   : > { %2691 = vst.msk [vmem:[#allocation5 + $0xa0] sm:$0xff] %vm2670_vm14, %v2615_v30 }
 0x3b9   : > { %2968 = vrot.lane.b32.xlu0 %v6296_v45, %s4879_s30 }
 0x3bb   : > { %2974 = vrot.lane.b32.xlu1 %v6308_v32, %s4879_s30 }
 0x3bd   : > { %v2621_v48 = vpop.permute.xlu1 %2620  ;;  %2972 = vrot.lane.b32.xlu0 %v6316_v38, %s4879_s30 }
 0x3be   : > { %2694 = vst.msk [vmem:[#allocation5 + $0xb8] sm:$0xff] %vm2670_vm14, %v2621_v48 }
 0x3bf   : > { %2978 = vrot.lane.b32.xlu1 %v6330_v60, %s4879_s30  ;;  %v2619_v28 = vpop.permute.xlu0 %2618 }
 0x3c0   : > { %2693 = vst.msk [vmem:[#allocation5 + $0xb0] sm:$0xff] %vm2670_vm14, %v2619_v28  ;;  %v4093_v28 = vld [vmem:[%s7258_s3 + $0x30] sm:$0xff] }
 0x3c1   : > { %2976 = vrot.lane.b32.xlu0 %v6338_v3, %s4879_s30 }
 0x3c3   : > { %2982 = vrot.lane.b32.xlu1 %v6346_v7, %s4879_s30 }
 0x3c5   : > { %v2625_v35 = vpop.permute.xlu1 %2624  ;;  %2980 = vrot.lane.b32.xlu0 %v6353_v9, %s4879_s30 }
 0x3c6   : > { %2696 = vst.msk [vmem:[#allocation5 + $0xc8] sm:$0xff] %vm2670_vm14, %v2625_v35 }
 0x3c7   : > { %2986 = vrot.lane.b32.xlu1 %v6360_v17, %s4879_s30  ;;  %v2623_v63 = vpop.permute.xlu0 %2622 }
 0x3c8   : > { %2695 = vst.msk [vmem:[#allocation5 + $0xc0] sm:$0xff] %vm2670_vm14, %v2623_v63 }
 0x3c9   : > { %2984 = vrot.lane.b32.xlu0 %v6365_v41, %s4879_s30 }
 0x3cb   : > { %2990 = vrot.lane.b32.xlu1 %v6372_v29, %s4879_s30 }
 0x3cd   : > { %v2629_v0 = vpop.permute.xlu1 %2628  ;;  %2988 = vrot.lane.b32.xlu0 %v6377_v26, %s4879_s30 }
 0x3ce   : > { %2698 = vst.msk [vmem:[#allocation5 + $0xd8] sm:$0xff] %vm2670_vm14, %v2629_v0 }
 0x3cf   : > { %2994 = vrot.lane.b32.xlu1 %v6385_v18, %s4879_s30  ;;  %v2627_v57 = vpop.permute.xlu0 %2626 }
 0x3d0   : > { %2697 = vst.msk [vmem:[#allocation5 + $0xd0] sm:$0xff] %vm2670_vm14, %v2627_v57 }
 0x3d1   : > { %2992 = vrot.lane.b32.xlu0 %v6391_v19, %s4879_s30 }
 0x3d3   : > { %2998 = vrot.lane.b32.xlu1 %v6399_v50, %s4879_s30 }
 0x3d5   : > { %v2633_v59 = vpop.permute.xlu1 %2632  ;;  %2996 = vrot.lane.b32.xlu0 %v6405_v40, %s4879_s30 }
 0x3d6   : > { %2700 = vst.msk [vmem:[#allocation5 + $0xe8] sm:$0xff] %vm2670_vm14, %v2633_v59 }
 0x3d7   : > { %3002 = vrot.lane.b32.xlu1 %v6413_v6, %s4879_s30  ;;  %v2631_v2 = vpop.permute.xlu0 %2630 }
 0x3d8   : > { %2699 = vst.msk [vmem:[#allocation5 + $0xe0] sm:$0xff] %vm2670_vm14, %v2631_v2  ;;  %v4088_v2 = vld [vmem:[%s7258_s3 + $0x8] sm:$0xff] }
 0x3d9   : > { %3000 = vrot.lane.b32.xlu0 %v6419_v8, %s4879_s30 }
 0x3db   : > { %3006 = vrot.lane.b32.xlu1 %v6427_v43, %s4879_s30 }
 0x3dd   : > { %v2637_v5 = vpop.permute.xlu1 %2636  ;;  %3004 = vrot.lane.b32.xlu0 %v6433_v27, %s4879_s30 }
 0x3de   : > { %2702 = vst.msk [vmem:[#allocation5 + $0xf8] sm:$0xff] %vm2670_vm14, %v2637_v5 }
 0x3df   : > { %3010 = vrot.lane.b32.xlu1 %v6441_v33, %s4879_s30  ;;  %v2635_v12 = vpop.permute.xlu0 %2634 }
 0x3e0   : > { %2701 = vst.msk [vmem:[#allocation5 + $0xf0] sm:$0xff] %vm2670_vm14, %v2635_v12 }
 0x3e1   : > { %v2770_v10 = vpop.permute.xlu1 %2769  ;;  %3008 = vrot.lane.b32.xlu0 %v6447_v47, %s4879_s30  ;;  %v4759_v47 = vpop.f32.mrf.mxu0 }
 0x3e2   : > { %2865 = vst.msk [vmem:[#allocation5 + $0x8] sm:$0xff] %vm2863_vm15, %v2770_v10  ;;  %v2322_v24 = vadd.f32 %v4759_v47, %v6232_v55 }
 0x3e3   : > { %3014 = vrot.lane.b32.xlu1 %v6455_v1, %s4879_s30  ;;  %v2768_v43 = vpop.permute.xlu0 %2767  ;;  %v4095_v1 = vld [vmem:[%s7258_s3 + $0x40] sm:$0xff] }
 0x3e4   : > { %2864 = vst.msk [vmem:[#allocation5] sm:$0xff] %vm2863_vm15, %v2768_v43  ;;  %4826 = vmatprep.subr.mxu1 %v4095_v1  ;;  %4760 = vmatprep.subr.mxu0 %v4095_v1  ;;  %v2356_v48 = vmax.f32 %v2322_v24, 0.0 }
 0x3e5   : > { %v2774_v13 = vpop.permute.xlu1 %2773  ;;  %3012 = vrot.lane.b32.xlu0 %v6461_v62, %s4879_s30  ;;  %v2316_v62 = vpop.f32.mrf.mxu0  ;;  %4835 = vmatpush3.msra.mxu1 %v4095_v1 }
 0x3e6   : > { %2867 = vst.msk [vmem:[#allocation5 + $0x18] sm:$0xff] %vm2863_vm15, %v2774_v13  ;;  %4761 = vmatpush3.msra.mxu0 %v4095_v1 }
 0x3e7   : > { %3157 = vrot.lane.b32.xlu1 %v6266_v31, %s4881_s17  ;;  %v2772_v33 = vpop.permute.xlu0 %2771  ;;  %v4094_v31 = vld [vmem:[%s7258_s3 + $0x38] sm:$0xff]  ;;  %2445 = vst.msk [vmem:[#allocation4 + $0x189] sm:$0xff] %vm2357_vm12, %v2356_v48 }
 0x3e8   : > { %2866 = vst.msk [vmem:[#allocation5 + $0x10] sm:$0xff] %vm2863_vm15, %v2772_v33  ;;  %4827 = vmatprep.subr.mxu1 %v4094_v31  ;;  %4762 = vmatprep.subr.mxu0 %v4094_v31 }
 0x3e9   : > { %v2778_v20 = vpop.permute.xlu1 %2777  ;;  %3016 = vrot.lane.b32.xlu0 %v6468_v16, %s4879_s30  ;;  %v2317_v16 = vadd.f32 %v6232_v55, %v2316_v62  ;;  %4836 = vmatpush3.msra.mxu1 %v4094_v31  ;;  %v4092_v55 = vld [vmem:[%s7258_s3 + $0x28] sm:$0xff] }
 0x3ea   : > { %2869 = vst.msk [vmem:[#allocation5 + $0x28] sm:$0xff] %vm2863_vm15, %v2778_v20  ;;  %4828 = vmatprep.subr.mxu1 %v4093_v28  ;;  %4763 = vmatpush3.msra.mxu0 %v4094_v31 }
 0x3eb   : > { %3350 = vrot.lane.b32.xlu1 %v6480_v42, %s4882_s27  ;;  %v2776_v30 = vpop.permute.xlu0 %2775  ;;  %v2355_v42 = vmax.f32 %v2317_v16, 0.0  ;;  %4837 = vmatpush3.msra.mxu1 %v4093_v28 }
 0x3ec   : > { %2868 = vst.msk [vmem:[#allocation5 + $0x20] sm:$0xff] %vm2863_vm15, %v2776_v30  ;;  %4829 = vmatprep.subr.mxu1 %v4092_v55  ;;  %4764 = vmatprep.subr.mxu0 %v4093_v28 }
 0x3ed   : > { %v2782_v35 = vpop.permute.xlu1 %2781  ;;  %3159 = vrot.lane.b32.xlu0 %v6258_v44, %s4881_s17  ;;  %2444 = vst.msk [vmem:[#allocation4 + $0x181] sm:$0xff] %vm2357_vm12, %v2355_v42  ;;  %4838 = vmatpush3.msra.mxu1 %v4092_v55  ;;  %v4091_v44 = vld [vmem:[%s7258_s3 + $0x20] sm:$0xff] }
 0x3ee   : > { %2871 = vst.msk [vmem:[#allocation5 + $0x38] sm:$0xff] %vm2863_vm15, %v2782_v35  ;;  %4830 = vmatprep.subr.mxu1 %v4091_v44  ;;  %4765 = vmatpush3.msra.mxu0 %v4093_v28 }
 0x3ef   : > { %3544 = vrot.lane.b32.xlu1 %v6296_v45, %s4883_s8  ;;  %v2780_v63 = vpop.permute.xlu0 %2779  ;;  %4839 = vmatpush3.msra.mxu1 %v4091_v44  ;;  %v4090_v45 = vld [vmem:[%s7258_s3 + $0x18] sm:$0xff] }
 0x3f0   : > { %2870 = vst.msk [vmem:[#allocation5 + $0x30] sm:$0xff] %vm2863_vm15, %v2780_v63  ;;  %4831 = vmatprep.subr.mxu1 %v4090_v45  ;;  %4766 = vmatprep.subr.mxu0 %v4092_v55 }
 0x3f1   : > { %v2786_v0 = vpop.permute.xlu1 %2785  ;;  %3352 = vrot.lane.b32.xlu0 %v6476_v21, %s4882_s27  ;;  %4840 = vmatpush3.msra.mxu1 %v4090_v45  ;;  %v4089_v21 = vld [vmem:[%s7258_s3 + $0x10] sm:$0xff] }
 0x3f2   : > { %2873 = vst.msk [vmem:[#allocation5 + $0x48] sm:$0xff] %vm2863_vm15, %v2786_v0  ;;  %4832 = vmatprep.subr.mxu1 %v4089_v21  ;;  %4767 = vmatpush3.msra.mxu0 %v4092_v55  ;;  %v3679_v0 = vld [vmem:[#allocation4 + $0xa9] sm:$0xff] }
 0x3f3   : > { %3737 = vrot.lane.b32.xlu1 %v6286_v22, %s4884_s13  ;;  %v2784_v57 = vpop.permute.xlu0 %2783  ;;  %4841 = vmatpush3.msra.mxu1 %v4089_v21 }
 0x3f4   : > { %2872 = vst.msk [vmem:[#allocation5 + $0x40] sm:$0xff] %vm2863_vm15, %v2784_v57  ;;  %4833 = vmatprep.subr.mxu1 %v4088_v2  ;;  %4768 = vmatprep.subr.mxu0 %v4091_v44 }
 0x3f5   : > { %v2790_v59 = vpop.permute.xlu1 %2789  ;;  %3546 = vrot.lane.b32.xlu0 %v6288_v34, %s4883_s8  ;;  %4842 = vmatpush3.msra.mxu1 %v4088_v2  ;;  %v4087_v34 = vld [vmem:[%s7258_s3] sm:$0xff] }
 0x3f6   : > { %2875 = vst.msk [vmem:[#allocation5 + $0x58] sm:$0xff] %vm2863_vm15, %v2790_v59  ;;  %4834 = vmatprep.subr.mxu1 %v4087_v34  ;;  %4769 = vmatpush3.msra.mxu0 %v4091_v44 }
 0x3f7   : > { %3739 = vrot.lane.b32.xlu1 %v6278_v14, %s4884_s13  ;;  %v2788_v5 = vpop.permute.xlu0 %2787  ;;  %4843 = vmatpush3.msra.mxu1 %v4087_v34 }
 0x3f8   : > { %2874 = vst.msk [vmem:[#allocation5 + $0x50] sm:$0xff] %vm2863_vm15, %v2788_v5  ;;  %4770 = vmatprep.subr.mxu0 %v4090_v45 }
 0x3f9   : > { %v2794_v12 = vpop.permute.xlu1 %2793  ;;  %3161 = vrot.lane.b32.xlu0 %v6286_v22, %s4881_s17  ;;  %4771 = vmatpush3.msra.mxu0 %v4090_v45 }
 0x3fa   : > { %2877 = vst.msk [vmem:[#allocation5 + $0x68] sm:$0xff] %vm2863_vm15, %v2794_v12  ;;  %4772 = vmatprep.subr.mxu0 %v4089_v21  ;;  %v3681_v12 = vld [vmem:[#allocation4 + $0xc1] sm:$0xff] }
 0x3fb   : > { %3163 = vrot.lane.b32.xlu1 %v6278_v14, %s4881_s17  ;;  %v2792_v10 = vpop.permute.xlu0 %2791  ;;  %4773 = vmatpush3.msra.mxu0 %v4089_v21 }
 0x3fc   : > { %2876 = vst.msk [vmem:[#allocation5 + $0x60] sm:$0xff] %vm2863_vm15, %v2792_v10  ;;  %4774 = vmatprep.subr.mxu0 %v4088_v2 }
 0x3fd   : > { %v2798_v43 = vpop.permute.xlu1 %2797  ;;  %3930 = vrot.lane.b32.xlu0 %v6488_v51, %s4885_s24  ;;  %4775 = vmatpush3.msra.mxu0 %v4088_v2 }
 0x3fe   : > { %2879 = vst.msk [vmem:[#allocation5 + $0x78] sm:$0xff] %vm2863_vm15, %v2798_v43  ;;  %4776 = vmatprep.subr.mxu0 %v4087_v34 }
 0x3ff   : > { %3932 = vrot.lane.b32.xlu1 %v6484_v46, %s4885_s24  ;;  %v2796_v22 = vpop.permute.xlu0 %2795  ;;  %4777 = vmatpush3.msra.mxu0 %v4087_v34 }
 0x400   : > { %2878 = vst.msk [vmem:[#allocation5 + $0x70] sm:$0xff] %vm2863_vm15, %v2796_v22 }
 0x401   : > { %v2802_v14 = vpop.permute.xlu1 %2801  ;;  %3354 = vrot.lane.b32.xlu0 %v6488_v51, %s4882_s27 }
 0x402   : > { %2881 = vst.msk [vmem:[#allocation5 + $0x88] sm:$0xff] %vm2863_vm15, %v2802_v14 }
 0x403   : > { %3548 = vrot.lane.b32.xlu1 %v6316_v38, %s4883_s8  ;;  %v2800_v13 = vpop.permute.xlu0 %2799 }
 0x404   : > { %2880 = vst.msk [vmem:[#allocation5 + $0x80] sm:$0xff] %vm2863_vm15, %v2800_v13 }
 0x405   : > { %v2806_v33 = vpop.permute.xlu1 %2805  ;;  %3356 = vrot.lane.b32.xlu0 %v6484_v46, %s4882_s27 }
 0x406   : > { %2883 = vst.msk [vmem:[#allocation5 + $0x98] sm:$0xff] %vm2863_vm15, %v2806_v33 }
 0x407   : > { %3741 = vrot.lane.b32.xlu1 %v6306_v37, %s4884_s13  ;;  %v2804_v51 = vpop.permute.xlu0 %2803 }
 0x408   : > { %2882 = vst.msk [vmem:[#allocation5 + $0x90] sm:$0xff] %vm2863_vm15, %v2804_v51 }
 0x409   : > { %v2810_v47 = vpop.permute.xlu1 %2809  ;;  %3550 = vrot.lane.b32.xlu0 %v6308_v32, %s4883_s8 }
 0x40a   : > { %2885 = vst.msk [vmem:[#allocation5 + $0xa8] sm:$0xff] %vm2863_vm15, %v2810_v47  ;;  %v3683_v47 = vld [vmem:[#allocation4 + $0xd9] sm:$0xff] }
 0x40b   : > { %3743 = vrot.lane.b32.xlu1 %v6298_v25, %s4884_s13  ;;  %v2808_v38 = vpop.permute.xlu0 %2807 }
 0x40c   : > { %2884 = vst.msk [vmem:[#allocation5 + $0xa0] sm:$0xff] %vm2863_vm15, %v2808_v38 }
 0x40d   : > { %v2814_v46 = vpop.permute.xlu1 %2813  ;;  %3165 = vrot.lane.b32.xlu0 %v6306_v37, %s4881_s17 }
 0x40e   : > { %2887 = vst.msk [vmem:[#allocation5 + $0xb8] sm:$0xff] %vm2863_vm15, %v2814_v46 }
 0x40f   : > { %3167 = vrot.lane.b32.xlu1 %v6298_v25, %s4881_s17  ;;  %v2812_v1 = vpop.permute.xlu0 %2811 }
 0x410   : > { %2886 = vst.msk [vmem:[#allocation5 + $0xb0] sm:$0xff] %vm2863_vm15, %v2812_v1 }
 0x411   : > { %v2818_v32 = vpop.permute.xlu1 %2817  ;;  %3934 = vrot.lane.b32.xlu0 %v6496_v56, %s4885_s24 }
 0x412   : > { %2889 = vst.msk [vmem:[#allocation5 + $0xc8] sm:$0xff] %vm2863_vm15, %v2818_v32 }
 0x413   : > { %3936 = vrot.lane.b32.xlu1 %v6492_v53, %s4885_s24  ;;  %v2816_v20 = vpop.permute.xlu0 %2815 }
 0x414   : > { %2888 = vst.msk [vmem:[#allocation5 + $0xc0] sm:$0xff] %vm2863_vm15, %v2816_v20  ;;  %v3877_v20 = vld [vmem:[#allocation4 + $0xe2] sm:$0xff] }
 0x415   : > { %v2822_v37 = vpop.permute.xlu1 %2821  ;;  %3358 = vrot.lane.b32.xlu0 %v6496_v56, %s4882_s27 }
 0x416   : > { %2891 = vst.msk [vmem:[#allocation5 + $0xd8] sm:$0xff] %vm2863_vm15, %v2822_v37 }
 0x417   : > { %3552 = vrot.lane.b32.xlu1 %v6338_v3, %s4883_s8  ;;  %v2820_v25 = vpop.permute.xlu0 %2819 }
 0x418   : > { %2890 = vst.msk [vmem:[#allocation5 + $0xd0] sm:$0xff] %vm2863_vm15, %v2820_v25 }
 0x419   : > { %v2826_v24 = vpop.permute.xlu1 %2825  ;;  %3360 = vrot.lane.b32.xlu0 %v6492_v53, %s4882_s27 }
 0x41a   : > { %2893 = vst.msk [vmem:[#allocation5 + $0xe8] sm:$0xff] %vm2863_vm15, %v2826_v24 }
 0x41b   : > { %3745 = vrot.lane.b32.xlu1 %v6328_v61, %s4884_s13  ;;  %v2824_v62 = vpop.permute.xlu0 %2823 }
 0x41c   : > { %2892 = vst.msk [vmem:[#allocation5 + $0xe0] sm:$0xff] %vm2863_vm15, %v2824_v62 }
 0x41d   : > { %v2830_v56 = vpop.permute.xlu1 %2829  ;;  %3554 = vrot.lane.b32.xlu0 %v6330_v60, %s4883_s8 }
 0x41e   : > { %2895 = vst.msk [vmem:[#allocation5 + $0xf8] sm:$0xff] %vm2863_vm15, %v2830_v56 }
 0x41f   : > { %3747 = vrot.lane.b32.xlu1 %v6318_v52, %s4884_s13  ;;  %v2828_v3 = vpop.permute.xlu0 %2827 }
 0x420   : > { %2894 = vst.msk [vmem:[#allocation5 + $0xf0] sm:$0xff] %vm2863_vm15, %v2828_v3 }
 0x421   : > { %v2963_v53 = vpop.permute.xlu1 %2962  ;;  %3169 = vrot.lane.b32.xlu0 %v6328_v61, %s4881_s17 }
 0x422   : > { %3058 = vst.msk [vmem:[#allocation5 + $0x8] sm:$0xff] %vm3056_vm0, %v2963_v53  ;;  %v3685_v53 = vld [vmem:[#allocation4 + $0xf1] sm:$0xff] }
 0x423   : > { %3171 = vrot.lane.b32.xlu1 %v6318_v52, %s4881_s17  ;;  %v2961_v31 = vpop.permute.xlu0 %2960 }
 0x424   : > { %3057 = vst.msk [vmem:[#allocation5] sm:$0xff] %vm3056_vm0, %v2961_v31 }
 0x425   : > { %v2967_v60 = vpop.permute.xlu1 %2966  ;;  %3938 = vrot.lane.b32.xlu0 %v6504_v15, %s4885_s24 }
 0x426   : > { %3060 = vst.msk [vmem:[#allocation5 + $0x18] sm:$0xff] %vm3056_vm0, %v2967_v60 }
 0x427   : > { %3940 = vrot.lane.b32.xlu1 %v6500_v11, %s4885_s24  ;;  %v2965_v30 = vpop.permute.xlu0 %2964 }
 0x428   : > { %3059 = vst.msk [vmem:[#allocation5 + $0x10] sm:$0xff] %vm3056_vm0, %v2965_v30 }
 0x429   : > { %v2971_v61 = vpop.permute.xlu1 %2970  ;;  %3362 = vrot.lane.b32.xlu0 %v6504_v15, %s4882_s27 }
 0x42a   : > { %3062 = vst.msk [vmem:[#allocation5 + $0x28] sm:$0xff] %vm3056_vm0, %v2971_v61 }
 0x42b   : > { %3556 = vrot.lane.b32.xlu1 %v6353_v9, %s4883_s8  ;;  %v2969_v52 = vpop.permute.xlu0 %2968  ;;  %v3678_v9 = vld [vmem:[#allocation4 + $0x99] sm:$0xff] }
 0x42c   : > { %3061 = vst.msk [vmem:[#allocation5 + $0x20] sm:$0xff] %vm3056_vm0, %v2969_v52 }
 0x42d   : > { %v2975_v48 = vpop.permute.xlu1 %2974  ;;  %3364 = vrot.lane.b32.xlu0 %v6500_v11, %s4882_s27  ;;  %v3099_v11 = vld [vmem:[#allocation4 + $0x91] sm:$0xff] }
 0x42e   : > { %3064 = vst.msk [vmem:[#allocation5 + $0x38] sm:$0xff] %vm3056_vm0, %v2975_v48  ;;  %v3878_v48 = vld [vmem:[#allocation4 + $0xf2] sm:$0xff] }
 0x42f   : > { %3749 = vrot.lane.b32.xlu1 %v6344_v4, %s4884_s13  ;;  %v2973_v16 = vpop.permute.xlu0 %2972 }
 0x430   : > { %3063 = vst.msk [vmem:[#allocation5 + $0x30] sm:$0xff] %vm3056_vm0, %v2973_v16  ;;  %v3879_v16 = vld [vmem:[#allocation4 + $0xfa] sm:$0xff] }
 0x431   : > { %v2979_v15 = vpop.permute.xlu1 %2978  ;;  %3558 = vrot.lane.b32.xlu0 %v6346_v7, %s4883_s8 }
 0x432   : > { %3066 = vst.msk [vmem:[#allocation5 + $0x48] sm:$0xff] %vm3056_vm0, %v2979_v15 }
 0x433   : > { %3751 = vrot.lane.b32.xlu1 %v3678_v9, %s4884_s13  ;;  %v2977_v28 = vpop.permute.xlu0 %2976 }
 0x434   : > { %3065 = vst.msk [vmem:[#allocation5 + $0x40] sm:$0xff] %vm3056_vm0, %v2977_v28 }
 0x435   : > { %v2983_v35 = vpop.permute.xlu1 %2982  ;;  %3173 = vrot.lane.b32.xlu0 %v3099_v11, %s4881_s17 }
 0x436   : > { %3068 = vst.msk [vmem:[#allocation5 + $0x58] sm:$0xff] %vm3056_vm0, %v2983_v35 }
 0x437   : > { %3175 = vrot.lane.b32.xlu1 %v3678_v9, %s4881_s17  ;;  %v2981_v4 = vpop.permute.xlu0 %2980 }
 0x438   : > { %3067 = vst.msk [vmem:[#allocation5 + $0x50] sm:$0xff] %vm3056_vm0, %v2981_v4 }
 0x439   : > { %v2987_v7 = vpop.permute.xlu1 %2986  ;;  %3942 = vrot.lane.b32.xlu0 %v6512_v49, %s4885_s24 }
 0x43a   : > { %3070 = vst.msk [vmem:[#allocation5 + $0x68] sm:$0xff] %vm3056_vm0, %v2987_v7  ;;  %v3687_v7 = vld [vmem:[#allocation4 + $0x109] sm:$0xff] }
 0x43b   : > { %3944 = vrot.lane.b32.xlu1 %v6508_v23, %s4885_s24  ;;  %v2985_v42 = vpop.permute.xlu0 %2984 }
 0x43c   : > { %3069 = vst.msk [vmem:[#allocation5 + $0x60] sm:$0xff] %vm3056_vm0, %v2985_v42 }
 0x43d   : > { %v2991_v55 = vpop.permute.xlu1 %2990  ;;  %3366 = vrot.lane.b32.xlu0 %v6512_v49, %s4882_s27 }
 0x43e   : > { %3072 = vst.msk [vmem:[#allocation5 + $0x78] sm:$0xff] %vm3056_vm0, %v2991_v55 }
 0x43f   : > { %3560 = vrot.lane.b32.xlu1 %v6365_v41, %s4883_s8  ;;  %v2989_v63 = vpop.permute.xlu0 %2988  ;;  %v3680_v41 = vld [vmem:[#allocation4 + $0xb1] sm:$0xff] }
 0x440   : > { %3071 = vst.msk [vmem:[#allocation5 + $0x70] sm:$0xff] %vm3056_vm0, %v2989_v63 }
 0x441   : > { %v2995_v44 = vpop.permute.xlu1 %2994  ;;  %3368 = vrot.lane.b32.xlu0 %v6508_v23, %s4882_s27 }
 0x442   : > { %3074 = vst.msk [vmem:[#allocation5 + $0x88] sm:$0xff] %vm3056_vm0, %v2995_v44 }
 0x443   : > { %3753 = vrot.lane.b32.xlu1 %v3679_v0, %s4884_s13  ;;  %v2993_v45 = vpop.permute.xlu0 %2992 }
 0x444   : > { %3073 = vst.msk [vmem:[#allocation5 + $0x80] sm:$0xff] %vm3056_vm0, %v2993_v45  ;;  %v3880_v45 = vld [vmem:[#allocation4 + $0x10a] sm:$0xff] }
 0x445   : > { %v2999_v49 = vpop.permute.xlu1 %2998  ;;  %3562 = vrot.lane.b32.xlu0 %v6360_v17, %s4883_s8 }
 0x446   : > { %3076 = vst.msk [vmem:[#allocation5 + $0x98] sm:$0xff] %vm3056_vm0, %v2999_v49  ;;  %v3881_v49 = vld [vmem:[#allocation4 + $0x112] sm:$0xff] }
 0x447   : > { %3755 = vrot.lane.b32.xlu1 %v3680_v41, %s4884_s13  ;;  %v2997_v57 = vpop.permute.xlu0 %2996 }
 0x448   : > { %3075 = vst.msk [vmem:[#allocation5 + $0x90] sm:$0xff] %vm3056_vm0, %v2997_v57 }
 0x449   : > { %v3003_v23 = vpop.permute.xlu1 %3002  ;;  %3177 = vrot.lane.b32.xlu0 %v3679_v0, %s4881_s17 }
 0x44a   : > { %3078 = vst.msk [vmem:[#allocation5 + $0xa8] sm:$0xff] %vm3056_vm0, %v3003_v23 }
 0x44b   : > { %3179 = vrot.lane.b32.xlu1 %v3680_v41, %s4881_s17  ;;  %v3001_v21 = vpop.permute.xlu0 %3000 }
 0x44c   : > { %3077 = vst.msk [vmem:[#allocation5 + $0xa0] sm:$0xff] %vm3056_vm0, %v3001_v21 }
 0x44d   : > { %v3007_v59 = vpop.permute.xlu1 %3006  ;;  %3946 = vrot.lane.b32.xlu0 %v6521_v39, %s4885_s24 }
 0x44e   : > { %3080 = vst.msk [vmem:[#allocation5 + $0xb8] sm:$0xff] %vm3056_vm0, %v3007_v59 }
 0x44f   : > { %3948 = vrot.lane.b32.xlu1 %v6516_v36, %s4885_s24  ;;  %v3005_v17 = vpop.permute.xlu0 %3004 }
 0x450   : > { %3079 = vst.msk [vmem:[#allocation5 + $0xb0] sm:$0xff] %vm3056_vm0, %v3005_v17 }
 0x451   : > { %v3011_v2 = vpop.permute.xlu1 %3010  ;;  %3370 = vrot.lane.b32.xlu0 %v6521_v39, %s4882_s27 }
 0x452   : > { %3082 = vst.msk [vmem:[#allocation5 + $0xc8] sm:$0xff] %vm3056_vm0, %v3011_v2  ;;  %v3689_v2 = vld [vmem:[#allocation4 + $0x121] sm:$0xff] }
 0x453   : > { %3564 = vrot.lane.b32.xlu1 %v6377_v26, %s4883_s8  ;;  %v3009_v5 = vpop.permute.xlu0 %3008  ;;  %v3682_v26 = vld [vmem:[#allocation4 + $0xc9] sm:$0xff] }
 0x454   : > { %3081 = vst.msk [vmem:[#allocation5 + $0xc0] sm:$0xff] %vm3056_vm0, %v3009_v5 }
 0x455   : > { %v3015_v34 = vpop.permute.xlu1 %3014  ;;  %3372 = vrot.lane.b32.xlu0 %v6516_v36, %s4882_s27 }
 0x456   : > { %3084 = vst.msk [vmem:[#allocation5 + $0xd8] sm:$0xff] %vm3056_vm0, %v3015_v34  ;;  %v3497_v34 = vld [vmem:[#allocation4 + $0x128] sm:$0xff] }
 0x457   : > { %3757 = vrot.lane.b32.xlu1 %v3681_v12, %s4884_s13  ;;  %v3013_v10 = vpop.permute.xlu0 %3012 }
 0x458   : > { %3083 = vst.msk [vmem:[#allocation5 + $0xd0] sm:$0xff] %vm3056_vm0, %v3013_v10 }
 0x459   : > { %v3158_v39 = vpop.permute.xlu1 %3157  ;;  %3566 = vrot.lane.b32.xlu0 %v6372_v29, %s4883_s8 }
 0x45a   : > { %3252 = vst.msk [vmem:[#allocation5 + $0x10] sm:$0xff] %vm3249_vm1, %v3158_v39 }
 0x45b   : > { %3759 = vrot.lane.b32.xlu1 %v3682_v26, %s4884_s13  ;;  %v3017_v43 = vpop.permute.xlu0 %3016 }
 0x45c   : > { %3085 = vst.msk [vmem:[#allocation5 + $0xe0] sm:$0xff] %vm3056_vm0, %v3017_v43  ;;  %v3882_v43 = vld [vmem:[#allocation4 + $0x122] sm:$0xff] }
 0x45d   : > { %v3351_v36 = vpop.permute.xlu1 %3350  ;;  %3181 = vrot.lane.b32.xlu0 %v3681_v12, %s4881_s17 }
 0x45e   : > { %3445 = vst.msk [vmem:[#allocation5 + $0x10] sm:$0xff] %vm3442_vm2, %v3351_v36 }
 0x45f   : > { %3183 = vrot.lane.b32.xlu1 %v3682_v26, %s4881_s17  ;;  %v3160_v22 = vpop.permute.xlu0 %3159 }
 0x460   : > { %3253 = vst.msk [vmem:[#allocation5 + $0x18] sm:$0xff] %vm3249_vm1, %v3160_v22  ;;  %v3883_v22 = vld [vmem:[#allocation4 + $0x12a] sm:$0xff] }
 0x461   : > { %v3545_v29 = vpop.permute.xlu1 %3544  ;;  %3950 = vrot.lane.b32.xlu0 %v6531_v58, %s4885_s24 }
 0x462   : > { %3639 = vst.msk [vmem:[#allocation5 + $0x10] sm:$0xff] %vm3636_vm3, %v3545_v29 }
 0x463   : > { %3952 = vrot.lane.b32.xlu1 %v6526_v54, %s4885_s24  ;;  %v3353_v14 = vpop.permute.xlu0 %3352 }
 0x464   : > { %3446 = vst.msk [vmem:[#allocation5 + $0x18] sm:$0xff] %vm3442_vm2, %v3353_v14 }
 0x465   : > { %v3738_v13 = vpop.permute.xlu1 %3737  ;;  %3374 = vrot.lane.b32.xlu0 %v6531_v58, %s4882_s27 }
 0x466   : > { %3832 = vst.msk [vmem:[#allocation5 + $0x10] sm:$0xff] %vm3829_vm4, %v3738_v13 }
 0x467   : > { %3568 = vrot.lane.b32.xlu1 %v6391_v19, %s4883_s8  ;;  %v3547_v33 = vpop.permute.xlu0 %3546  ;;  %v3684_v19 = vld [vmem:[#allocation4 + $0xe1] sm:$0xff] }
 0x468   : > { %3640 = vst.msk [vmem:[#allocation5 + $0x18] sm:$0xff] %vm3636_vm3, %v3547_v33 }
 0x469   : > { %v3740_v51 = vpop.permute.xlu1 %3739  ;;  %3376 = vrot.lane.b32.xlu0 %v6526_v54, %s4882_s27 }
 0x46a   : > { %3833 = vst.msk [vmem:[#allocation5 + $0x18] sm:$0xff] %vm3829_vm4, %v3740_v51  ;;  %v3498_v51 = vld [vmem:[#allocation4 + $0x138] sm:$0xff] }
 0x46b   : > { %3761 = vrot.lane.b32.xlu1 %v3683_v47, %s4884_s13  ;;  %v3162_v38 = vpop.permute.xlu0 %3161 }
 0x46c   : > { %3254 = vst.msk [vmem:[#allocation5 + $0x20] sm:$0xff] %vm3249_vm1, %v3162_v38 }
 0x46d   : > { %v3164_v58 = vpop.permute.xlu1 %3163  ;;  %3570 = vrot.lane.b32.xlu0 %v6385_v18, %s4883_s8  ;;  %v3876_v18 = vld [vmem:[#allocation4 + $0xda] sm:$0xff] }
 0x46e   : > { %3255 = vst.msk [vmem:[#allocation5 + $0x28] sm:$0xff] %vm3249_vm1, %v3164_v58  ;;  %v3691_v58 = vld [vmem:[#allocation4 + $0x139] sm:$0xff] }
 0x46f   : > { %3763 = vrot.lane.b32.xlu1 %v3684_v19, %s4884_s13  ;;  %v3931_v46 = vpop.permute.xlu0 %3930 }
 0x470   : > { %4025 = vst.msk [vmem:[#allocation5 + $0x10] sm:$0xff] %vm4022_vm5, %v3931_v46  ;;  %v3499_v46 = vld [vmem:[#allocation4 + $0x140] sm:$0xff] }
 0x471   : > { %v3933_v54 = vpop.permute.xlu1 %3932  ;;  %3185 = vrot.lane.b32.xlu0 %v3683_v47, %s4881_s17 }
 0x472   : > { %4026 = vst.msk [vmem:[#allocation5 + $0x18] sm:$0xff] %vm4022_vm5, %v3933_v54 }
 0x473   : > { %3187 = vrot.lane.b32.xlu1 %v3684_v19, %s4881_s17  ;;  %v3355_v1 = vpop.permute.xlu0 %3354 }
 0x474   : > { %3447 = vst.msk [vmem:[#allocation5 + $0x20] sm:$0xff] %vm3442_vm2, %v3355_v1  ;;  %v3692_v1 = vld [vmem:[#allocation4 + $0x141] sm:$0xff] }
 0x475   : > { %v3549_v32 = vpop.permute.xlu1 %3548  ;;  %3954 = vrot.lane.b32.xlu0 %v3876_v18, %s4885_s24 }
 0x476   : > { %3641 = vst.msk [vmem:[#allocation5 + $0x20] sm:$0xff] %vm3636_vm3, %v3549_v32 }
 0x477   : > { %3956 = vrot.lane.b32.xlu1 %v3877_v20, %s4885_s24  ;;  %v3357_v37 = vpop.permute.xlu0 %3356  ;;  %v4057_v25 = vld [vmem:[#allocation5 + $0x10] sm:$0xff] }
 0x478   : > { %3448 = vst.msk [vmem:[#allocation5 + $0x28] sm:$0xff] %vm3442_vm2, %v3357_v37  ;;  %4781 = vmatprep.mubr.msk.f32.mxu1 %vm4103_vm6, %v4057_v25  ;;  %v3884_v37 = vld [vmem:[#allocation4 + $0x13a] sm:$0xff] }
 0x479   : > { %v3742_v24 = vpop.permute.xlu1 %3741  ;;  %3378 = vrot.lane.b32.xlu0 %v3876_v18, %s4882_s27  ;;  %v4058_v62 = vld [vmem:[#allocation5 + $0x18] sm:$0xff] }
 0x47a   : > { %3834 = vst.msk [vmem:[#allocation5 + $0x20] sm:$0xff] %vm3829_vm4, %v3742_v24  ;;  %4782 = vmatmul.mubr.msk.f32.vlgmr.msra.gmra.mxu1 %vm4103_vm6, %v4058_v62  ;;  %v3885_v24 = vld [vmem:[#allocation4 + $0x142] sm:$0xff] }
 0x47b   : > { %3572 = vrot.lane.b32.xlu1 %v6405_v40, %s4883_s8  ;;  %v3551_v56 = vpop.permute.xlu0 %3550  ;;  %v3686_v40 = vld [vmem:[#allocation4 + $0xf9] sm:$0xff] }
 0x47c   : > { %3642 = vst.msk [vmem:[#allocation5 + $0x28] sm:$0xff] %vm3636_vm3, %v3551_v56 }
 0x47d   : > { %v3744_v3 = vpop.permute.xlu1 %3743  ;;  %3380 = vrot.lane.b32.xlu0 %v3877_v20, %s4882_s27 }
 0x47e   : > { %3835 = vst.msk [vmem:[#allocation5 + $0x28] sm:$0xff] %vm3829_vm4, %v3744_v3 }
 0x47f   : > { %3765 = vrot.lane.b32.xlu1 %v3685_v53, %s4884_s13  ;;  %v3166_v31 = vpop.permute.xlu0 %3165 }
 0x480   : > { %3256 = vst.msk [vmem:[#allocation5 + $0x30] sm:$0xff] %vm3249_vm1, %v3166_v31  ;;  %v3500_v31 = vld [vmem:[#allocation4 + $0x150] sm:$0xff] }
 0x481   : > { %v3168_v60 = vpop.permute.xlu1 %3167  ;;  %3574 = vrot.lane.b32.xlu0 %v6399_v50, %s4883_s8 }
 0x482   : > { %3257 = vst.msk [vmem:[#allocation5 + $0x38] sm:$0xff] %vm3249_vm1, %v3168_v60 }
 0x483   : > { %3767 = vrot.lane.b32.xlu1 %v3686_v40, %s4884_s13  ;;  %v3935_v30 = vpop.permute.xlu0 %3934 }
 0x484   : > { %4027 = vst.msk [vmem:[#allocation5 + $0x20] sm:$0xff] %vm4022_vm5, %v3935_v30  ;;  %v3693_v30 = vld [vmem:[#allocation4 + $0x151] sm:$0xff] }
 0x485   : > { %v3937_v61 = vpop.permute.xlu1 %3936  ;;  %3189 = vrot.lane.b32.xlu0 %v3685_v53, %s4881_s17 }
 0x486   : > { %4028 = vst.msk [vmem:[#allocation5 + $0x28] sm:$0xff] %vm4022_vm5, %v3937_v61 }
 0x487   : > { %3191 = vrot.lane.b32.xlu1 %v3686_v40, %s4881_s17  ;;  %v3359_v52 = vpop.permute.xlu0 %3358 }
 0x488   : > { %3449 = vst.msk [vmem:[#allocation5 + $0x30] sm:$0xff] %vm3442_vm2, %v3359_v52  ;;  %v3501_v52 = vld [vmem:[#allocation4 + $0x158] sm:$0xff] }
 0x489   : > { %v3553_v50 = vpop.permute.xlu1 %3552  ;;  %3958 = vrot.lane.b32.xlu0 %v3878_v48, %s4885_s24 }
 0x48a   : > { %3643 = vst.msk [vmem:[#allocation5 + $0x30] sm:$0xff] %vm3636_vm3, %v3553_v50  ;;  %v3694_v50 = vld [vmem:[#allocation4 + $0x159] sm:$0xff] }
 0x48b   : > { %3960 = vrot.lane.b32.xlu1 %v3879_v16, %s4885_s24  ;;  %v3361_v15 = vpop.permute.xlu0 %3360  ;;  %v4059_v9 = vld [vmem:[#allocation5 + $0x20] sm:$0xff] }
 0x48c   : > { %3450 = vst.msk [vmem:[#allocation5 + $0x38] sm:$0xff] %vm3442_vm2, %v3361_v15  ;;  %4784 = vmatprep.mubr.msk.f32.mxu1 %vm4103_vm6, %v4059_v9 }
 0x48d   : > { %v3746_v28 = vpop.permute.xlu1 %3745  ;;  %3382 = vrot.lane.b32.xlu0 %v3878_v48, %s4882_s27  ;;  %v4060_v11 = vld [vmem:[#allocation5 + $0x28] sm:$0xff] }
 0x48e   : > { %3836 = vst.msk [vmem:[#allocation5 + $0x30] sm:$0xff] %vm3829_vm4, %v3746_v28  ;;  %4785 = vmatmul.mubr.msk.f32.gmra.mxu1 %vm4103_vm6, %v4060_v11  ;;  %v3886_v28 = vld [vmem:[#allocation4 + $0x152] sm:$0xff] }
 0x48f   : > { %3576 = vrot.lane.b32.xlu1 %v6419_v8, %s4883_s8  ;;  %v3555_v35 = vpop.permute.xlu0 %3554  ;;  %v3688_v8 = vld [vmem:[#allocation4 + $0x111] sm:$0xff] }
 0x490   : > { %3644 = vst.msk [vmem:[#allocation5 + $0x38] sm:$0xff] %vm3636_vm3, %v3555_v35  ;;  %v3887_v35 = vld [vmem:[#allocation4 + $0x15a] sm:$0xff] }
 0x491   : > { %v3748_v4 = vpop.permute.xlu1 %3747  ;;  %3384 = vrot.lane.b32.xlu0 %v3879_v16, %s4882_s27 }
 0x492   : > { %3837 = vst.msk [vmem:[#allocation5 + $0x38] sm:$0xff] %vm3829_vm4, %v3748_v4 }
 0x493   : > { %3769 = vrot.lane.b32.xlu1 %v3687_v7, %s4884_s13  ;;  %v3170_v42 = vpop.permute.xlu0 %3169 }
 0x494   : > { %3258 = vst.msk [vmem:[#allocation5 + $0x40] sm:$0xff] %vm3249_vm1, %v3170_v42 }
 0x495   : > { %v3172_v55 = vpop.permute.xlu1 %3171  ;;  %3578 = vrot.lane.b32.xlu0 %v6413_v6, %s4883_s8 }
 0x496   : > { %3259 = vst.msk [vmem:[#allocation5 + $0x48] sm:$0xff] %vm3249_vm1, %v3172_v55 }
 0x497   : > { %3771 = vrot.lane.b32.xlu1 %v3688_v8, %s4884_s13  ;;  %v3939_v63 = vpop.permute.xlu0 %3938 }
 0x498   : > { %4029 = vst.msk [vmem:[#allocation5 + $0x30] sm:$0xff] %vm4022_vm5, %v3939_v63 }
 0x499   : > { %v3941_v44 = vpop.permute.xlu1 %3940  ;;  %3193 = vrot.lane.b32.xlu0 %v3687_v7, %s4881_s17 }
 0x49a   : > { %4030 = vst.msk [vmem:[#allocation5 + $0x38] sm:$0xff] %vm4022_vm5, %v3941_v44 }
 0x49b   : > { %3195 = vrot.lane.b32.xlu1 %v3688_v8, %s4881_s17  ;;  %v3363_v0 = vpop.permute.xlu0 %3362  ;;  %v3502_v8 = vld [vmem:[#allocation4 + $0x168] sm:$0xff] }
 0x49c   : > { %3451 = vst.msk [vmem:[#allocation5 + $0x40] sm:$0xff] %vm3442_vm2, %v3363_v0  ;;  %v3695_v0 = vld [vmem:[#allocation4 + $0x169] sm:$0xff] }
 0x49d   : > { %v3557_v6 = vpop.permute.xlu1 %3556  ;;  %3962 = vrot.lane.b32.xlu0 %v3880_v45, %s4885_s24 }
 0x49e   : > { %3645 = vst.msk [vmem:[#allocation5 + $0x40] sm:$0xff] %vm3636_vm3, %v3557_v6  ;;  %v3503_v6 = vld [vmem:[#allocation4 + $0x170] sm:$0xff] }
 0x49f   : > { %3964 = vrot.lane.b32.xlu1 %v3881_v49, %s4885_s24  ;;  %v3365_v41 = vpop.permute.xlu0 %3364  ;;  %v4061_v57 = vld [vmem:[#allocation5 + $0x30] sm:$0xff] }
 0x4a0   : > { %3452 = vst.msk [vmem:[#allocation5 + $0x48] sm:$0xff] %vm3442_vm2, %v3365_v41  ;;  %4787 = vmatprep.mubr.msk.f32.mxu1 %vm4103_vm6, %v4061_v57 }
 0x4a1   : > { %v3750_v23 = vpop.permute.xlu1 %3749  ;;  %3386 = vrot.lane.b32.xlu0 %v3880_v45, %s4882_s27  ;;  %v4062_v21 = vld [vmem:[#allocation5 + $0x38] sm:$0xff] }
 0x4a2   : > { %3838 = vst.msk [vmem:[#allocation5 + $0x40] sm:$0xff] %vm3829_vm4, %v3750_v23  ;;  %4788 = vmatmul.mubr.msk.f32.gmra.mxu1 %vm4103_vm6, %v4062_v21  ;;  %v3888_v23 = vld [vmem:[#allocation4 + $0x16a] sm:$0xff] }
 0x4a3   : > { %3580 = vrot.lane.b32.xlu1 %v6433_v27, %s4883_s8  ;;  %v3559_v59 = vpop.permute.xlu0 %3558  ;;  %v3690_v27 = vld [vmem:[#allocation4 + $0x129] sm:$0xff] }
 0x4a4   : > { %3646 = vst.msk [vmem:[#allocation5 + $0x48] sm:$0xff] %vm3636_vm3, %v3559_v59  ;;  %v3696_v59 = vld [vmem:[#allocation4 + $0x171] sm:$0xff] }
 0x4a5   : > { %v3752_v17 = vpop.permute.xlu1 %3751  ;;  %3388 = vrot.lane.b32.xlu0 %v3881_v49, %s4882_s27 }
 0x4a6   : > { %3839 = vst.msk [vmem:[#allocation5 + $0x48] sm:$0xff] %vm3829_vm4, %v3752_v17 }
 0x4a7   : > { %3773 = vrot.lane.b32.xlu1 %v3689_v2, %s4884_s13  ;;  %v3174_v5 = vpop.permute.xlu0 %3173 }
 0x4a8   : > { %3260 = vst.msk [vmem:[#allocation5 + $0x50] sm:$0xff] %vm3249_vm1, %v3174_v5 }
 0x4a9   : > { %v3176_v12 = vpop.permute.xlu1 %3175  ;;  %3582 = vrot.lane.b32.xlu0 %v3497_v34, %s4883_s8 }
 0x4aa   : > { %3261 = vst.msk [vmem:[#allocation5 + $0x58] sm:$0xff] %vm3249_vm1, %v3176_v12 }
 0x4ab   : > { %3775 = vrot.lane.b32.xlu1 %v3690_v27, %s4884_s13  ;;  %v3943_v10 = vpop.permute.xlu0 %3942 }
 0x4ac   : > { %4031 = vst.msk [vmem:[#allocation5 + $0x40] sm:$0xff] %vm4022_vm5, %v3943_v10 }
 0x4ad   : > { %v3945_v39 = vpop.permute.xlu1 %3944  ;;  %3197 = vrot.lane.b32.xlu0 %v3689_v2, %s4881_s17 }
 0x4ae   : > { %4032 = vst.msk [vmem:[#allocation5 + $0x48] sm:$0xff] %vm4022_vm5, %v3945_v39 }
 0x4af   : > { %3199 = vrot.lane.b32.xlu1 %v3690_v27, %s4881_s17  ;;  %v3367_v26 = vpop.permute.xlu0 %3366  ;;  %v3311_v27 = vld [vmem:[#allocation4 + $0x172] sm:$0xff] }
 0x4b0   : > { %3453 = vst.msk [vmem:[#allocation5 + $0x50] sm:$0xff] %vm3442_vm2, %v3367_v26  ;;  %v2926_v26 = vld [vmem:[#allocation4 + $0x180] sm:$0xff] }
 0x4b1   : > { %v3561_v36 = vpop.permute.xlu1 %3560  ;;  %3966 = vrot.lane.b32.xlu0 %v3882_v43, %s4885_s24 }
 0x4b2   : > { %3647 = vst.msk [vmem:[#allocation5 + $0x50] sm:$0xff] %vm3636_vm3, %v3561_v36 }
 0x4b3   : > { %3968 = vrot.lane.b32.xlu1 %v3883_v22, %s4885_s24  ;;  %v3369_v29 = vpop.permute.xlu0 %3368  ;;  %v4063_v14 = vld [vmem:[#allocation5 + $0x40] sm:$0xff] }
 0x4b4   : > { %3454 = vst.msk [vmem:[#allocation5 + $0x58] sm:$0xff] %vm3442_vm2, %v3369_v29  ;;  %4790 = vmatprep.mubr.msk.f32.mxu1 %vm4103_vm6, %v4063_v14  ;;  %v3505_v14 = vld [vmem:[#allocation4 + $0x188] sm:$0xff] }
 0x4b5   : > { %v3754_v13 = vpop.permute.xlu1 %3753  ;;  %3390 = vrot.lane.b32.xlu0 %v3882_v43, %s4882_s27  ;;  %v4064_v33 = vld [vmem:[#allocation5 + $0x48] sm:$0xff] }
 0x4b6   : > { %3840 = vst.msk [vmem:[#allocation5 + $0x50] sm:$0xff] %vm3829_vm4, %v3754_v13  ;;  %4791 = vmatmul.mubr.msk.f32.gmra.mxu1 %vm4103_vm6, %v4064_v33  ;;  %v3089_v33 = vld [vmem:[#allocation4 + $0x19] sm:$0xff] }
 0x4b7   : > { %3584 = vrot.lane.b32.xlu1 %v3498_v51, %s4883_s8  ;;  %v3563_v47 = vpop.permute.xlu0 %3562 }
 0x4b8   : > { %3648 = vst.msk [vmem:[#allocation5 + $0x58] sm:$0xff] %vm3636_vm3, %v3563_v47 }
 0x4b9   : > { %v3756_v38 = vpop.permute.xlu1 %3755  ;;  %3392 = vrot.lane.b32.xlu0 %v3883_v22, %s4882_s27  ;;  %v3697_v22 = vld [vmem:[#allocation4 + $0x181] sm:$0xff] }
 0x4ba   : > { %3841 = vst.msk [vmem:[#allocation5 + $0x58] sm:$0xff] %vm3829_vm4, %v3756_v38  ;;  %v3698_v38 = vld [vmem:[#allocation4 + $0x189] sm:$0xff] }
 0x4bb   : > { %3777 = vrot.lane.b32.xlu1 %v3691_v58, %s4884_s13  ;;  %v3178_v19 = vpop.permute.xlu0 %3177 }
 0x4bc   : > { %3262 = vst.msk [vmem:[#allocation5 + $0x60] sm:$0xff] %vm3249_vm1, %v3178_v19 }
 0x4bd   : > { %v3180_v54 = vpop.permute.xlu1 %3179  ;;  %3586 = vrot.lane.b32.xlu0 %v3499_v46, %s4883_s8 }
 0x4be   : > { %3263 = vst.msk [vmem:[#allocation5 + $0x68] sm:$0xff] %vm3249_vm1, %v3180_v54 }
 0x4bf   : > { %3779 = vrot.lane.b32.xlu1 %v3692_v1, %s4884_s13  ;;  %v3947_v18 = vpop.permute.xlu0 %3946 }
 0x4c0   : > { %4033 = vst.msk [vmem:[#allocation5 + $0x50] sm:$0xff] %vm4022_vm5, %v3947_v18 }
 0x4c1   : > { %v3949_v32 = vpop.permute.xlu1 %3948  ;;  %3201 = vrot.lane.b32.xlu0 %v3691_v58, %s4881_s17 }
 0x4c2   : > { %4034 = vst.msk [vmem:[#allocation5 + $0x58] sm:$0xff] %vm4022_vm5, %v3949_v32  ;;  %v3890_v32 = vld [vmem:[#allocation4 + $0x182] sm:$0xff] }
 0x4c3   : > { %3203 = vrot.lane.b32.xlu1 %v3692_v1, %s4881_s17  ;;  %v3371_v20 = vpop.permute.xlu0 %3370  ;;  %v3090_v1 = vld [vmem:[#allocation4 + $0x21] sm:$0xff] }
 0x4c4   : > { %3455 = vst.msk [vmem:[#allocation5 + $0x60] sm:$0xff] %vm3442_vm2, %v3371_v20 }
 0x4c5   : > { %v3565_v25 = vpop.permute.xlu1 %3564  ;;  %3970 = vrot.lane.b32.xlu0 %v3884_v37, %s4885_s24 }
 0x4c6   : > { %3649 = vst.msk [vmem:[#allocation5 + $0x60] sm:$0xff] %vm3636_vm3, %v3565_v25 }
 0x4c7   : > { %3972 = vrot.lane.b32.xlu1 %v3885_v24, %s4885_s24  ;;  %v3373_v62 = vpop.permute.xlu0 %3372  ;;  %v4065_v56 = vld [vmem:[#allocation5 + $0x50] sm:$0xff] }
 0x4c8   : > { %3456 = vst.msk [vmem:[#allocation5 + $0x68] sm:$0xff] %vm3442_vm2, %v3373_v62  ;;  %4793 = vmatprep.mubr.msk.f32.mxu1 %vm4103_vm6, %v4065_v56  ;;  %v3891_v62 = vld [vmem:[#allocation4 + $0x18a] sm:$0xff] }
 0x4c9   : > { %v3758_v3 = vpop.permute.xlu1 %3757  ;;  %3394 = vrot.lane.b32.xlu0 %v3884_v37, %s4882_s27  ;;  %v4066_v53 = vld [vmem:[#allocation5 + $0x58] sm:$0xff]  ;;  %v3282_v37 = vld [vmem:[#allocation4 + $0x1a] sm:$0xff] }
 0x4ca   : > { %3842 = vst.msk [vmem:[#allocation5 + $0x60] sm:$0xff] %vm3829_vm4, %v3758_v3  ;;  %4794 = vmatmul.mubr.msk.f32.gmra.mxu1 %vm4103_vm6, %v4066_v53 }
 0x4cb   : > { %3588 = vrot.lane.b32.xlu1 %v3500_v31, %s4883_s8  ;;  %v3567_v60 = vpop.permute.xlu0 %3566  ;;  %v3283_v31 = vld [vmem:[#allocation4 + $0x22] sm:$0xff] }
 0x4cc   : > { %3650 = vst.msk [vmem:[#allocation5 + $0x68] sm:$0xff] %vm3636_vm3, %v3567_v60  ;;  %v3506_v60 = vld [vmem:[#allocation4 + $0x198] sm:$0xff] }
 0x4cd   : > { %v3760_v40 = vpop.permute.xlu1 %3759  ;;  %3396 = vrot.lane.b32.xlu0 %v3885_v24, %s4882_s27 }
 0x4ce   : > { %3843 = vst.msk [vmem:[#allocation5 + $0x68] sm:$0xff] %vm3829_vm4, %v3760_v40 }
 0x4cf   : > { %3781 = vrot.lane.b32.xlu1 %v3693_v30, %s4884_s13  ;;  %v3182_v61 = vpop.permute.xlu0 %3181 }
 0x4d0   : > { %3264 = vst.msk [vmem:[#allocation5 + $0x70] sm:$0xff] %vm3249_vm1, %v3182_v61 }
 0x4d1   : > { %v3184_v48 = vpop.permute.xlu1 %3183  ;;  %3590 = vrot.lane.b32.xlu0 %v3501_v52, %s4883_s8  ;;  %v3476_v52 = vld [vmem:[#allocation4 + $0x30] sm:$0xff] }
 0x4d2   : > { %3265 = vst.msk [vmem:[#allocation5 + $0x78] sm:$0xff] %vm3249_vm1, %v3184_v48  ;;  %v3507_v48 = vld [vmem:[#allocation4 + $0x1a0] sm:$0xff] }
 0x4d3   : > { %3783 = vrot.lane.b32.xlu1 %v3694_v50, %s4884_s13  ;;  %v3951_v16 = vpop.permute.xlu0 %3950 }
 0x4d4   : > { %4035 = vst.msk [vmem:[#allocation5 + $0x60] sm:$0xff] %vm4022_vm5, %v3951_v16 }
 0x4d5   : > { %v3953_v15 = vpop.permute.xlu1 %3952  ;;  %3205 = vrot.lane.b32.xlu0 %v3693_v30, %s4881_s17 }
 0x4d6   : > { %4036 = vst.msk [vmem:[#allocation5 + $0x68] sm:$0xff] %vm4022_vm5, %v3953_v15 }
 0x4d7   : > { %3207 = vrot.lane.b32.xlu1 %v3694_v50, %s4881_s17  ;;  %v3375_v9 = vpop.permute.xlu0 %3374 }
 0x4d8   : > { %3457 = vst.msk [vmem:[#allocation5 + $0x70] sm:$0xff] %vm3442_vm2, %v3375_v9  ;;  %v3477_v9 = vld [vmem:[#allocation4 + $0x38] sm:$0xff] }
 0x4d9   : > { %v3569_v11 = vpop.permute.xlu1 %3568  ;;  %3974 = vrot.lane.b32.xlu0 %v3886_v28, %s4885_s24 }
 0x4da   : > { %3651 = vst.msk [vmem:[#allocation5 + $0x70] sm:$0xff] %vm3636_vm3, %v3569_v11 }
 0x4db   : > { %3976 = vrot.lane.b32.xlu1 %v3887_v35, %s4885_s24  ;;  %v3377_v4 = vpop.permute.xlu0 %3376  ;;  %v4067_v7 = vld [vmem:[#allocation5 + $0x60] sm:$0xff] }
 0x4dc   : > { %3458 = vst.msk [vmem:[#allocation5 + $0x78] sm:$0xff] %vm3442_vm2, %v3377_v4  ;;  %4796 = vmatprep.mubr.msk.f32.mxu1 %vm4103_vm6, %v4067_v7  ;;  %v3669_v4 = vld [vmem:[#allocation4 + $0x31] sm:$0xff]  ;;  %v3700_v7 = vld [vmem:[#allocation4 + $0x1a1] sm:$0xff] }
 0x4dd   : > { %v3762_v42 = vpop.permute.xlu1 %3761  ;;  %3398 = vrot.lane.b32.xlu0 %v3886_v28, %s4882_s27  ;;  %v4068_v55 = vld [vmem:[#allocation5 + $0x68] sm:$0xff] }
 0x4de   : > { %3844 = vst.msk [vmem:[#allocation5 + $0x70] sm:$0xff] %vm3829_vm4, %v3762_v42  ;;  %4797 = vmatmul.mubr.msk.f32.gmra.mxu1 %vm4103_vm6, %v4068_v55  ;;  %v3699_v28 = vld [vmem:[#allocation4 + $0x199] sm:$0xff] }
 0x4df   : > { %3592 = vrot.lane.b32.xlu1 %v3502_v8, %s4883_s8  ;;  %v3571_v63 = vpop.permute.xlu0 %3570  ;;  %v3670_v8 = vld [vmem:[#allocation4 + $0x39] sm:$0xff] }
 0x4e0   : > { %3652 = vst.msk [vmem:[#allocation5 + $0x78] sm:$0xff] %vm3636_vm3, %v3571_v63  ;;  %v3892_v63 = vld [vmem:[#allocation4 + $0x19a] sm:$0xff] }
 0x4e1   : > { %v3764_v44 = vpop.permute.xlu1 %3763  ;;  %3400 = vrot.lane.b32.xlu0 %v3887_v35, %s4882_s27 }
 0x4e2   : > { %3845 = vst.msk [vmem:[#allocation5 + $0x78] sm:$0xff] %vm3829_vm4, %v3764_v44 }
 0x4e3   : > { %3785 = vrot.lane.b32.xlu1 %v3695_v0, %s4884_s13  ;;  %v3186_v45 = vpop.permute.xlu0 %3185 }
 0x4e4   : > { %3266 = vst.msk [vmem:[#allocation5 + $0x80] sm:$0xff] %vm3249_vm1, %v3186_v45  ;;  %v3862_v45 = vld [vmem:[#allocation4 + $0x32] sm:$0xff] }
 0x4e5   : > { %v3188_v49 = vpop.permute.xlu1 %3187  ;;  %3594 = vrot.lane.b32.xlu0 %v3503_v6, %s4883_s8 }
 0x4e6   : > { %3267 = vst.msk [vmem:[#allocation5 + $0x88] sm:$0xff] %vm3249_vm1, %v3188_v49 }
 0x4e7   : > { %3209 = vrot.lane.b32.xlu1 %v3695_v0, %s4881_s17  ;;  %v3955_v41 = vpop.permute.xlu0 %3954 }
 0x4e8   : > { %4037 = vst.msk [vmem:[#allocation5 + $0x70] sm:$0xff] %vm4022_vm5, %v3955_v41 }
 0x4e9   : > { %v3957_v57 = vpop.permute.xlu1 %3956  ;;  %3018 = vrot.lane.b32.xlu0 %v3503_v6, %s4879_s30  ;;  %v3893_v6 = vld [vmem:[#allocation4 + $0x1a2] sm:$0xff] }
 0x4ea   : > { %4038 = vst.msk [vmem:[#allocation5 + $0x78] sm:$0xff] %vm4022_vm5, %v3957_v57 }
 0x4eb   : > { %3978 = vrot.lane.b32.xlu1 %v3888_v23, %s4885_s24  ;;  %v3379_v21 = vpop.permute.xlu0 %3378 }
 0x4ec   : > { %3459 = vst.msk [vmem:[#allocation5 + $0x80] sm:$0xff] %vm3442_vm2, %v3379_v21 }
 0x4ed   : > { %v3573_v17 = vpop.permute.xlu1 %3572  ;;  %3787 = vrot.lane.b32.xlu0 %v3696_v59, %s4884_s13 }
 0x4ee   : > { %3653 = vst.msk [vmem:[#allocation5 + $0x80] sm:$0xff] %vm3636_vm3, %v3573_v17 }
 0x4ef   : > { %3402 = vrot.lane.b32.xlu1 %v3888_v23, %s4882_s27  ;;  %v3381_v2 = vpop.permute.xlu0 %3380  ;;  %v4069_v5 = vld [vmem:[#allocation5 + $0x70] sm:$0xff] }
 0x4f0   : > { %3460 = vst.msk [vmem:[#allocation5 + $0x88] sm:$0xff] %vm3442_vm2, %v3381_v2  ;;  %4799 = vmatprep.mubr.msk.f32.mxu1 %vm4103_vm6, %v4069_v5  ;;  %v3863_v23 = vld [vmem:[#allocation4 + $0x3a] sm:$0xff] }
 0x4f1   : > { %v3766_v34 = vpop.permute.xlu1 %3765  ;;  %3211 = vrot.lane.b32.xlu0 %v3696_v59, %s4881_s17  ;;  %v4070_v12 = vld [vmem:[#allocation5 + $0x78] sm:$0xff] }
 0x4f2   : > { %3846 = vst.msk [vmem:[#allocation5 + $0x80] sm:$0xff] %vm3829_vm4, %v3766_v34  ;;  %4800 = vmatmul.mubr.msk.f32.gmra.mxu1 %vm4103_vm6, %v4070_v12 }
 0x4f3   : > { %3404 = vrot.lane.b32.xlu1 %v3311_v27, %s4882_s27  ;;  %v3575_v10 = vpop.permute.xlu0 %3574 }
 0x4f4   : > { %3654 = vst.msk [vmem:[#allocation5 + $0x88] sm:$0xff] %vm3636_vm3, %v3575_v10 }
 0x4f5   : > { %v3768_v39 = vpop.permute.xlu1 %3767  ;;  %3980 = vrot.lane.b32.xlu0 %v3311_v27, %s4885_s24  ;;  %v7083_v27 = vld [vmem:[%s7259_s4] ss:$0 sm:$0xff] }
 0x4f6   : > { %3847 = vst.msk [vmem:[#allocation5 + $0x88] sm:$0xff] %vm3829_vm4, %v3768_v39 }
 0x4f7   : > { %3020 = vrot.lane.b32.xlu1 %v2926_v26, %s4879_s30  ;;  %v3190_v43 = vpop.permute.xlu0 %3189 }
 0x4f8   : > { %3268 = vst.msk [vmem:[#allocation5 + $0x90] sm:$0xff] %vm3249_vm1, %v3190_v43 }
 0x4f9   : > { %v3192_v36 = vpop.permute.xlu1 %3191  ;;  %3596 = vrot.lane.b32.xlu0 %v2926_v26, %s4883_s8 }
 0x4fa   : > { %3269 = vst.msk [vmem:[#allocation5 + $0x98] sm:$0xff] %vm3249_vm1, %v3192_v36 }
 0x4fb   : > { %3789 = vrot.lane.b32.xlu1 %v3697_v22, %s4884_s13  ;;  %v3959_v29 = vpop.permute.xlu0 %3958 }
 0x4fc   : > { %4039 = vst.msk [vmem:[#allocation5 + $0x80] sm:$0xff] %vm4022_vm5, %v3959_v29 }
 0x4fd   : > { %v3961_v13 = vpop.permute.xlu1 %3960  ;;  %3598 = vrot.lane.b32.xlu0 %v3505_v14, %s4883_s8 }
 0x4fe   : > { %4040 = vst.msk [vmem:[#allocation5 + $0x88] sm:$0xff] %vm4022_vm5, %v3961_v13 }
 0x4ff   : > { %3153 = vrot.lane.b32.xlu1 %v3089_v33, %s4881_s17  ;;  %v3383_v51 = vpop.permute.xlu0 %3382 }
 0x500   : > { %3461 = vst.msk [vmem:[#allocation5 + $0x90] sm:$0xff] %vm3442_vm2, %v3383_v51 }
 0x501   : > { %v3577_v47 = vpop.permute.xlu1 %3576  ;;  %3022 = vrot.lane.b32.xlu0 %v3505_v14, %s4879_s30 }
 0x502   : > { %3655 = vst.msk [vmem:[#allocation5 + $0x90] sm:$0xff] %vm3636_vm3, %v3577_v47 }
 0x503   : > { %3791 = vrot.lane.b32.xlu1 %v3698_v38, %s4884_s13  ;;  %v3385_v58 = vpop.permute.xlu0 %3384  ;;  %v4071_v19 = vld [vmem:[#allocation5 + $0x80] sm:$0xff] }
 0x504   : > { %3462 = vst.msk [vmem:[#allocation5 + $0x98] sm:$0xff] %vm3442_vm2, %v3385_v58  ;;  %4802 = vmatprep.mubr.msk.f32.mxu1 %vm4103_vm6, %v4071_v19 }
 0x505   : > { %v3770_v46 = vpop.permute.xlu1 %3769  ;;  %3213 = vrot.lane.b32.xlu0 %v3697_v22, %s4881_s17  ;;  %v4072_v54 = vld [vmem:[#allocation5 + $0x88] sm:$0xff] }
 0x506   : > { %3848 = vst.msk [vmem:[#allocation5 + $0x90] sm:$0xff] %vm3829_vm4, %v3770_v46  ;;  %4803 = vmatmul.mubr.msk.f32.gmra.mxu1 %vm4103_vm6, %v4072_v54 }
 0x507   : > { %3155 = vrot.lane.b32.xlu1 %v3090_v1, %s4881_s17  ;;  %v3579_v18 = vpop.permute.xlu0 %3578 }
 0x508   : > { %3656 = vst.msk [vmem:[#allocation5 + $0x98] sm:$0xff] %vm3636_vm3, %v3579_v18 }
 0x509   : > { %v3772_v20 = vpop.permute.xlu1 %3771  ;;  %3982 = vrot.lane.b32.xlu0 %v3890_v32, %s4885_s24 }
 0x50a   : > { %3849 = vst.msk [vmem:[#allocation5 + $0x98] sm:$0xff] %vm3829_vm4, %v3772_v20 }
 0x50b   : > { %3346 = vrot.lane.b32.xlu1 %v3282_v37, %s4882_s27  ;;  %v3194_v25 = vpop.permute.xlu0 %3193 }
 0x50c   : > { %3270 = vst.msk [vmem:[#allocation5 + $0xa0] sm:$0xff] %vm3249_vm1, %v3194_v25 }
 0x50d   : > { %v3196_v24 = vpop.permute.xlu1 %3195  ;;  %3215 = vrot.lane.b32.xlu0 %v3698_v38, %s4881_s17 }
 0x50e   : > { %3271 = vst.msk [vmem:[#allocation5 + $0xa8] sm:$0xff] %vm3249_vm1, %v3196_v24 }
 0x50f   : > { %3984 = vrot.lane.b32.xlu1 %v3891_v62, %s4885_s24  ;;  %v3963_v56 = vpop.permute.xlu0 %3962 }
 0x510   : > { %4041 = vst.msk [vmem:[#allocation5 + $0x90] sm:$0xff] %vm4022_vm5, %v3963_v56 }
 0x511   : > { %v3965_v3 = vpop.permute.xlu1 %3964  ;;  %3406 = vrot.lane.b32.xlu0 %v3890_v32, %s4882_s27 }
 0x512   : > { %4042 = vst.msk [vmem:[#allocation5 + $0x98] sm:$0xff] %vm4022_vm5, %v3965_v3 }
 0x513   : > { %3408 = vrot.lane.b32.xlu1 %v3891_v62, %s4882_s27  ;;  %v3387_v53 = vpop.permute.xlu0 %3386 }
 0x514   : > { %3463 = vst.msk [vmem:[#allocation5 + $0xa0] sm:$0xff] %vm3442_vm2, %v3387_v53 }
 0x515   : > { %v3581_v40 = vpop.permute.xlu1 %3580  ;;  %3348 = vrot.lane.b32.xlu0 %v3283_v31, %s4882_s27  ;;  %s7092_s27 = scalar_lea.vmem %s7260_s5, %s4622_s21 }
 0x516   : > { %3657 = vst.msk [vmem:[#allocation5 + $0xa0] sm:$0xff] %vm3636_vm3, %v3581_v40 }
 0x517   : > { %3600 = vrot.lane.b32.xlu1 %v3506_v60, %s4883_s8  ;;  %v3389_v30 = vpop.permute.xlu0 %3388  ;;  %v4073_v61 = vld [vmem:[#allocation5 + $0x90] sm:$0xff] }
 0x518   : > { %3464 = vst.msk [vmem:[#allocation5 + $0xa8] sm:$0xff] %vm3442_vm2, %v3389_v30  ;;  %4805 = vmatprep.mubr.msk.f32.mxu1 %vm4103_vm6, %v4073_v61 }
 0x519   : > { %v3774_v50 = vpop.permute.xlu1 %3773  ;;  %3540 = vrot.lane.b32.xlu0 %v3476_v52, %s4883_s8  ;;  %v4074_v16 = vld [vmem:[#allocation5 + $0x98] sm:$0xff] }
 0x51a   : > { %3850 = vst.msk [vmem:[#allocation5 + $0xa0] sm:$0xff] %vm3829_vm4, %v3774_v50  ;;  %4806 = vmatmul.mubr.msk.f32.gmra.mxu1 %vm4103_vm6, %v4074_v16 }
 0x51b   : > { %3602 = vrot.lane.b32.xlu1 %v3507_v48, %s4883_s8  ;;  %v3583_v15 = vpop.permute.xlu0 %3582 }
 0x51c   : > { %3658 = vst.msk [vmem:[#allocation5 + $0xa8] sm:$0xff] %vm3636_vm3, %v3583_v15 }
 0x51d   : > { %v3776_v11 = vpop.permute.xlu1 %3775  ;;  %3542 = vrot.lane.b32.xlu0 %v3477_v9, %s4883_s8 }
 0x51e   : > { %3851 = vst.msk [vmem:[#allocation5 + $0xa8] sm:$0xff] %vm3829_vm4, %v3776_v11 }
 0x51f   : > { %3793 = vrot.lane.b32.xlu1 %v3699_v28, %s4884_s13  ;;  %v3198_v35 = vpop.permute.xlu0 %3197 }
 0x520   : > { %3272 = vst.msk [vmem:[#allocation5 + $0xb0] sm:$0xff] %vm3249_vm1, %v3198_v35 }
 0x521   : > { %v3200_v42 = vpop.permute.xlu1 %3199  ;;  %3733 = vrot.lane.b32.xlu0 %v3669_v4, %s4884_s13 }
 0x522   : > { %3273 = vst.msk [vmem:[#allocation5 + $0xb8] sm:$0xff] %vm3249_vm1, %v3200_v42 }
 0x523   : > { %3795 = vrot.lane.b32.xlu1 %v3700_v7, %s4884_s13  ;;  %v3967_v55 = vpop.permute.xlu0 %3966 }
 0x524   : > { %4043 = vst.msk [vmem:[#allocation5 + $0xa0] sm:$0xff] %vm4022_vm5, %v3967_v55 }
 0x525   : > { %v3969_v44 = vpop.permute.xlu1 %3968  ;;  %3735 = vrot.lane.b32.xlu0 %v3670_v8, %s4884_s13 }
 0x526   : > { %4044 = vst.msk [vmem:[#allocation5 + $0xa8] sm:$0xff] %vm4022_vm5, %v3969_v44 }
 0x527   : > { %3986 = vrot.lane.b32.xlu1 %v3892_v63, %s4885_s24  ;;  %v3391_v0 = vpop.permute.xlu0 %3390 }
 0x528   : > { %3465 = vst.msk [vmem:[#allocation5 + $0xb0] sm:$0xff] %vm3442_vm2, %v3391_v0 }
 0x529   : > { %v3585_v49 = vpop.permute.xlu1 %3584  ;;  %3926 = vrot.lane.b32.xlu0 %v3862_v45, %s4885_s24 }
 0x52a   : > { %3659 = vst.msk [vmem:[#allocation5 + $0xb0] sm:$0xff] %vm3636_vm3, %v3585_v49 }
 0x52b   : > { %3988 = vrot.lane.b32.xlu1 %v3893_v6, %s4885_s24  ;;  %v3393_v41 = vpop.permute.xlu0 %3392  ;;  %v4075_v57 = vld [vmem:[#allocation5 + $0xa0] sm:$0xff] }
 0x52c   : > { %3466 = vst.msk [vmem:[#allocation5 + $0xb8] sm:$0xff] %vm3442_vm2, %v3393_v41  ;;  %4808 = vmatprep.mubr.msk.f32.mxu1 %vm4103_vm6, %v4075_v57 }
 0x52d   : > { %v3778_v21 = vpop.permute.xlu1 %3777  ;;  %3928 = vrot.lane.b32.xlu0 %v3863_v23, %s4885_s24  ;;  %v4076_v59 = vld [vmem:[#allocation5 + $0xa8] sm:$0xff] }
 0x52e   : > { %3852 = vst.msk [vmem:[#allocation5 + $0xb0] sm:$0xff] %vm3829_vm4, %v3778_v21  ;;  %4809 = vmatmul.mubr.msk.f32.gmra.mxu1 %vm4103_vm6, %v4076_v59 }
 0x52f   : > { %v3587_v17 = vpop.permute.xlu0 %3586 }
 0x530   : > { %3660 = vst.msk [vmem:[#allocation5 + $0xb8] sm:$0xff] %vm3636_vm3, %v3587_v17 }
 0x531   : > { %v3780_v2 = vpop.permute.xlu1 %3779 }
 0x532   : > { %3853 = vst.msk [vmem:[#allocation5 + $0xb8] sm:$0xff] %vm3829_vm4, %v3780_v2 }
 0x533   : > { %v3202_v5 = vpop.permute.xlu0 %3201 }
 0x534   : > { %3274 = vst.msk [vmem:[#allocation5 + $0xc0] sm:$0xff] %vm3249_vm1, %v3202_v5 }
 0x535   : > { %v3204_v34 = vpop.permute.xlu1 %3203 }
 0x536   : > { %3275 = vst.msk [vmem:[#allocation5 + $0xc8] sm:$0xff] %vm3249_vm1, %v3204_v34 }
 0x537   : > { %v3971_v12 = vpop.permute.xlu0 %3970 }
 0x538   : > { %4045 = vst.msk [vmem:[#allocation5 + $0xb0] sm:$0xff] %vm4022_vm5, %v3971_v12 }
 0x539   : > { %v3973_v10 = vpop.permute.xlu1 %3972 }
 0x53a   : > { %4046 = vst.msk [vmem:[#allocation5 + $0xb8] sm:$0xff] %vm4022_vm5, %v3973_v10  ;;  %v4783_v39 = vpop.f32.mrf.mxu1 }
 0x53b   : > { %v4282_v26 = vadd.f32 %v4783_v39, %v7083_v27  ;;  %v3395_v43 = vpop.permute.xlu0 %3394 }
 0x53c   : > { %3467 = vst.msk [vmem:[#allocation5 + $0xc0] sm:$0xff] %vm3442_vm2, %v3395_v43  ;;  %v4276_v36 = vpop.f32.mrf.mxu1 }
 0x53d   : > { %v4428_v22 = vmax.f32 %v4282_v26, 0.0  ;;  %v4277_v29 = vadd.f32 %v7083_v27, %v4276_v36  ;;  %v3589_v14 = vpop.permute.xlu1 %3588 }
 0x53e   : > { %3661 = vst.msk [vmem:[#allocation5 + $0xc0] sm:$0xff] %vm3636_vm3, %v3589_v14 }
 0x53f   : > { %4460 = vst.msk [vmem:[%s7092_s27 + $0x18] sm:$0xff] %vm2357_vm12, %v4428_v22  ;;  %v4427_v13 = vmax.f32 %v4277_v29, 0.0  ;;  %v3397_v33 = vpop.permute.xlu0 %3396  ;;  %v4077_v51 = vld [vmem:[#allocation5 + $0xb0] sm:$0xff] }
 0x540   : > { %3468 = vst.msk [vmem:[#allocation5 + $0xc8] sm:$0xff] %vm3442_vm2, %v3397_v33  ;;  %4811 = vmatprep.mubr.msk.f32.mxu1 %vm4103_vm6, %v4077_v51 }
 0x541   : > { %4459 = vst.msk [vmem:[%s7092_s27 + $0x10] sm:$0xff] %vm2357_vm12, %v4427_v13  ;;  %v3782_v47 = vpop.permute.xlu1 %3781  ;;  %v4078_v38 = vld [vmem:[#allocation5 + $0xb8] sm:$0xff] }
 0x542   : > { %3854 = vst.msk [vmem:[#allocation5 + $0xc0] sm:$0xff] %vm3829_vm4, %v3782_v47  ;;  %4812 = vmatmul.mubr.msk.f32.gmra.mxu1 %vm4103_vm6, %v4078_v38 }
 0x543   : > { %v3591_v58 = vpop.permute.xlu0 %3590 }
 0x544   : > { %3662 = vst.msk [vmem:[#allocation5 + $0xc8] sm:$0xff] %vm3636_vm3, %v3591_v58 }
 0x545   : > { %v3784_v19 = vpop.permute.xlu1 %3783 }
 0x546   : > { %3855 = vst.msk [vmem:[#allocation5 + $0xc8] sm:$0xff] %vm3829_vm4, %v3784_v19 }
 0x547   : > { %v3206_v46 = vpop.permute.xlu0 %3205 }
 0x548   : > { %3276 = vst.msk [vmem:[#allocation5 + $0xd0] sm:$0xff] %vm3249_vm1, %v3206_v46 }
 0x549   : > { %v3208_v54 = vpop.permute.xlu1 %3207 }
 0x54a   : > { %3277 = vst.msk [vmem:[#allocation5 + $0xd8] sm:$0xff] %vm3249_vm1, %v3208_v54 }
 0x54b   : > { %v3975_v1 = vpop.permute.xlu0 %3974 }
 0x54c   : > { %4047 = vst.msk [vmem:[#allocation5 + $0xc0] sm:$0xff] %vm4022_vm5, %v3975_v1 }
 0x54d   : > { %v3977_v18 = vpop.permute.xlu1 %3976 }
 0x54e   : > { %4048 = vst.msk [vmem:[#allocation5 + $0xc8] sm:$0xff] %vm4022_vm5, %v3977_v18  ;;  %v4786_v32 = vpop.f32.mrf.mxu1 }
 0x54f   : > { %v4292_v20 = vadd.f32 %v4786_v32, %v7083_v27  ;;  %v3399_v37 = vpop.permute.xlu0 %3398 }
 0x550   : > { %3469 = vst.msk [vmem:[#allocation5 + $0xd0] sm:$0xff] %vm3442_vm2, %v3399_v37  ;;  %v4286_v25 = vpop.f32.mrf.mxu1 }
 0x551   : > { %v4430_v24 = vmax.f32 %v4292_v20, 0.0  ;;  %v4287_v62 = vadd.f32 %v7083_v27, %v4286_v25  ;;  %v3593_v56 = vpop.permute.xlu1 %3592 }
 0x552   : > { %3663 = vst.msk [vmem:[#allocation5 + $0xd0] sm:$0xff] %vm3636_vm3, %v3593_v56 }
 0x553   : > { %4462 = vst.msk [vmem:[%s7092_s27 + $0x28] sm:$0xff] %vm2357_vm12, %v4430_v24  ;;  %v4429_v3 = vmax.f32 %v4287_v62, 0.0  ;;  %v3401_v53 = vpop.permute.xlu0 %3400  ;;  %v4079_v31 = vld [vmem:[#allocation5 + $0xc0] sm:$0xff] }
 0x554   : > { %3470 = vst.msk [vmem:[#allocation5 + $0xd8] sm:$0xff] %vm3442_vm2, %v3401_v53  ;;  %4814 = vmatprep.mubr.msk.f32.mxu1 %vm4103_vm6, %v4079_v31 }
 0x555   : > { %4461 = vst.msk [vmem:[%s7092_s27 + $0x20] sm:$0xff] %vm2357_vm12, %v4429_v3  ;;  %v3786_v60 = vpop.permute.xlu1 %3785  ;;  %v4080_v40 = vld [vmem:[#allocation5 + $0xc8] sm:$0xff] }
 0x556   : > { %3856 = vst.msk [vmem:[#allocation5 + $0xd0] sm:$0xff] %vm3829_vm4, %v3786_v60  ;;  %4815 = vmatmul.mubr.msk.f32.gmra.mxu1 %vm4103_vm6, %v4080_v40 }
 0x557   : > { %v3595_v30 = vpop.permute.xlu0 %3594 }
 0x558   : > { %3664 = vst.msk [vmem:[#allocation5 + $0xd8] sm:$0xff] %vm3636_vm3, %v3595_v30 }
 0x559   : > { %v3210_v61 = vpop.permute.xlu1 %3209 }
 0x55a   : > { %3278 = vst.msk [vmem:[#allocation5 + $0xe0] sm:$0xff] %vm3249_vm1, %v3210_v61 }
 0x55b   : > { %v3019_v52 = vpop.permute.xlu0 %3018 }
 0x55c   : > { %3086 = vst.msk [vmem:[#allocation5 + $0xe8] sm:$0xff] %vm3056_vm0, %v3019_v52 }
 0x55d   : > { %v3979_v48 = vpop.permute.xlu1 %3978 }
 0x55e   : > { %4049 = vst.msk [vmem:[#allocation5 + $0xd0] sm:$0xff] %vm4022_vm5, %v3979_v48 }
 0x55f   : > { %v3788_v50 = vpop.permute.xlu0 %3787 }
 0x560   : > { %3857 = vst.msk [vmem:[#allocation5 + $0xd8] sm:$0xff] %vm3829_vm4, %v3788_v50 }
 0x561   : > { %v3403_v16 = vpop.permute.xlu1 %3402 }
 0x562   : > { %3471 = vst.msk [vmem:[#allocation5 + $0xe0] sm:$0xff] %vm3442_vm2, %v3403_v16  ;;  %v4789_v15 = vpop.f32.mrf.mxu1 }
 0x563   : > { %v4302_v9 = vadd.f32 %v4789_v15, %v7083_v27  ;;  %v3212_v28 = vpop.permute.xlu0 %3211 }
 0x564   : > { %3279 = vst.msk [vmem:[#allocation5 + $0xe8] sm:$0xff] %vm3249_vm1, %v3212_v28  ;;  %v4296_v11 = vpop.f32.mrf.mxu1 }
 0x565   : > { %v4432_v35 = vmax.f32 %v4302_v9, 0.0  ;;  %v4297_v4 = vadd.f32 %v7083_v27, %v4296_v11  ;;  %v3405_v7 = vpop.permute.xlu1 %3404  ;;  %v4081_v42 = vld [vmem:[#allocation5 + $0xd0] sm:$0xff] }
 0x566   : > { %3472 = vst.msk [vmem:[#allocation5 + $0xe8] sm:$0xff] %vm3442_vm2, %v3405_v7  ;;  %4817 = vmatprep.mubr.msk.f32.mxu1 %vm4103_vm6, %v4081_v42 }
 0x567   : > { %4464 = vst.msk [vmem:[%s7092_s27 + $0x38] sm:$0xff] %vm2357_vm12, %v4432_v35  ;;  %v4431_v55 = vmax.f32 %v4297_v4, 0.0  ;;  %v3981_v8 = vpop.permute.xlu0 %3980 }
 0x568   : > { %4050 = vst.msk [vmem:[#allocation5 + $0xd8] sm:$0xff] %vm4022_vm5, %v3981_v8 }
 0x569   : > { %4463 = vst.msk [vmem:[%s7092_s27 + $0x30] sm:$0xff] %vm2357_vm12, %v4431_v55  ;;  %v3021_v63 = vpop.permute.xlu1 %3020 }
 0x56a   : > { %3087 = vst.msk [vmem:[#allocation5 + $0xf0] sm:$0xff] %vm3056_vm0, %v3021_v63 }
 0x56b   : > { %v3597_v44 = vpop.permute.xlu0 %3596 }
 0x56c   : > { %3665 = vst.msk [vmem:[#allocation5 + $0xe0] sm:$0xff] %vm3636_vm3, %v3597_v44 }
 0x56d   : > { %v3790_v0 = vpop.permute.xlu1 %3789 }
 0x56e   : > { %3858 = vst.msk [vmem:[#allocation5 + $0xe0] sm:$0xff] %vm3829_vm4, %v3790_v0 }
 0x56f   : > { %v3599_v45 = vpop.permute.xlu0 %3598  ;;  %v4082_v6 = vld [vmem:[#allocation5 + $0xd8] sm:$0xff] }
 0x570   : > { %3666 = vst.msk [vmem:[#allocation5 + $0xe8] sm:$0xff] %vm3636_vm3, %v3599_v45  ;;  %4818 = vmatmul.mubr.msk.f32.gmra.mxu1 %vm4103_vm6, %v4082_v6 }
 0x571   : > { %v3154_v49 = vpop.permute.xlu1 %3153 }
 0x572   : > { %3250 = vst.msk [vmem:[#allocation5] sm:$0xff] %vm3249_vm1, %v3154_v49 }
 0x573   : > { %v3023_v41 = vpop.permute.xlu0 %3022 }
 0x574   : > { %3088 = vst.msk [vmem:[#allocation5 + $0xf8] sm:$0xff] %vm3056_vm0, %v3023_v41 }
 0x575   : > { %v3792_v57 = vpop.permute.xlu1 %3791 }
 0x576   : > { %3859 = vst.msk [vmem:[#allocation5 + $0xe8] sm:$0xff] %vm3829_vm4, %v3792_v57  ;;  %v4792_v23 = vpop.f32.mrf.mxu1 }
 0x577   : > { %v4312_v21 = vadd.f32 %v4792_v23, %v7083_v27  ;;  %v3214_v59 = vpop.permute.xlu0 %3213 }
 0x578   : > { %3280 = vst.msk [vmem:[#allocation5 + $0xf0] sm:$0xff] %vm3249_vm1, %v3214_v59  ;;  %v4306_v17 = vpop.f32.mrf.mxu1 }
 0x579   : > { %v4434_v2 = vmax.f32 %v4312_v21, 0.0  ;;  %v4307_v5 = vadd.f32 %v7083_v27, %v4306_v17  ;;  %v3156_v34 = vpop.permute.xlu1 %3155 }
 0x57a   : > { %3251 = vst.msk [vmem:[#allocation5 + $0x8] sm:$0xff] %vm3249_vm1, %v3156_v34 }
 0x57b   : > { %4466 = vst.msk [vmem:[%s7092_s27 + $0x48] sm:$0xff] %vm2357_vm12, %v4434_v2  ;;  %v4433_v12 = vmax.f32 %v4307_v5, 0.0  ;;  %v3983_v10 = vpop.permute.xlu0 %3982 }
 0x57c   : > { %4051 = vst.msk [vmem:[#allocation5 + $0xe0] sm:$0xff] %vm4022_vm5, %v3983_v10 }
 0x57d   : > { %4465 = vst.msk [vmem:[%s7092_s27 + $0x40] sm:$0xff] %vm2357_vm12, %v4433_v12  ;;  %v3347_v39 = vpop.permute.xlu1 %3346 }
 0x57e   : > { %3443 = vst.msk [vmem:[#allocation5] sm:$0xff] %vm3442_vm2, %v3347_v39 }
 0x57f   : > { %v3216_v26 = vpop.permute.xlu0 %3215 }
 0x580   : > { %3281 = vst.msk [vmem:[#allocation5 + $0xf8] sm:$0xff] %vm3249_vm1, %v3216_v26 }
 0x581   : > { %v3985_v43 = vpop.permute.xlu1 %3984 }
 0x582   : > { %4052 = vst.msk [vmem:[#allocation5 + $0xe8] sm:$0xff] %vm4022_vm5, %v3985_v43 }
 0x583   : > { %v3407_v36 = vpop.permute.xlu0 %3406  ;;  %v4083_v22 = vld [vmem:[#allocation5 + $0xe0] sm:$0xff] }
 0x584   : > { %3473 = vst.msk [vmem:[#allocation5 + $0xf0] sm:$0xff] %vm3442_vm2, %v3407_v36  ;;  %4820 = vmatprep.mubr.msk.f32.mxu1 %vm4103_vm6, %v4083_v22 }
 0x585   : > { %v3409_v29 = vpop.permute.xlu1 %3408 }
 0x586   : > { %3474 = vst.msk [vmem:[#allocation5 + $0xf8] sm:$0xff] %vm3442_vm2, %v3409_v29 }
 0x587   : > { %v3349_v14 = vpop.permute.xlu0 %3348 }
 0x588   : > { %3444 = vst.msk [vmem:[#allocation5 + $0x8] sm:$0xff] %vm3442_vm2, %v3349_v14 }
 0x589   : > { %v3601_v13 = vpop.permute.xlu1 %3600  ;;  %v4084_v33 = vld [vmem:[#allocation5 + $0xe8] sm:$0xff] }
 0x58a   : > { %3667 = vst.msk [vmem:[#allocation5 + $0xf0] sm:$0xff] %vm3636_vm3, %v3601_v13  ;;  %v4795_v51 = vpop.f32.mrf.mxu1  ;;  %4821 = vmatmul.mubr.msk.f32.gmra.mxu1 %vm4103_vm6, %v4084_v33 }
 0x58b   : > { %v4322_v47 = vadd.f32 %v4795_v51, %v7083_v27  ;;  %v3541_v38 = vpop.permute.xlu0 %3540 }
 0x58c   : > { %3637 = vst.msk [vmem:[#allocation5] sm:$0xff] %vm3636_vm3, %v3541_v38  ;;  %v4316_v58 = vpop.f32.mrf.mxu1 }
 0x58d   : > { %v4436_v19 = vmax.f32 %v4322_v47, 0.0  ;;  %v4317_v46 = vadd.f32 %v7083_v27, %v4316_v58  ;;  %v3603_v54 = vpop.permute.xlu1 %3602 }
 0x58e   : > { %3668 = vst.msk [vmem:[#allocation5 + $0xf8] sm:$0xff] %vm3636_vm3, %v3603_v54 }
 0x58f   : > { %4468 = vst.msk [vmem:[%s7092_s27 + $0x58] sm:$0xff] %vm2357_vm12, %v4436_v19  ;;  %v4435_v1 = vmax.f32 %v4317_v46, 0.0  ;;  %v3543_v18 = vpop.permute.xlu0 %3542 }
 0x590   : > { %3638 = vst.msk [vmem:[#allocation5 + $0x8] sm:$0xff] %vm3636_vm3, %v3543_v18 }
 0x591   : > { %4467 = vst.msk [vmem:[%s7092_s27 + $0x50] sm:$0xff] %vm2357_vm12, %v4435_v1  ;;  %v3794_v32 = vpop.permute.xlu1 %3793 }
 0x592   : > { %3860 = vst.msk [vmem:[#allocation5 + $0xf0] sm:$0xff] %vm3829_vm4, %v3794_v32 }
 0x593   : > { %v3734_v20 = vpop.permute.xlu0 %3733 }
 0x594   : > { %3830 = vst.msk [vmem:[#allocation5] sm:$0xff] %vm3829_vm4, %v3734_v20 }
 0x595   : > { %v3796_v37 = vpop.permute.xlu1 %3795 }
 0x596   : > { %3861 = vst.msk [vmem:[#allocation5 + $0xf8] sm:$0xff] %vm3829_vm4, %v3796_v37 }
 0x597   : > { %v3736_v25 = vpop.permute.xlu0 %3735 }
 0x598   : > { %3831 = vst.msk [vmem:[#allocation5 + $0x8] sm:$0xff] %vm3829_vm4, %v3736_v25 }
 0x599   : > { %v3987_v24 = vpop.permute.xlu1 %3986 }
 0x59a   : > { %4053 = vst.msk [vmem:[#allocation5 + $0xf0] sm:$0xff] %vm4022_vm5, %v3987_v24 }
 0x59b   : > { %v3927_v62 = vpop.permute.xlu0 %3926 }
 0x59c   : > { %4023 = vst.msk [vmem:[#allocation5] sm:$0xff] %vm4022_vm5, %v3927_v62 }
 0x59d   : > { %v3989_v56 = vpop.permute.xlu1 %3988 }
 0x59e   : > { %4054 = vst.msk [vmem:[#allocation5 + $0xf8] sm:$0xff] %vm4022_vm5, %v3989_v56  ;;  %v4798_v3 = vpop.f32.mrf.mxu1 }
 0x59f   : > { %v4332_v53 = vadd.f32 %v4798_v3, %v7083_v27  ;;  %v3929_v31 = vpop.permute.xlu0 %3928 }
 0x5a0   : > { %4024 = vst.msk [vmem:[#allocation5 + $0x8] sm:$0xff] %vm4022_vm5, %v3929_v31  ;;  %v4326_v60 = vpop.f32.mrf.mxu1 }
 0x5a1   : > { %v4438_v40 = vmax.f32 %v4332_v53, 0.0  ;;  %v4327_v30 = vadd.f32 %v7083_v27, %v4326_v60  ;;  %v4085_v61 = vld [vmem:[#allocation5 + $0xf0] sm:$0xff] }
 0x5a2   : > { %4823 = vmatprep.mubr.msk.f32.mxu1 %vm4103_vm6, %v4085_v61 }
 0x5a3   : > { %4470 = vst.msk [vmem:[%s7092_s27 + $0x68] sm:$0xff] %vm2357_vm12, %v4438_v40  ;;  %v4437_v52 = vmax.f32 %v4327_v30, 0.0  ;;  %v4055_v48 = vld [vmem:[#allocation5] sm:$0xff] }
 0x5a4   : > { %4778 = vmatprep.mubr.msk.f32.mxu0 %vm4103_vm6, %v4055_v48 }
 0x5a5   : > { %4469 = vst.msk [vmem:[%s7092_s27 + $0x60] sm:$0xff] %vm2357_vm12, %v4437_v52  ;;  %v4086_v50 = vld [vmem:[#allocation5 + $0xf8] sm:$0xff] }
 0x5a6   : > { %4824 = vmatmul.mubr.msk.f32.gmra.mxu1 %vm4103_vm6, %v4086_v50 }
 0x5a7   : > { %v4056_v16 = vld [vmem:[#allocation5 + $0x8] sm:$0xff] }
 0x5a8   : > { %4779 = vmatmul.mubr.msk.f32.vlgmr.msra.gmra.mxu0 %vm4103_vm6, %v4056_v16 }
 0x5b2   : > { %v4801_v15 = vpop.f32.mrf.mxu1 }
 0x5b3   : > { %v4342_v9 = vadd.f32 %v4801_v15, %v7083_v27 }
 0x5b4   : > { %v4336_v28 = vpop.f32.mrf.mxu1 }
 0x5b5   : > { %v4440_v11 = vmax.f32 %v4342_v9, 0.0  ;;  %v4337_v35 = vadd.f32 %v7083_v27, %v4336_v28 }
 0x5b7   : > { %4472 = vst.msk [vmem:[%s7092_s27 + $0x78] sm:$0xff] %vm2357_vm12, %v4440_v11  ;;  %v4439_v4 = vmax.f32 %v4337_v35, 0.0 }
 0x5b9   : > { %4471 = vst.msk [vmem:[%s7092_s27 + $0x70] sm:$0xff] %vm2357_vm12, %v4439_v4 }
 0x5c6   : > { %v4804_v7 = vpop.f32.mrf.mxu1 }
 0x5c7   : > { %v4352_v42 = vadd.f32 %v4804_v7, %v7083_v27 }
 0x5c8   : > { %v4346_v55 = vpop.f32.mrf.mxu1 }
 0x5c9   : > { %v4442_v8 = vmax.f32 %v4352_v42, 0.0  ;;  %v4347_v63 = vadd.f32 %v7083_v27, %v4346_v55 }
 0x5cb   : > { %4474 = vst.msk [vmem:[%s7092_s27 + $0x88] sm:$0xff] %vm2357_vm12, %v4442_v8  ;;  %v4441_v44 = vmax.f32 %v4347_v63, 0.0 }
 0x5cd   : > { %4473 = vst.msk [vmem:[%s7092_s27 + $0x80] sm:$0xff] %vm2357_vm12, %v4441_v44 }
 0x5da   : > { %v4807_v0 = vpop.f32.mrf.mxu1 }
 0x5db   : > { %v4362_v45 = vadd.f32 %v4807_v0, %v7083_v27 }
 0x5dc   : > { %v4356_v6 = vpop.f32.mrf.mxu1 }
 0x5dd   : > { %v4444_v49 = vmax.f32 %v4362_v45, 0.0  ;;  %v4357_v41 = vadd.f32 %v7083_v27, %v4356_v6 }
 0x5df   : > { %4476 = vst.msk [vmem:[%s7092_s27 + $0x98] sm:$0xff] %vm2357_vm12, %v4444_v49  ;;  %v4443_v57 = vmax.f32 %v4357_v41, 0.0 }
 0x5e1   : > { %4475 = vst.msk [vmem:[%s7092_s27 + $0x90] sm:$0xff] %vm2357_vm12, %v4443_v57 }
 0x5ee   : > { %v4810_v23 = vpop.f32.mrf.mxu1 }
 0x5ef   : > { %v4372_v21 = vadd.f32 %v4810_v23, %v7083_v27 }
 0x5f0   : > { %v4366_v59 = vpop.f32.mrf.mxu1 }
 0x5f1   : > { %v4446_v17 = vmax.f32 %v4372_v21, 0.0  ;;  %v4367_v2 = vadd.f32 %v7083_v27, %v4366_v59 }
 0x5f3   : > { %4478 = vst.msk [vmem:[%s7092_s27 + $0xa8] sm:$0xff] %vm2357_vm12, %v4446_v17  ;;  %v4445_v5 = vmax.f32 %v4367_v2, 0.0 }
 0x5f5   : > { %4477 = vst.msk [vmem:[%s7092_s27 + $0xa0] sm:$0xff] %vm2357_vm12, %v4445_v5 }
 0x602   : > { %v4813_v34 = vpop.f32.mrf.mxu1 }
 0x603   : > { %v4382_v12 = vadd.f32 %v4813_v34, %v7083_v27 }
 0x604   : > { %v4376_v10 = vpop.f32.mrf.mxu1 }
 0x605   : > { %v4448_v39 = vmax.f32 %v4382_v12, 0.0  ;;  %v4377_v26 = vadd.f32 %v7083_v27, %v4376_v10 }
 0x607   : > { %4480 = vst.msk [vmem:[%s7092_s27 + $0xb8] sm:$0xff] %vm2357_vm12, %v4448_v39  ;;  %v4447_v43 = vmax.f32 %v4377_v26, 0.0 }
 0x609   : > { %4479 = vst.msk [vmem:[%s7092_s27 + $0xb0] sm:$0xff] %vm2357_vm12, %v4447_v43 }
 0x616   : > { %v4816_v36 = vpop.f32.mrf.mxu1 }
 0x617   : > { %v4392_v22 = vadd.f32 %v4816_v36, %v7083_v27 }
 0x618   : > { %v4386_v29 = vpop.f32.mrf.mxu1 }
 0x619   : > { %v4450_v14 = vmax.f32 %v4392_v22, 0.0  ;;  %v4387_v13 = vadd.f32 %v7083_v27, %v4386_v29 }
 0x61b   : > { %4482 = vst.msk [vmem:[%s7092_s27 + $0xc8] sm:$0xff] %vm2357_vm12, %v4450_v14  ;;  %v4449_v33 = vmax.f32 %v4387_v13, 0.0 }
 0x61d   : > { %4481 = vst.msk [vmem:[%s7092_s27 + $0xc0] sm:$0xff] %vm2357_vm12, %v4449_v33 }
 0x630   : > { %v4819_v51 = vpop.f32.mrf.mxu1 }
 0x631   : > { %v4402_v47 = vadd.f32 %v4819_v51, %v7083_v27 }
 0x632   : > { %v4396_v38 = vpop.f32.mrf.mxu1 }
 0x633   : > { %v4452_v58 = vmax.f32 %v4402_v47, 0.0  ;;  %v4397_v19 = vadd.f32 %v7083_v27, %v4396_v38 }
 0x635   : > { %4484 = vst.msk [vmem:[%s7092_s27 + $0xd8] sm:$0xff] %vm2357_vm12, %v4452_v58  ;;  %v4451_v46 = vmax.f32 %v4397_v19, 0.0 }
 0x637   : > { %4483 = vst.msk [vmem:[%s7092_s27 + $0xd0] sm:$0xff] %vm2357_vm12, %v4451_v46 }
 0x64a   : > { %v4822_v54 = vpop.f32.mrf.mxu1 }
 0x64b   : > { %v4412_v1 = vadd.f32 %v4822_v54, %v7083_v27 }
 0x64c   : > { %v4406_v18 = vpop.f32.mrf.mxu1 }
 0x64d   : > { %v4454_v32 = vmax.f32 %v4412_v1, 0.0  ;;  %v4407_v20 = vadd.f32 %v7083_v27, %v4406_v18 }
 0x64f   : > { %4486 = vst.msk [vmem:[%s7092_s27 + $0xe8] sm:$0xff] %vm2357_vm12, %v4454_v32  ;;  %v4453_v37 = vmax.f32 %v4407_v20, 0.0 }
 0x651   : > { %4485 = vst.msk [vmem:[%s7092_s27 + $0xe0] sm:$0xff] %vm2357_vm12, %v4453_v37 }
 0x666   : > { %v4825_v25 = vpop.f32.mrf.mxu1 }
 0x667   : > { %v4422_v24 = vadd.f32 %v4825_v25, %v7083_v27 }
 0x668   : > { %v4780_v62 = vpop.f32.mrf.mxu0  ;;  %v4416_v56 = vpop.f32.mrf.mxu1 }
 0x669   : > { %v4456_v3 = vmax.f32 %v4422_v24, 0.0  ;;  %v4272_v53 = vadd.f32 %v4780_v62, %v7083_v27  ;;  %v4417_v31 = vadd.f32 %v7083_v27, %v4416_v56 }
 0x66a   : > { %v4266_v60 = vpop.f32.mrf.mxu0 }
 0x66b   : > { %4488 = vst.msk [vmem:[%s7092_s27 + $0xf8] sm:$0xff] %vm2357_vm12, %v4456_v3  ;;  %v4426_v40 = vmax.f32 %v4272_v53, 0.0  ;;  %v4455_v30 = vmax.f32 %v4417_v31, 0.0  ;;  %v4267_v61 = vadd.f32 %v7083_v27, %v4266_v60 }
 0x66d   : > { %4458 = vst.msk [vmem:[%s7092_s27 + $0x8] sm:$0xff] %vm2357_vm12, %v4426_v40  ;;  %4487 = vst.msk [vmem:[%s7092_s27 + $0xf0] sm:$0xff] %vm2357_vm12, %v4455_v30  ;;  %v4425_v52 = vmax.f32 %v4267_v61, 0.0 }
 0x66f   : > { %4457 = vst.msk [vmem:[%s7092_s27] sm:$0xff] %vm2357_vm12, %v4425_v52 }
 0x670 PF: > { %s15_s18 = sadd.s32 1, %s4871_s18  }
 0x671   : > { %p12_p4 = scmp.ge.s32.totalorder %s15_s18, 4  }
 0x673   :  { %14 = sbr.rel (!%p12_p4) target bundleno = 1 (0x1), region = 74 }

</bundles_post_ra>
